<compile_context>
chip_gen: v7x
topology: tpu7x:2x2x1
jax: 0.10.0
libtpu: 0.0.40
codegen_flags: <defaults>
</compile_context>

<pallas_src>
import math

import jax
import jax.numpy as jnp
from jax import lax
from jax.experimental import pallas as pl
from jax.experimental.pallas import tpu as pltpu

# ---------------- config (small shapes consistent with the module) ----------
BATCH = 2
SEQ = 8
HIDDEN = 32            # bert_output_dim (word_embeddings.weight.size(1))
NUM_HEADS = 4
HEAD_DIM = HIDDEN // NUM_HEADS
INTERMEDIATE = 64
NUM_LAYERS = 2
VOCAB = 100
MAX_POS = 16
TYPE_VOCAB = 2         # standard BERT; enables the vectorized 2-way select
OUTPUT_DIM = 16        # output_dim, add_linear=True
LN_EPS = 1e-12
ROWS = BATCH * SEQ     # batch flattened into the row (sublane) dimension


def _layer_norm(x, g, b):
    mu = jnp.mean(x, axis=-1, keepdims=True)
    var = jnp.mean(jnp.square(x - mu), axis=-1, keepdims=True)
    return (x - mu) * lax.rsqrt(var + LN_EPS) * g + b


def _gelu(x):
    # TODO(synk): HF BERT's default 'gelu' is the exact erf form; tanh approx
    # used here (difference ~1e-3 relative).
    c = math.sqrt(2.0 / math.pi)
    return 0.5 * x * (1.0 + jnp.tanh(c * (x + 0.044715 * x * x * x)))


def _bf16(x):
    return x.astype(jnp.bfloat16)


# ---------------- fused forward kernel ---------------------------------------

def fused_bert_kernel(tok_ref, seg_ref, amask_ref,
                      word_ref, pos_ref, type_ref, embg_ref, embb_ref,
                      wqkv_ref, bqkv_ref, wo_ref, bo_ref,
                      ln1g_ref, ln1b_ref, w1_ref, b1_ref, w2_ref, b2_ref,
                      ln2g_ref, ln2b_ref,
                      wp_ref, bp_ref, wl_ref, bl_ref,
                      out_ref, emb_buf, ctx_buf):
    # ---- word-embedding gather (token ids in SMEM index the VMEM table) ----
    for r in range(ROWS):                       # 16 rows, static unroll
        b, s = divmod(r, SEQ)
        tok = tok_ref[b, s]                     # SMEM scalar read
        emb_buf[pl.ds(r, 1), :] = word_ref[tok]  # dynamic leading-axis load

    # position embeddings: one static (SEQ, H) slice, tiled across the batch
    pos_blk = pos_ref[pl.ds(0, SEQ), :]                       # (SEQ, H)
    pos_all = jnp.concatenate([pos_blk] * BATCH, axis=0)      # (ROWS, H)

    # token-type embeddings: vectorized select between the two type rows
    seg_col = seg_ref[...]                                    # (ROWS, 1) f32
    t0 = type_ref[0]                                          # (1, H)
    t1 = type_ref[1]                                          # (1, H)
    type_all = t0 + seg_col * (t1 - t0)                       # (ROWS, H)

    emb = emb_buf[...] + pos_all + type_all
    hidden = _layer_norm(emb, embg_ref[...], embb_ref[...])   # (ROWS, H) f32
    scale = 1.0 / math.sqrt(HEAD_DIM)

    # ---- transformer layers (weights stacked on a leading layer axis) ------
    for l in range(NUM_LAYERS):
        x = hidden

        # fused QKV projection over all rows: (ROWS, H) @ (H, 3H)
        qkv = jnp.dot(_bf16(x), wqkv_ref[l],
                      preferred_element_type=jnp.float32) + bqkv_ref[l]
        q = qkv[:, 0:HIDDEN]
        k = qkv[:, HIDDEN:2 * HIDDEN]
        v = qkv[:, 2 * HIDDEN:3 * HIDDEN]

        # attention scores/softmax per (batch, head); contexts assembled into
        # ctx_buf so the output projection is a single Wo matmul over all rows.
        for b in range(BATCH):
            r0 = b * SEQ
            mrow = amask_ref[pl.ds(b, 1), :]                  # (1, SEQ) additive
            qb = q[r0:r0 + SEQ, :]
            kb = k[r0:r0 + SEQ, :]
            vb = v[r0:r0 + SEQ, :]
            for h in range(NUM_HEADS):
                c0 = h * HEAD_DIM
                qh = qb[:, c0:c0 + HEAD_DIM]
                kh = kb[:, c0:c0 + HEAD_DIM]
                vh = vb[:, c0:c0 + HEAD_DIM]
                # scores = qh @ kh.T  (contract last dims, no explicit transpose)
                sc = lax.dot_general(qh, kh, (((1,), (1,)), ((), ())),
                                     preferred_element_type=jnp.float32)
                sc = sc * scale + mrow
                sc = sc - jnp.max(sc, axis=-1, keepdims=True)
                p = jnp.exp(sc)
                p = p * pl.reciprocal(jnp.sum(p, axis=-1, keepdims=True),
                                      approx=True)
                ctx = jnp.dot(p, vh, preferred_element_type=jnp.float32)
                ctx_buf[pl.ds(r0, SEQ), pl.ds(c0, HEAD_DIM)] = ctx

        attn = jnp.dot(_bf16(ctx_buf[...]), wo_ref[l],
                       preferred_element_type=jnp.float32) + bo_ref[l]
        h1 = _layer_norm(x + attn, ln1g_ref[l], ln1b_ref[l])

        ff = _gelu(jnp.dot(_bf16(h1), w1_ref[l],
                           preferred_element_type=jnp.float32) + b1_ref[l])
        ff2 = jnp.dot(_bf16(ff), w2_ref[l],
                      preferred_element_type=jnp.float32) + b2_ref[l]
        hidden = _layer_norm(h1 + ff2, ln2g_ref[l], ln2b_ref[l])

    # ---- pooler (tanh on CLS) + additional_linear (dropout = identity) -----
    # only the BATCH CLS rows go through the pooler / linear head.
    cls_rows = jnp.concatenate(
        [hidden[b * SEQ:b * SEQ + 1, :] for b in range(BATCH)], axis=0)
    pooled = jnp.tanh(jnp.dot(_bf16(cls_rows), wp_ref[...],
                              preferred_element_type=jnp.float32) + bp_ref[...])
    out = jnp.dot(_bf16(pooled), wl_ref[...],
                  preferred_element_type=jnp.float32) + bl_ref[...]
    out_ref[...] = out                                  # single full-tile store


# ---------------- wrapper -----------------------------------------------------

def bert_encoder_forward(params, token_ids, segment_ids, attention_mask):
    amask = (1.0 - attention_mask.astype(jnp.float32)) * -10000.0     # (B, S)
    seg_col = segment_ids.astype(jnp.float32).reshape(ROWS, 1)        # (B*S, 1)

    args = [
        token_ids.astype(jnp.int32), seg_col, amask,
        params["word_emb"], params["pos_emb"], params["type_emb"],
        params["emb_ln_g"], params["emb_ln_b"],
        _bf16(params["wqkv"]), params["bqkv"],
        _bf16(params["wo"]), params["bo"],
        params["ln1_g"], params["ln1_b"],
        _bf16(params["w1"]), params["b1"],
        _bf16(params["w2"]), params["b2"],
        params["ln2_g"], params["ln2_b"],
        _bf16(params["pooler_w"]), params["pooler_b"],
        _bf16(params["addl_w"]), params["addl_b"],
    ]

    smem = pl.BlockSpec(memory_space=pltpu.MemorySpace.SMEM)
    vmem = pl.BlockSpec(memory_space=pltpu.MemorySpace.VMEM)
    in_specs = [smem] + [vmem] * (len(args) - 1)

    # Advisory cost estimate so XLA can overlap the (tiny) custom call.
    flops_layer = (2 * ROWS * HIDDEN * 3 * HIDDEN                        # QKV
                   + BATCH * NUM_HEADS * 2 * (2 * SEQ * SEQ * HEAD_DIM)  # scores+PV
                   + 2 * ROWS * HIDDEN * HIDDEN                          # Wo
                   + 2 * 2 * ROWS * HIDDEN * INTERMEDIATE)               # FFN
    flops = (NUM_LAYERS * flops_layer
             + 2 * BATCH * HIDDEN * HIDDEN + 2 * BATCH * HIDDEN * OUTPUT_DIM)
    transcendentals = (NUM_LAYERS * (BATCH * NUM_HEADS * SEQ * SEQ
                                     + ROWS * INTERMEDIATE)
                       + BATCH * HIDDEN)
    bytes_accessed = (sum(int(a.size) * a.dtype.itemsize for a in args)
                      + BATCH * OUTPUT_DIM * 4)

    return pl.pallas_call(
        fused_bert_kernel,
        out_shape=jax.ShapeDtypeStruct((BATCH, OUTPUT_DIM), jnp.float32),
        in_specs=in_specs,
        out_specs=pl.BlockSpec(memory_space=pltpu.MemorySpace.VMEM),
        scratch_shapes=[pltpu.VMEM((ROWS, HIDDEN), jnp.float32),   # emb_buf
                        pltpu.VMEM((ROWS, HIDDEN), jnp.float32)],  # ctx_buf
        cost_estimate=pl.CostEstimate(flops=int(flops),
                                      transcendentals=int(transcendentals),
                                      bytes_accessed=int(bytes_accessed)),
    )(*args)


# ---------------- parameters (deterministic synthetic init) ------------------

def init_params(key):
    keys = iter(jax.random.split(key, 32))

    def nrm(shape):
        return (0.02 * jax.random.normal(next(keys), shape)).astype(jnp.float32)

    def zeros(shape):
        return jnp.zeros(shape, jnp.float32)

    def ones(shape):
        return jnp.ones(shape, jnp.float32)

    L = NUM_LAYERS
    return {
        # word/type tables stored (N, 1, HIDDEN) for dynamic leading-axis gather;
        # position table stored (MAX_POS, HIDDEN) for a static block slice.
        "word_emb": nrm((VOCAB, 1, HIDDEN)),
        "pos_emb": nrm((MAX_POS, HIDDEN)),
        "type_emb": nrm((TYPE_VOCAB, 1, HIDDEN)),
        "emb_ln_g": ones((1, HIDDEN)), "emb_ln_b": zeros((1, HIDDEN)),
        # per-layer weights stacked on a leading layer axis; QKV fused
        "wqkv": nrm((L, HIDDEN, 3 * HIDDEN)), "bqkv": zeros((L, 1, 3 * HIDDEN)),
        "wo": nrm((L, HIDDEN, HIDDEN)), "bo": zeros((L, 1, HIDDEN)),
        "ln1_g": ones((L, 1, HIDDEN)), "ln1_b": zeros((L, 1, HIDDEN)),
        "w1": nrm((L, HIDDEN, INTERMEDIATE)), "b1": zeros((L, 1, INTERMEDIATE)),
        "w2": nrm((L, INTERMEDIATE, HIDDEN)), "b2": zeros((L, 1, HIDDEN)),
        "ln2_g": ones((L, 1, HIDDEN)), "ln2_b": zeros((L, 1, HIDDEN)),
        # pooler + additional_linear
        "pooler_w": nrm((HIDDEN, HIDDEN)), "pooler_b": zeros((1, HIDDEN)),
        "addl_w": nrm((HIDDEN, OUTPUT_DIM)), "addl_b": zeros((1, OUTPUT_DIM)),
    }


if __name__ == "__main__":
    key = jax.random.PRNGKey(0)
    pkey, tkey = jax.random.split(key)
    params = init_params(pkey)

    token_ids = jax.random.randint(tkey, (BATCH, SEQ), 0, VOCAB, dtype=jnp.int32)
    segment_ids = jnp.zeros((BATCH, SEQ), jnp.int32)
    attention_mask = jnp.ones((BATCH, SEQ), jnp.int32).at[1, 6:].set(0)

    out = bert_encoder_forward(params, token_ids, segment_ids, attention_mask)
    jax.block_until_ready(out)
    assert out.shape == (BATCH, OUTPUT_DIM) and out.dtype == jnp.float32
    print("KERNEL_OK")
</pallas_src>

<mosaic_0001>
module attributes {stable_mosaic.version = 11 : i64} {
  func.func @fused_bert_kernel(%arg0: memref<2x8xi32, #tpu.memory_space<smem>>, %arg1: memref<16x1xf32, #tpu.memory_space<vmem>>, %arg2: memref<2x8xf32, #tpu.memory_space<vmem>>, %arg3: memref<100x1x32xf32, #tpu.memory_space<vmem>>, %arg4: memref<16x32xf32, #tpu.memory_space<vmem>>, %arg5: memref<2x1x32xf32, #tpu.memory_space<vmem>>, %arg6: memref<1x32xf32, #tpu.memory_space<vmem>>, %arg7: memref<1x32xf32, #tpu.memory_space<vmem>>, %arg8: memref<2x32x96xbf16, #tpu.memory_space<vmem>>, %arg9: memref<2x1x96xf32, #tpu.memory_space<vmem>>, %arg10: memref<2x32x32xbf16, #tpu.memory_space<vmem>>, %arg11: memref<2x1x32xf32, #tpu.memory_space<vmem>>, %arg12: memref<2x1x32xf32, #tpu.memory_space<vmem>>, %arg13: memref<2x1x32xf32, #tpu.memory_space<vmem>>, %arg14: memref<2x32x64xbf16, #tpu.memory_space<vmem>>, %arg15: memref<2x1x64xf32, #tpu.memory_space<vmem>>, %arg16: memref<2x64x32xbf16, #tpu.memory_space<vmem>>, %arg17: memref<2x1x32xf32, #tpu.memory_space<vmem>>, %arg18: memref<2x1x32xf32, #tpu.memory_space<vmem>>, %arg19: memref<2x1x32xf32, #tpu.memory_space<vmem>>, %arg20: memref<32x32xbf16, #tpu.memory_space<vmem>>, %arg21: memref<1x32xf32, #tpu.memory_space<vmem>>, %arg22: memref<32x16xbf16, #tpu.memory_space<vmem>>, %arg23: memref<1x16xf32, #tpu.memory_space<vmem>>, %arg24: memref<2x16xf32, #tpu.memory_space<vmem>>, %arg25: memref<16x32xf32, #tpu.memory_space<vmem>>, %arg26: memref<16x32xf32, #tpu.memory_space<vmem>>) attributes {dimension_semantics = [], scalar_prefetch = 0 : i64, scratch_operands = 2 : i64, tpu.core_type = #tpu.core_type<tc>} {
    %c0 = arith.constant 0 : index
    %c0_0 = arith.constant 0 : index
    %0 = memref.load %arg0[%c0, %c0_0] : memref<2x8xi32, #tpu.memory_space<smem>>
    %1 = arith.index_cast %0 : i32 to index
    %c0_1 = arith.constant 0 : index
    %c0_2 = arith.constant 0 : index
    %2 = vector.load %arg3[%1, %c0_1, %c0_2] : memref<100x1x32xf32, #tpu.memory_space<vmem>>, vector<1x1x32xf32>
    %3 = vector.shape_cast %2 : vector<1x1x32xf32> to vector<1x32xf32>
    %c0_3 = arith.constant 0 : index
    %c0_4 = arith.constant 0 : index
    %4 = vector.load %arg25[%c0_3, %c0_4] : memref<16x32xf32, #tpu.memory_space<vmem>>, vector<1x32xf32>
    tpu.vector_store %arg25[%c0_3, %c0_4], %3 {strides = array<i32>} : memref<16x32xf32, #tpu.memory_space<vmem>>, vector<1x32xf32>,
    %c0_5 = arith.constant 0 : index
    %c1 = arith.constant 1 : index
    %5 = memref.load %arg0[%c0_5, %c1] : memref<2x8xi32, #tpu.memory_space<smem>>
    %6 = arith.index_cast %5 : i32 to index
    %c0_6 = arith.constant 0 : index
    %c0_7 = arith.constant 0 : index
    %7 = vector.load %arg3[%6, %c0_6, %c0_7] : memref<100x1x32xf32, #tpu.memory_space<vmem>>, vector<1x1x32xf32>
    %8 = vector.shape_cast %7 : vector<1x1x32xf32> to vector<1x32xf32>
    %c1_8 = arith.constant 1 : index
    %c0_9 = arith.constant 0 : index
    %9 = vector.load %arg25[%c1_8, %c0_9] : memref<16x32xf32, #tpu.memory_space<vmem>>, vector<1x32xf32>
    tpu.vector_store %arg25[%c1_8, %c0_9], %8 {strides = array<i32>} : memref<16x32xf32, #tpu.memory_space<vmem>>, vector<1x32xf32>,
    %c0_10 = arith.constant 0 : index
    %c2 = arith.constant 2 : index
    %10 = memref.load %arg0[%c0_10, %c2] : memref<2x8xi32, #tpu.memory_space<smem>>
    %11 = arith.index_cast %10 : i32 to index
    %c0_11 = arith.constant 0 : index
    %c0_12 = arith.constant 0 : index
    %12 = vector.load %arg3[%11, %c0_11, %c0_12] : memref<100x1x32xf32, #tpu.memory_space<vmem>>, vector<1x1x32xf32>
    %13 = vector.shape_cast %12 : vector<1x1x32xf32> to vector<1x32xf32>
    %c2_13 = arith.constant 2 : index
    %c0_14 = arith.constant 0 : index
    %14 = vector.load %arg25[%c2_13, %c0_14] : memref<16x32xf32, #tpu.memory_space<vmem>>, vector<1x32xf32>
    tpu.vector_store %arg25[%c2_13, %c0_14], %13 {strides = array<i32>} : memref<16x32xf32, #tpu.memory_space<vmem>>, vector<1x32xf32>,
    %c0_15 = arith.constant 0 : index
    %c3 = arith.constant 3 : index
    %15 = memref.load %arg0[%c0_15, %c3] : memref<2x8xi32, #tpu.memory_space<smem>>
    %16 = arith.index_cast %15 : i32 to index
    %c0_16 = arith.constant 0 : index
    %c0_17 = arith.constant 0 : index
    %17 = vector.load %arg3[%16, %c0_16, %c0_17] : memref<100x1x32xf32, #tpu.memory_space<vmem>>, vector<1x1x32xf32>
    %18 = vector.shape_cast %17 : vector<1x1x32xf32> to vector<1x32xf32>
    %c3_18 = arith.constant 3 : index
    %c0_19 = arith.constant 0 : index
    %19 = vector.load %arg25[%c3_18, %c0_19] : memref<16x32xf32, #tpu.memory_space<vmem>>, vector<1x32xf32>
    tpu.vector_store %arg25[%c3_18, %c0_19], %18 {strides = array<i32>} : memref<16x32xf32, #tpu.memory_space<vmem>>, vector<1x32xf32>,
    %c0_20 = arith.constant 0 : index
    %c4 = arith.constant 4 : index
    %20 = memref.load %arg0[%c0_20, %c4] : memref<2x8xi32, #tpu.memory_space<smem>>
    %21 = arith.index_cast %20 : i32 to index
    %c0_21 = arith.constant 0 : index
    %c0_22 = arith.constant 0 : index
    %22 = vector.load %arg3[%21, %c0_21, %c0_22] : memref<100x1x32xf32, #tpu.memory_space<vmem>>, vector<1x1x32xf32>
    %23 = vector.shape_cast %22 : vector<1x1x32xf32> to vector<1x32xf32>
    %c4_23 = arith.constant 4 : index
    %c0_24 = arith.constant 0 : index
    %24 = vector.load %arg25[%c4_23, %c0_24] : memref<16x32xf32, #tpu.memory_space<vmem>>, vector<1x32xf32>
    tpu.vector_store %arg25[%c4_23, %c0_24], %23 {strides = array<i32>} : memref<16x32xf32, #tpu.memory_space<vmem>>, vector<1x32xf32>,
    %c0_25 = arith.constant 0 : index
    %c5 = arith.constant 5 : index
    %25 = memref.load %arg0[%c0_25, %c5] : memref<2x8xi32, #tpu.memory_space<smem>>
    %26 = arith.index_cast %25 : i32 to index
    %c0_26 = arith.constant 0 : index
    %c0_27 = arith.constant 0 : index
    %27 = vector.load %arg3[%26, %c0_26, %c0_27] : memref<100x1x32xf32, #tpu.memory_space<vmem>>, vector<1x1x32xf32>
    %28 = vector.shape_cast %27 : vector<1x1x32xf32> to vector<1x32xf32>
    %c5_28 = arith.constant 5 : index
    %c0_29 = arith.constant 0 : index
    %29 = vector.load %arg25[%c5_28, %c0_29] : memref<16x32xf32, #tpu.memory_space<vmem>>, vector<1x32xf32>
    tpu.vector_store %arg25[%c5_28, %c0_29], %28 {strides = array<i32>} : memref<16x32xf32, #tpu.memory_space<vmem>>, vector<1x32xf32>,
    %c0_30 = arith.constant 0 : index
    %c6 = arith.constant 6 : index
    %30 = memref.load %arg0[%c0_30, %c6] : memref<2x8xi32, #tpu.memory_space<smem>>
    %31 = arith.index_cast %30 : i32 to index
    %c0_31 = arith.constant 0 : index
    %c0_32 = arith.constant 0 : index
    %32 = vector.load %arg3[%31, %c0_31, %c0_32] : memref<100x1x32xf32, #tpu.memory_space<vmem>>, vector<1x1x32xf32>
    %33 = vector.shape_cast %32 : vector<1x1x32xf32> to vector<1x32xf32>
    %c6_33 = arith.constant 6 : index
    %c0_34 = arith.constant 0 : index
    %34 = vector.load %arg25[%c6_33, %c0_34] : memref<16x32xf32, #tpu.memory_space<vmem>>, vector<1x32xf32>
    tpu.vector_store %arg25[%c6_33, %c0_34], %33 {strides = array<i32>} : memref<16x32xf32, #tpu.memory_space<vmem>>, vector<1x32xf32>,
    %c0_35 = arith.constant 0 : index
    %c7 = arith.constant 7 : index
    %35 = memref.load %arg0[%c0_35, %c7] : memref<2x8xi32, #tpu.memory_space<smem>>
    %36 = arith.index_cast %35 : i32 to index
    %c0_36 = arith.constant 0 : index
    %c0_37 = arith.constant 0 : index
    %37 = vector.load %arg3[%36, %c0_36, %c0_37] : memref<100x1x32xf32, #tpu.memory_space<vmem>>, vector<1x1x32xf32>
    %38 = vector.shape_cast %37 : vector<1x1x32xf32> to vector<1x32xf32>
    %c7_38 = arith.constant 7 : index
    %c0_39 = arith.constant 0 : index
    %39 = vector.load %arg25[%c7_38, %c0_39] : memref<16x32xf32, #tpu.memory_space<vmem>>, vector<1x32xf32>
    tpu.vector_store %arg25[%c7_38, %c0_39], %38 {strides = array<i32>} : memref<16x32xf32, #tpu.memory_space<vmem>>, vector<1x32xf32>,
    %c1_40 = arith.constant 1 : index
    %c0_41 = arith.constant 0 : index
    %40 = memref.load %arg0[%c1_40, %c0_41] : memref<2x8xi32, #tpu.memory_space<smem>>
    %41 = arith.index_cast %40 : i32 to index
    %c0_42 = arith.constant 0 : index
    %c0_43 = arith.constant 0 : index
    %42 = vector.load %arg3[%41, %c0_42, %c0_43] : memref<100x1x32xf32, #tpu.memory_space<vmem>>, vector<1x1x32xf32>
    %43 = vector.shape_cast %42 : vector<1x1x32xf32> to vector<1x32xf32>
    %c8 = arith.constant 8 : index
    %c0_44 = arith.constant 0 : index
    %44 = vector.load %arg25[%c8, %c0_44] : memref<16x32xf32, #tpu.memory_space<vmem>>, vector<1x32xf32>
    tpu.vector_store %arg25[%c8, %c0_44], %43 {strides = array<i32>} : memref<16x32xf32, #tpu.memory_space<vmem>>, vector<1x32xf32>,
    %c1_45 = arith.constant 1 : index
    %c1_46 = arith.constant 1 : index
    %45 = memref.load %arg0[%c1_45, %c1_46] : memref<2x8xi32, #tpu.memory_space<smem>>
    %46 = arith.index_cast %45 : i32 to index
    %c0_47 = arith.constant 0 : index
    %c0_48 = arith.constant 0 : index
    %47 = vector.load %arg3[%46, %c0_47, %c0_48] : memref<100x1x32xf32, #tpu.memory_space<vmem>>, vector<1x1x32xf32>
    %48 = vector.shape_cast %47 : vector<1x1x32xf32> to vector<1x32xf32>
    %c9 = arith.constant 9 : index
    %c0_49 = arith.constant 0 : index
    %49 = vector.load %arg25[%c9, %c0_49] : memref<16x32xf32, #tpu.memory_space<vmem>>, vector<1x32xf32>
    tpu.vector_store %arg25[%c9, %c0_49], %48 {strides = array<i32>} : memref<16x32xf32, #tpu.memory_space<vmem>>, vector<1x32xf32>,
    %c1_50 = arith.constant 1 : index
    %c2_51 = arith.constant 2 : index
    %50 = memref.load %arg0[%c1_50, %c2_51] : memref<2x8xi32, #tpu.memory_space<smem>>
    %51 = arith.index_cast %50 : i32 to index
    %c0_52 = arith.constant 0 : index
    %c0_53 = arith.constant 0 : index
    %52 = vector.load %arg3[%51, %c0_52, %c0_53] : memref<100x1x32xf32, #tpu.memory_space<vmem>>, vector<1x1x32xf32>
    %53 = vector.shape_cast %52 : vector<1x1x32xf32> to vector<1x32xf32>
    %c10 = arith.constant 10 : index
    %c0_54 = arith.constant 0 : index
    %54 = vector.load %arg25[%c10, %c0_54] : memref<16x32xf32, #tpu.memory_space<vmem>>, vector<1x32xf32>
    tpu.vector_store %arg25[%c10, %c0_54], %53 {strides = array<i32>} : memref<16x32xf32, #tpu.memory_space<vmem>>, vector<1x32xf32>,
    %c1_55 = arith.constant 1 : index
    %c3_56 = arith.constant 3 : index
    %55 = memref.load %arg0[%c1_55, %c3_56] : memref<2x8xi32, #tpu.memory_space<smem>>
    %56 = arith.index_cast %55 : i32 to index
    %c0_57 = arith.constant 0 : index
    %c0_58 = arith.constant 0 : index
    %57 = vector.load %arg3[%56, %c0_57, %c0_58] : memref<100x1x32xf32, #tpu.memory_space<vmem>>, vector<1x1x32xf32>
    %58 = vector.shape_cast %57 : vector<1x1x32xf32> to vector<1x32xf32>
    %c11 = arith.constant 11 : index
    %c0_59 = arith.constant 0 : index
    %59 = vector.load %arg25[%c11, %c0_59] : memref<16x32xf32, #tpu.memory_space<vmem>>, vector<1x32xf32>
    tpu.vector_store %arg25[%c11, %c0_59], %58 {strides = array<i32>} : memref<16x32xf32, #tpu.memory_space<vmem>>, vector<1x32xf32>,
    %c1_60 = arith.constant 1 : index
    %c4_61 = arith.constant 4 : index
    %60 = memref.load %arg0[%c1_60, %c4_61] : memref<2x8xi32, #tpu.memory_space<smem>>
    %61 = arith.index_cast %60 : i32 to index
    %c0_62 = arith.constant 0 : index
    %c0_63 = arith.constant 0 : index
    %62 = vector.load %arg3[%61, %c0_62, %c0_63] : memref<100x1x32xf32, #tpu.memory_space<vmem>>, vector<1x1x32xf32>
    %63 = vector.shape_cast %62 : vector<1x1x32xf32> to vector<1x32xf32>
    %c12 = arith.constant 12 : index
    %c0_64 = arith.constant 0 : index
    %64 = vector.load %arg25[%c12, %c0_64] : memref<16x32xf32, #tpu.memory_space<vmem>>, vector<1x32xf32>
    tpu.vector_store %arg25[%c12, %c0_64], %63 {strides = array<i32>} : memref<16x32xf32, #tpu.memory_space<vmem>>, vector<1x32xf32>,
    %c1_65 = arith.constant 1 : index
    %c5_66 = arith.constant 5 : index
    %65 = memref.load %arg0[%c1_65, %c5_66] : memref<2x8xi32, #tpu.memory_space<smem>>
    %66 = arith.index_cast %65 : i32 to index
    %c0_67 = arith.constant 0 : index
    %c0_68 = arith.constant 0 : index
    %67 = vector.load %arg3[%66, %c0_67, %c0_68] : memref<100x1x32xf32, #tpu.memory_space<vmem>>, vector<1x1x32xf32>
    %68 = vector.shape_cast %67 : vector<1x1x32xf32> to vector<1x32xf32>
    %c13 = arith.constant 13 : index
    %c0_69 = arith.constant 0 : index
    %69 = vector.load %arg25[%c13, %c0_69] : memref<16x32xf32, #tpu.memory_space<vmem>>, vector<1x32xf32>
    tpu.vector_store %arg25[%c13, %c0_69], %68 {strides = array<i32>} : memref<16x32xf32, #tpu.memory_space<vmem>>, vector<1x32xf32>,
    %c1_70 = arith.constant 1 : index
    %c6_71 = arith.constant 6 : index
    %70 = memref.load %arg0[%c1_70, %c6_71] : memref<2x8xi32, #tpu.memory_space<smem>>
    %71 = arith.index_cast %70 : i32 to index
    %c0_72 = arith.constant 0 : index
    %c0_73 = arith.constant 0 : index
    %72 = vector.load %arg3[%71, %c0_72, %c0_73] : memref<100x1x32xf32, #tpu.memory_space<vmem>>, vector<1x1x32xf32>
    %73 = vector.shape_cast %72 : vector<1x1x32xf32> to vector<1x32xf32>
    %c14 = arith.constant 14 : index
    %c0_74 = arith.constant 0 : index
    %74 = vector.load %arg25[%c14, %c0_74] : memref<16x32xf32, #tpu.memory_space<vmem>>, vector<1x32xf32>
    tpu.vector_store %arg25[%c14, %c0_74], %73 {strides = array<i32>} : memref<16x32xf32, #tpu.memory_space<vmem>>, vector<1x32xf32>,
    %c1_75 = arith.constant 1 : index
    %c7_76 = arith.constant 7 : index
    %75 = memref.load %arg0[%c1_75, %c7_76] : memref<2x8xi32, #tpu.memory_space<smem>>
    %76 = arith.index_cast %75 : i32 to index
    %c0_77 = arith.constant 0 : index
    %c0_78 = arith.constant 0 : index
    %77 = vector.load %arg3[%76, %c0_77, %c0_78] : memref<100x1x32xf32, #tpu.memory_space<vmem>>, vector<1x1x32xf32>
    %78 = vector.shape_cast %77 : vector<1x1x32xf32> to vector<1x32xf32>
    %c15 = arith.constant 15 : index
    %c0_79 = arith.constant 0 : index
    %79 = vector.load %arg25[%c15, %c0_79] : memref<16x32xf32, #tpu.memory_space<vmem>>, vector<1x32xf32>
    tpu.vector_store %arg25[%c15, %c0_79], %78 {strides = array<i32>} : memref<16x32xf32, #tpu.memory_space<vmem>>, vector<1x32xf32>,
    %c0_80 = arith.constant 0 : index
    %c0_81 = arith.constant 0 : index
    %80 = vector.load %arg4[%c0_80, %c0_81] : memref<16x32xf32, #tpu.memory_space<vmem>>, vector<8x32xf32>
    %81 = tpu.concatenate %80, %80 in 0 : vector<8x32xf32>, vector<8x32xf32> -> vector<16x32xf32>
    %c0_82 = arith.constant 0 : index
    %c0_83 = arith.constant 0 : index
    %82 = vector.load %arg1[%c0_82, %c0_83] : memref<16x1xf32, #tpu.memory_space<vmem>>, vector<16x1xf32>
    %c0_84 = arith.constant 0 : index
    %c0_85 = arith.constant 0 : index
    %c0_86 = arith.constant 0 : index
    %83 = vector.load %arg5[%c0_84, %c0_85, %c0_86] : memref<2x1x32xf32, #tpu.memory_space<vmem>>, vector<1x1x32xf32>
    %84 = vector.shape_cast %83 : vector<1x1x32xf32> to vector<1x32xf32>
    %c1_87 = arith.constant 1 : index
    %c0_88 = arith.constant 0 : index
    %c0_89 = arith.constant 0 : index
    %85 = vector.load %arg5[%c1_87, %c0_88, %c0_89] : memref<2x1x32xf32, #tpu.memory_space<vmem>>, vector<1x1x32xf32>
    %86 = vector.shape_cast %85 : vector<1x1x32xf32> to vector<1x32xf32>
    %87 = arith.subf %86, %84 : vector<1x32xf32>
    %88 = vector.broadcast %82 : vector<16x1xf32> to vector<16x32xf32>
    %89 = vector.broadcast %87 : vector<1x32xf32> to vector<16x32xf32>
    %90 = arith.mulf %88, %89 : vector<16x32xf32>
    %91 = vector.broadcast %84 : vector<1x32xf32> to vector<16x32xf32>
    %92 = arith.addf %91, %90 : vector<16x32xf32>
    %c0_90 = arith.constant 0 : index
    %c0_91 = arith.constant 0 : index
    %93 = vector.load %arg25[%c0_90, %c0_91] : memref<16x32xf32, #tpu.memory_space<vmem>>, vector<16x32xf32>
    %94 = arith.addf %93, %81 : vector<16x32xf32>
    %95 = arith.addf %94, %92 : vector<16x32xf32>
    %c0_92 = arith.constant 0 : index
    %c0_93 = arith.constant 0 : index
    %96 = vector.load %arg6[%c0_92, %c0_93] : memref<1x32xf32, #tpu.memory_space<vmem>>, vector<1x32xf32>
    %c0_94 = arith.constant 0 : index
    %c0_95 = arith.constant 0 : index
    %97 = vector.load %arg7[%c0_94, %c0_95] : memref<1x32xf32, #tpu.memory_space<vmem>>, vector<1x32xf32>
    %cst = arith.constant dense<0.000000e+00> : vector<16xf32>
    %98 = vector.multi_reduction <add>, %95, %cst [1] : vector<16x32xf32> to vector<16xf32>
    %99 = vector.shape_cast %98 : vector<16xf32> to vector<16x1xf32>
    %cst_96 = arith.constant 3.200000e+01 : f32
    %100 = vector.broadcast %cst_96 : f32 to vector<16x1xf32>
    %101 = arith.divf %99, %100 : vector<16x1xf32>
    %102 = vector.broadcast %101 : vector<16x1xf32> to vector<16x32xf32>
    %103 = arith.subf %95, %102 : vector<16x32xf32>
    %104 = arith.mulf %103, %103 : vector<16x32xf32>
    %cst_97 = arith.constant dense<0.000000e+00> : vector<16xf32>
    %105 = vector.multi_reduction <add>, %104, %cst_97 [1] : vector<16x32xf32> to vector<16xf32>
    %106 = vector.shape_cast %105 : vector<16xf32> to vector<16x1xf32>
    %cst_98 = arith.constant 3.200000e+01 : f32
    %107 = vector.broadcast %cst_98 : f32 to vector<16x1xf32>
    %108 = arith.divf %106, %107 : vector<16x1xf32>
    %109 = vector.broadcast %101 : vector<16x1xf32> to vector<16x32xf32>
    %110 = arith.subf %95, %109 : vector<16x32xf32>
    %cst_99 = arith.constant 9.99999996E-13 : f32
    %111 = vector.broadcast %cst_99 : f32 to vector<16x1xf32>
    %112 = arith.addf %108, %111 : vector<16x1xf32>
    %113 = math.rsqrt %112 : vector<16x1xf32>
    %114 = vector.broadcast %113 : vector<16x1xf32> to vector<16x32xf32>
    %115 = arith.mulf %110, %114 : vector<16x32xf32>
    %116 = vector.broadcast %96 : vector<1x32xf32> to vector<16x32xf32>
    %117 = arith.mulf %115, %116 : vector<16x32xf32>
    %118 = vector.broadcast %97 : vector<1x32xf32> to vector<16x32xf32>
    %119 = arith.addf %117, %118 : vector<16x32xf32>
    %120 = arith.truncf %119 : vector<16x32xf32> to vector<16x32xbf16>
    %c0_100 = arith.constant 0 : index
    %c0_101 = arith.constant 0 : index
    %c0_102 = arith.constant 0 : index
    %121 = vector.load %arg8[%c0_100, %c0_101, %c0_102] : memref<2x32x96xbf16, #tpu.memory_space<vmem>>, vector<1x32x96xbf16>
    %122 = vector.shape_cast %121 : vector<1x32x96xbf16> to vector<32x96xbf16>
    %cst_103 = arith.constant dense<0.000000e+00> : vector<16x96xf32>
    %123 = tpu.matmul %120, %122, %cst_103 {dimension_numbers = #tpu.dot_dimension_numbers<[1], [0], [0], [1], [0, 0, 1, 1], [], []>} : vector<16x32xbf16>, vector<32x96xbf16>, vector<16x96xf32> -> vector<16x96xf32>
    %c0_104 = arith.constant 0 : index
    %c0_105 = arith.constant 0 : index
    %c0_106 = arith.constant 0 : index
    %124 = vector.load %arg9[%c0_104, %c0_105, %c0_106] : memref<2x1x96xf32, #tpu.memory_space<vmem>>, vector<1x1x96xf32>
    %125 = vector.shape_cast %124 : vector<1x1x96xf32> to vector<1x96xf32>
    %126 = vector.broadcast %125 : vector<1x96xf32> to vector<16x96xf32>
    %127 = arith.addf %123, %126 : vector<16x96xf32>
    %128 = vector.extract_strided_slice %127 {offsets = [0, 0], sizes = [16, 32], strides = [1, 1]} : vector<16x96xf32> to vector<16x32xf32>
    %129 = vector.extract_strided_slice %127 {offsets = [0, 32], sizes = [16, 32], strides = [1, 1]} : vector<16x96xf32> to vector<16x32xf32>
    %130 = vector.extract_strided_slice %127 {offsets = [0, 64], sizes = [16, 32], strides = [1, 1]} : vector<16x96xf32> to vector<16x32xf32>
    %c0_107 = arith.constant 0 : index
    %c0_108 = arith.constant 0 : index
    %131 = vector.load %arg2[%c0_107, %c0_108] : memref<2x8xf32, #tpu.memory_space<vmem>>, vector<1x8xf32>
    %132 = vector.extract_strided_slice %128 {offsets = [0, 0], sizes = [8, 32], strides = [1, 1]} : vector<16x32xf32> to vector<8x32xf32>
    %133 = vector.extract_strided_slice %129 {offsets = [0, 0], sizes = [8, 32], strides = [1, 1]} : vector<16x32xf32> to vector<8x32xf32>
    %134 = vector.extract_strided_slice %130 {offsets = [0, 0], sizes = [8, 32], strides = [1, 1]} : vector<16x32xf32> to vector<8x32xf32>
    %135 = vector.extract_strided_slice %132 {offsets = [0, 0], sizes = [8, 8], strides = [1, 1]} : vector<8x32xf32> to vector<8x8xf32>
    %136 = vector.extract_strided_slice %133 {offsets = [0, 0], sizes = [8, 8], strides = [1, 1]} : vector<8x32xf32> to vector<8x8xf32>
    %137 = vector.extract_strided_slice %134 {offsets = [0, 0], sizes = [8, 8], strides = [1, 1]} : vector<8x32xf32> to vector<8x8xf32>
    %cst_109 = arith.constant dense<0.000000e+00> : vector<8x8xf32>
    %138 = tpu.matmul %135, %136, %cst_109 {dimension_numbers = #tpu.dot_dimension_numbers<[1], [1], [0], [0], [0, 0, 1, 0], [], []>} : vector<8x8xf32>, vector<8x8xf32>, vector<8x8xf32> -> vector<8x8xf32>
    %cst_110 = arith.constant 0.353553385 : f32
    %139 = vector.broadcast %cst_110 : f32 to vector<8x8xf32>
    %140 = arith.mulf %138, %139 : vector<8x8xf32>
    %141 = vector.broadcast %131 : vector<1x8xf32> to vector<8x8xf32>
    %142 = arith.addf %140, %141 : vector<8x8xf32>
    %cst_111 = arith.constant dense<0xFF800000> : vector<8xf32>
    %143 = vector.multi_reduction <maximumf>, %142, %cst_111 [1] : vector<8x8xf32> to vector<8xf32>
    %144 = vector.shape_cast %143 : vector<8xf32> to vector<8x1xf32>
    %145 = vector.broadcast %144 : vector<8x1xf32> to vector<8x8xf32>
    %146 = arith.subf %142, %145 : vector<8x8xf32>
    %147 = math.exp %146 : vector<8x8xf32>
    %cst_112 = arith.constant dense<0.000000e+00> : vector<8xf32>
    %148 = vector.multi_reduction <add>, %147, %cst_112 [1] : vector<8x8xf32> to vector<8xf32>
    %149 = vector.shape_cast %148 : vector<8xf32> to vector<8x1xf32>
    %150 = tpu.reciprocal %149 {approx = true} : vector<8x1xf32> -> vector<8x1xf32>
    %151 = vector.broadcast %150 : vector<8x1xf32> to vector<8x8xf32>
    %152 = arith.mulf %147, %151 : vector<8x8xf32>
    %cst_113 = arith.constant dense<0.000000e+00> : vector<8x8xf32>
    %153 = tpu.matmul %152, %137, %cst_113 {dimension_numbers = #tpu.dot_dimension_numbers<[1], [0], [0], [1], [0, 0, 1, 1], [], []>} : vector<8x8xf32>, vector<8x8xf32>, vector<8x8xf32> -> vector<8x8xf32>
    %c0_114 = arith.constant 0 : index
    %c0_115 = arith.constant 0 : index
    %154 = vector.load %arg26[%c0_114, %c0_115] : memref<16x32xf32, #tpu.memory_space<vmem>>, vector<8x8xf32>
    tpu.vector_store %arg26[%c0_114, %c0_115], %153 {strides = array<i32>} : memref<16x32xf32, #tpu.memory_space<vmem>>, vector<8x8xf32>,
    %155 = vector.extract_strided_slice %132 {offsets = [0, 8], sizes = [8, 8], strides = [1, 1]} : vector<8x32xf32> to vector<8x8xf32>
    %156 = vector.extract_strided_slice %133 {offsets = [0, 8], sizes = [8, 8], strides = [1, 1]} : vector<8x32xf32> to vector<8x8xf32>
    %157 = vector.extract_strided_slice %134 {offsets = [0, 8], sizes = [8, 8], strides = [1, 1]} : vector<8x32xf32> to vector<8x8xf32>
    %cst_116 = arith.constant dense<0.000000e+00> : vector<8x8xf32>
    %158 = tpu.matmul %155, %156, %cst_116 {dimension_numbers = #tpu.dot_dimension_numbers<[1], [1], [0], [0], [0, 0, 1, 0], [], []>} : vector<8x8xf32>, vector<8x8xf32>, vector<8x8xf32> -> vector<8x8xf32>
    %cst_117 = arith.constant 0.353553385 : f32
    %159 = vector.broadcast %cst_117 : f32 to vector<8x8xf32>
    %160 = arith.mulf %158, %159 : vector<8x8xf32>
    %161 = vector.broadcast %131 : vector<1x8xf32> to vector<8x8xf32>
    %162 = arith.addf %160, %161 : vector<8x8xf32>
    %cst_118 = arith.constant dense<0xFF800000> : vector<8xf32>
    %163 = vector.multi_reduction <maximumf>, %162, %cst_118 [1] : vector<8x8xf32> to vector<8xf32>
    %164 = vector.shape_cast %163 : vector<8xf32> to vector<8x1xf32>
    %165 = vector.broadcast %164 : vector<8x1xf32> to vector<8x8xf32>
    %166 = arith.subf %162, %165 : vector<8x8xf32>
    %167 = math.exp %166 : vector<8x8xf32>
    %cst_119 = arith.constant dense<0.000000e+00> : vector<8xf32>
    %168 = vector.multi_reduction <add>, %167, %cst_119 [1] : vector<8x8xf32> to vector<8xf32>
    %169 = vector.shape_cast %168 : vector<8xf32> to vector<8x1xf32>
    %170 = tpu.reciprocal %169 {approx = true} : vector<8x1xf32> -> vector<8x1xf32>
    %171 = vector.broadcast %170 : vector<8x1xf32> to vector<8x8xf32>
    %172 = arith.mulf %167, %171 : vector<8x8xf32>
    %cst_120 = arith.constant dense<0.000000e+00> : vector<8x8xf32>
    %173 = tpu.matmul %172, %157, %cst_120 {dimension_numbers = #tpu.dot_dimension_numbers<[1], [0], [0], [1], [0, 0, 1, 1], [], []>} : vector<8x8xf32>, vector<8x8xf32>, vector<8x8xf32> -> vector<8x8xf32>
    %c0_121 = arith.constant 0 : index
    %c8_122 = arith.constant 8 : index
    %174 = vector.load %arg26[%c0_121, %c8_122] : memref<16x32xf32, #tpu.memory_space<vmem>>, vector<8x8xf32>
    tpu.vector_store %arg26[%c0_121, %c8_122], %173 {strides = array<i32>} : memref<16x32xf32, #tpu.memory_space<vmem>>, vector<8x8xf32>,
    %175 = vector.extract_strided_slice %132 {offsets = [0, 16], sizes = [8, 8], strides = [1, 1]} : vector<8x32xf32> to vector<8x8xf32>
    %176 = vector.extract_strided_slice %133 {offsets = [0, 16], sizes = [8, 8], strides = [1, 1]} : vector<8x32xf32> to vector<8x8xf32>
    %177 = vector.extract_strided_slice %134 {offsets = [0, 16], sizes = [8, 8], strides = [1, 1]} : vector<8x32xf32> to vector<8x8xf32>
    %cst_123 = arith.constant dense<0.000000e+00> : vector<8x8xf32>
    %178 = tpu.matmul %175, %176, %cst_123 {dimension_numbers = #tpu.dot_dimension_numbers<[1], [1], [0], [0], [0, 0, 1, 0], [], []>} : vector<8x8xf32>, vector<8x8xf32>, vector<8x8xf32> -> vector<8x8xf32>
    %cst_124 = arith.constant 0.353553385 : f32
    %179 = vector.broadcast %cst_124 : f32 to vector<8x8xf32>
    %180 = arith.mulf %178, %179 : vector<8x8xf32>
    %181 = vector.broadcast %131 : vector<1x8xf32> to vector<8x8xf32>
    %182 = arith.addf %180, %181 : vector<8x8xf32>
    %cst_125 = arith.constant dense<0xFF800000> : vector<8xf32>
    %183 = vector.multi_reduction <maximumf>, %182, %cst_125 [1] : vector<8x8xf32> to vector<8xf32>
    %184 = vector.shape_cast %183 : vector<8xf32> to vector<8x1xf32>
    %185 = vector.broadcast %184 : vector<8x1xf32> to vector<8x8xf32>
    %186 = arith.subf %182, %185 : vector<8x8xf32>
    %187 = math.exp %186 : vector<8x8xf32>
    %cst_126 = arith.constant dense<0.000000e+00> : vector<8xf32>
    %188 = vector.multi_reduction <add>, %187, %cst_126 [1] : vector<8x8xf32> to vector<8xf32>
    %189 = vector.shape_cast %188 : vector<8xf32> to vector<8x1xf32>
    %190 = tpu.reciprocal %189 {approx = true} : vector<8x1xf32> -> vector<8x1xf32>
    %191 = vector.broadcast %190 : vector<8x1xf32> to vector<8x8xf32>
    %192 = arith.mulf %187, %191 : vector<8x8xf32>
    %cst_127 = arith.constant dense<0.000000e+00> : vector<8x8xf32>
    %193 = tpu.matmul %192, %177, %cst_127 {dimension_numbers = #tpu.dot_dimension_numbers<[1], [0], [0], [1], [0, 0, 1, 1], [], []>} : vector<8x8xf32>, vector<8x8xf32>, vector<8x8xf32> -> vector<8x8xf32>
    %c0_128 = arith.constant 0 : index
    %c16 = arith.constant 16 : index
    %194 = vector.load %arg26[%c0_128, %c16] : memref<16x32xf32, #tpu.memory_space<vmem>>, vector<8x8xf32>
    tpu.vector_store %arg26[%c0_128, %c16], %193 {strides = array<i32>} : memref<16x32xf32, #tpu.memory_space<vmem>>, vector<8x8xf32>,
    %195 = vector.extract_strided_slice %132 {offsets = [0, 24], sizes = [8, 8], strides = [1, 1]} : vector<8x32xf32> to vector<8x8xf32>
    %196 = vector.extract_strided_slice %133 {offsets = [0, 24], sizes = [8, 8], strides = [1, 1]} : vector<8x32xf32> to vector<8x8xf32>
    %197 = vector.extract_strided_slice %134 {offsets = [0, 24], sizes = [8, 8], strides = [1, 1]} : vector<8x32xf32> to vector<8x8xf32>
    %cst_129 = arith.constant dense<0.000000e+00> : vector<8x8xf32>
    %198 = tpu.matmul %195, %196, %cst_129 {dimension_numbers = #tpu.dot_dimension_numbers<[1], [1], [0], [0], [0, 0, 1, 0], [], []>} : vector<8x8xf32>, vector<8x8xf32>, vector<8x8xf32> -> vector<8x8xf32>
    %cst_130 = arith.constant 0.353553385 : f32
    %199 = vector.broadcast %cst_130 : f32 to vector<8x8xf32>
    %200 = arith.mulf %198, %199 : vector<8x8xf32>
    %201 = vector.broadcast %131 : vector<1x8xf32> to vector<8x8xf32>
    %202 = arith.addf %200, %201 : vector<8x8xf32>
    %cst_131 = arith.constant dense<0xFF800000> : vector<8xf32>
    %203 = vector.multi_reduction <maximumf>, %202, %cst_131 [1] : vector<8x8xf32> to vector<8xf32>
    %204 = vector.shape_cast %203 : vector<8xf32> to vector<8x1xf32>
    %205 = vector.broadcast %204 : vector<8x1xf32> to vector<8x8xf32>
    %206 = arith.subf %202, %205 : vector<8x8xf32>
    %207 = math.exp %206 : vector<8x8xf32>
    %cst_132 = arith.constant dense<0.000000e+00> : vector<8xf32>
    %208 = vector.multi_reduction <add>, %207, %cst_132 [1] : vector<8x8xf32> to vector<8xf32>
    %209 = vector.shape_cast %208 : vector<8xf32> to vector<8x1xf32>
    %210 = tpu.reciprocal %209 {approx = true} : vector<8x1xf32> -> vector<8x1xf32>
    %211 = vector.broadcast %210 : vector<8x1xf32> to vector<8x8xf32>
    %212 = arith.mulf %207, %211 : vector<8x8xf32>
    %cst_133 = arith.constant dense<0.000000e+00> : vector<8x8xf32>
    %213 = tpu.matmul %212, %197, %cst_133 {dimension_numbers = #tpu.dot_dimension_numbers<[1], [0], [0], [1], [0, 0, 1, 1], [], []>} : vector<8x8xf32>, vector<8x8xf32>, vector<8x8xf32> -> vector<8x8xf32>
    %c0_134 = arith.constant 0 : index
    %c24 = arith.constant 24 : index
    %214 = vector.load %arg26[%c0_134, %c24] : memref<16x32xf32, #tpu.memory_space<vmem>>, vector<8x8xf32>
    tpu.vector_store %arg26[%c0_134, %c24], %213 {strides = array<i32>} : memref<16x32xf32, #tpu.memory_space<vmem>>, vector<8x8xf32>,
    %c1_135 = arith.constant 1 : index
    %c0_136 = arith.constant 0 : index
    %215 = vector.load %arg2[%c1_135, %c0_136] : memref<2x8xf32, #tpu.memory_space<vmem>>, vector<1x8xf32>
    %216 = vector.extract_strided_slice %128 {offsets = [8, 0], sizes = [8, 32], strides = [1, 1]} : vector<16x32xf32> to vector<8x32xf32>
    %217 = vector.extract_strided_slice %129 {offsets = [8, 0], sizes = [8, 32], strides = [1, 1]} : vector<16x32xf32> to vector<8x32xf32>
    %218 = vector.extract_strided_slice %130 {offsets = [8, 0], sizes = [8, 32], strides = [1, 1]} : vector<16x32xf32> to vector<8x32xf32>
    %219 = vector.extract_strided_slice %216 {offsets = [0, 0], sizes = [8, 8], strides = [1, 1]} : vector<8x32xf32> to vector<8x8xf32>
    %220 = vector.extract_strided_slice %217 {offsets = [0, 0], sizes = [8, 8], strides = [1, 1]} : vector<8x32xf32> to vector<8x8xf32>
    %221 = vector.extract_strided_slice %218 {offsets = [0, 0], sizes = [8, 8], strides = [1, 1]} : vector<8x32xf32> to vector<8x8xf32>
    %cst_137 = arith.constant dense<0.000000e+00> : vector<8x8xf32>
    %222 = tpu.matmul %219, %220, %cst_137 {dimension_numbers = #tpu.dot_dimension_numbers<[1], [1], [0], [0], [0, 0, 1, 0], [], []>} : vector<8x8xf32>, vector<8x8xf32>, vector<8x8xf32> -> vector<8x8xf32>
    %cst_138 = arith.constant 0.353553385 : f32
    %223 = vector.broadcast %cst_138 : f32 to vector<8x8xf32>
    %224 = arith.mulf %222, %223 : vector<8x8xf32>
    %225 = vector.broadcast %215 : vector<1x8xf32> to vector<8x8xf32>
    %226 = arith.addf %224, %225 : vector<8x8xf32>
    %cst_139 = arith.constant dense<0xFF800000> : vector<8xf32>
    %227 = vector.multi_reduction <maximumf>, %226, %cst_139 [1] : vector<8x8xf32> to vector<8xf32>
    %228 = vector.shape_cast %227 : vector<8xf32> to vector<8x1xf32>
    %229 = vector.broadcast %228 : vector<8x1xf32> to vector<8x8xf32>
    %230 = arith.subf %226, %229 : vector<8x8xf32>
    %231 = math.exp %230 : vector<8x8xf32>
    %cst_140 = arith.constant dense<0.000000e+00> : vector<8xf32>
    %232 = vector.multi_reduction <add>, %231, %cst_140 [1] : vector<8x8xf32> to vector<8xf32>
    %233 = vector.shape_cast %232 : vector<8xf32> to vector<8x1xf32>
    %234 = tpu.reciprocal %233 {approx = true} : vector<8x1xf32> -> vector<8x1xf32>
    %235 = vector.broadcast %234 : vector<8x1xf32> to vector<8x8xf32>
    %236 = arith.mulf %231, %235 : vector<8x8xf32>
    %cst_141 = arith.constant dense<0.000000e+00> : vector<8x8xf32>
    %237 = tpu.matmul %236, %221, %cst_141 {dimension_numbers = #tpu.dot_dimension_numbers<[1], [0], [0], [1], [0, 0, 1, 1], [], []>} : vector<8x8xf32>, vector<8x8xf32>, vector<8x8xf32> -> vector<8x8xf32>
    %c8_142 = arith.constant 8 : index
    %c0_143 = arith.constant 0 : index
    %238 = vector.load %arg26[%c8_142, %c0_143] : memref<16x32xf32, #tpu.memory_space<vmem>>, vector<8x8xf32>
    tpu.vector_store %arg26[%c8_142, %c0_143], %237 {strides = array<i32>} : memref<16x32xf32, #tpu.memory_space<vmem>>, vector<8x8xf32>,
    %239 = vector.extract_strided_slice %216 {offsets = [0, 8], sizes = [8, 8], strides = [1, 1]} : vector<8x32xf32> to vector<8x8xf32>
    %240 = vector.extract_strided_slice %217 {offsets = [0, 8], sizes = [8, 8], strides = [1, 1]} : vector<8x32xf32> to vector<8x8xf32>
    %241 = vector.extract_strided_slice %218 {offsets = [0, 8], sizes = [8, 8], strides = [1, 1]} : vector<8x32xf32> to vector<8x8xf32>
    %cst_144 = arith.constant dense<0.000000e+00> : vector<8x8xf32>
    %242 = tpu.matmul %239, %240, %cst_144 {dimension_numbers = #tpu.dot_dimension_numbers<[1], [1], [0], [0], [0, 0, 1, 0], [], []>} : vector<8x8xf32>, vector<8x8xf32>, vector<8x8xf32> -> vector<8x8xf32>
    %cst_145 = arith.constant 0.353553385 : f32
    %243 = vector.broadcast %cst_145 : f32 to vector<8x8xf32>
    %244 = arith.mulf %242, %243 : vector<8x8xf32>
    %245 = vector.broadcast %215 : vector<1x8xf32> to vector<8x8xf32>
    %246 = arith.addf %244, %245 : vector<8x8xf32>
    %cst_146 = arith.constant dense<0xFF800000> : vector<8xf32>
    %247 = vector.multi_reduction <maximumf>, %246, %cst_146 [1] : vector<8x8xf32> to vector<8xf32>
    %248 = vector.shape_cast %247 : vector<8xf32> to vector<8x1xf32>
    %249 = vector.broadcast %248 : vector<8x1xf32> to vector<8x8xf32>
    %250 = arith.subf %246, %249 : vector<8x8xf32>
    %251 = math.exp %250 : vector<8x8xf32>
    %cst_147 = arith.constant dense<0.000000e+00> : vector<8xf32>
    %252 = vector.multi_reduction <add>, %251, %cst_147 [1] : vector<8x8xf32> to vector<8xf32>
    %253 = vector.shape_cast %252 : vector<8xf32> to vector<8x1xf32>
    %254 = tpu.reciprocal %253 {approx = true} : vector<8x1xf32> -> vector<8x1xf32>
    %255 = vector.broadcast %254 : vector<8x1xf32> to vector<8x8xf32>
    %256 = arith.mulf %251, %255 : vector<8x8xf32>
    %cst_148 = arith.constant dense<0.000000e+00> : vector<8x8xf32>
    %257 = tpu.matmul %256, %241, %cst_148 {dimension_numbers = #tpu.dot_dimension_numbers<[1], [0], [0], [1], [0, 0, 1, 1], [], []>} : vector<8x8xf32>, vector<8x8xf32>, vector<8x8xf32> -> vector<8x8xf32>
    %c8_149 = arith.constant 8 : index
    %c8_150 = arith.constant 8 : index
    %258 = vector.load %arg26[%c8_149, %c8_150] : memref<16x32xf32, #tpu.memory_space<vmem>>, vector<8x8xf32>
    tpu.vector_store %arg26[%c8_149, %c8_150], %257 {strides = array<i32>} : memref<16x32xf32, #tpu.memory_space<vmem>>, vector<8x8xf32>,
    %259 = vector.extract_strided_slice %216 {offsets = [0, 16], sizes = [8, 8], strides = [1, 1]} : vector<8x32xf32> to vector<8x8xf32>
    %260 = vector.extract_strided_slice %217 {offsets = [0, 16], sizes = [8, 8], strides = [1, 1]} : vector<8x32xf32> to vector<8x8xf32>
    %261 = vector.extract_strided_slice %218 {offsets = [0, 16], sizes = [8, 8], strides = [1, 1]} : vector<8x32xf32> to vector<8x8xf32>
    %cst_151 = arith.constant dense<0.000000e+00> : vector<8x8xf32>
    %262 = tpu.matmul %259, %260, %cst_151 {dimension_numbers = #tpu.dot_dimension_numbers<[1], [1], [0], [0], [0, 0, 1, 0], [], []>} : vector<8x8xf32>, vector<8x8xf32>, vector<8x8xf32> -> vector<8x8xf32>
    %cst_152 = arith.constant 0.353553385 : f32
    %263 = vector.broadcast %cst_152 : f32 to vector<8x8xf32>
    %264 = arith.mulf %262, %263 : vector<8x8xf32>
    %265 = vector.broadcast %215 : vector<1x8xf32> to vector<8x8xf32>
    %266 = arith.addf %264, %265 : vector<8x8xf32>
    %cst_153 = arith.constant dense<0xFF800000> : vector<8xf32>
    %267 = vector.multi_reduction <maximumf>, %266, %cst_153 [1] : vector<8x8xf32> to vector<8xf32>
    %268 = vector.shape_cast %267 : vector<8xf32> to vector<8x1xf32>
    %269 = vector.broadcast %268 : vector<8x1xf32> to vector<8x8xf32>
    %270 = arith.subf %266, %269 : vector<8x8xf32>
    %271 = math.exp %270 : vector<8x8xf32>
    %cst_154 = arith.constant dense<0.000000e+00> : vector<8xf32>
    %272 = vector.multi_reduction <add>, %271, %cst_154 [1] : vector<8x8xf32> to vector<8xf32>
    %273 = vector.shape_cast %272 : vector<8xf32> to vector<8x1xf32>
    %274 = tpu.reciprocal %273 {approx = true} : vector<8x1xf32> -> vector<8x1xf32>
    %275 = vector.broadcast %274 : vector<8x1xf32> to vector<8x8xf32>
    %276 = arith.mulf %271, %275 : vector<8x8xf32>
    %cst_155 = arith.constant dense<0.000000e+00> : vector<8x8xf32>
    %277 = tpu.matmul %276, %261, %cst_155 {dimension_numbers = #tpu.dot_dimension_numbers<[1], [0], [0], [1], [0, 0, 1, 1], [], []>} : vector<8x8xf32>, vector<8x8xf32>, vector<8x8xf32> -> vector<8x8xf32>
    %c8_156 = arith.constant 8 : index
    %c16_157 = arith.constant 16 : index
    %278 = vector.load %arg26[%c8_156, %c16_157] : memref<16x32xf32, #tpu.memory_space<vmem>>, vector<8x8xf32>
    tpu.vector_store %arg26[%c8_156, %c16_157], %277 {strides = array<i32>} : memref<16x32xf32, #tpu.memory_space<vmem>>, vector<8x8xf32>,
    %279 = vector.extract_strided_slice %216 {offsets = [0, 24], sizes = [8, 8], strides = [1, 1]} : vector<8x32xf32> to vector<8x8xf32>
    %280 = vector.extract_strided_slice %217 {offsets = [0, 24], sizes = [8, 8], strides = [1, 1]} : vector<8x32xf32> to vector<8x8xf32>
    %281 = vector.extract_strided_slice %218 {offsets = [0, 24], sizes = [8, 8], strides = [1, 1]} : vector<8x32xf32> to vector<8x8xf32>
    %cst_158 = arith.constant dense<0.000000e+00> : vector<8x8xf32>
    %282 = tpu.matmul %279, %280, %cst_158 {dimension_numbers = #tpu.dot_dimension_numbers<[1], [1], [0], [0], [0, 0, 1, 0], [], []>} : vector<8x8xf32>, vector<8x8xf32>, vector<8x8xf32> -> vector<8x8xf32>
    %cst_159 = arith.constant 0.353553385 : f32
    %283 = vector.broadcast %cst_159 : f32 to vector<8x8xf32>
    %284 = arith.mulf %282, %283 : vector<8x8xf32>
    %285 = vector.broadcast %215 : vector<1x8xf32> to vector<8x8xf32>
    %286 = arith.addf %284, %285 : vector<8x8xf32>
    %cst_160 = arith.constant dense<0xFF800000> : vector<8xf32>
    %287 = vector.multi_reduction <maximumf>, %286, %cst_160 [1] : vector<8x8xf32> to vector<8xf32>
    %288 = vector.shape_cast %287 : vector<8xf32> to vector<8x1xf32>
    %289 = vector.broadcast %288 : vector<8x1xf32> to vector<8x8xf32>
    %290 = arith.subf %286, %289 : vector<8x8xf32>
    %291 = math.exp %290 : vector<8x8xf32>
    %cst_161 = arith.constant dense<0.000000e+00> : vector<8xf32>
    %292 = vector.multi_reduction <add>, %291, %cst_161 [1] : vector<8x8xf32> to vector<8xf32>
    %293 = vector.shape_cast %292 : vector<8xf32> to vector<8x1xf32>
    %294 = tpu.reciprocal %293 {approx = true} : vector<8x1xf32> -> vector<8x1xf32>
    %295 = vector.broadcast %294 : vector<8x1xf32> to vector<8x8xf32>
    %296 = arith.mulf %291, %295 : vector<8x8xf32>
    %cst_162 = arith.constant dense<0.000000e+00> : vector<8x8xf32>
    %297 = tpu.matmul %296, %281, %cst_162 {dimension_numbers = #tpu.dot_dimension_numbers<[1], [0], [0], [1], [0, 0, 1, 1], [], []>} : vector<8x8xf32>, vector<8x8xf32>, vector<8x8xf32> -> vector<8x8xf32>
    %c8_163 = arith.constant 8 : index
    %c24_164 = arith.constant 24 : index
    %298 = vector.load %arg26[%c8_163, %c24_164] : memref<16x32xf32, #tpu.memory_space<vmem>>, vector<8x8xf32>
    tpu.vector_store %arg26[%c8_163, %c24_164], %297 {strides = array<i32>} : memref<16x32xf32, #tpu.memory_space<vmem>>, vector<8x8xf32>,
    %c0_165 = arith.constant 0 : index
    %c0_166 = arith.constant 0 : index
    %299 = vector.load %arg26[%c0_165, %c0_166] : memref<16x32xf32, #tpu.memory_space<vmem>>, vector<16x32xf32>
    %300 = arith.truncf %299 : vector<16x32xf32> to vector<16x32xbf16>
    %c0_167 = arith.constant 0 : index
    %c0_168 = arith.constant 0 : index
    %c0_169 = arith.constant 0 : index
    %301 = vector.load %arg10[%c0_167, %c0_168, %c0_169] : memref<2x32x32xbf16, #tpu.memory_space<vmem>>, vector<1x32x32xbf16>
    %302 = vector.shape_cast %301 : vector<1x32x32xbf16> to vector<32x32xbf16>
    %cst_170 = arith.constant dense<0.000000e+00> : vector<16x32xf32>
    %303 = tpu.matmul %300, %302, %cst_170 {dimension_numbers = #tpu.dot_dimension_numbers<[1], [0], [0], [1], [0, 0, 1, 1], [], []>} : vector<16x32xbf16>, vector<32x32xbf16>, vector<16x32xf32> -> vector<16x32xf32>
    %c0_171 = arith.constant 0 : index
    %c0_172 = arith.constant 0 : index
    %c0_173 = arith.constant 0 : index
    %304 = vector.load %arg11[%c0_171, %c0_172, %c0_173] : memref<2x1x32xf32, #tpu.memory_space<vmem>>, vector<1x1x32xf32>
    %305 = vector.shape_cast %304 : vector<1x1x32xf32> to vector<1x32xf32>
    %306 = vector.broadcast %305 : vector<1x32xf32> to vector<16x32xf32>
    %307 = arith.addf %303, %306 : vector<16x32xf32>
    %308 = arith.addf %119, %307 : vector<16x32xf32>
    %c0_174 = arith.constant 0 : index
    %c0_175 = arith.constant 0 : index
    %c0_176 = arith.constant 0 : index
    %309 = vector.load %arg12[%c0_174, %c0_175, %c0_176] : memref<2x1x32xf32, #tpu.memory_space<vmem>>, vector<1x1x32xf32>
    %310 = vector.shape_cast %309 : vector<1x1x32xf32> to vector<1x32xf32>
    %c0_177 = arith.constant 0 : index
    %c0_178 = arith.constant 0 : index
    %c0_179 = arith.constant 0 : index
    %311 = vector.load %arg13[%c0_177, %c0_178, %c0_179] : memref<2x1x32xf32, #tpu.memory_space<vmem>>, vector<1x1x32xf32>
    %312 = vector.shape_cast %311 : vector<1x1x32xf32> to vector<1x32xf32>
    %cst_180 = arith.constant dense<0.000000e+00> : vector<16xf32>
    %313 = vector.multi_reduction <add>, %308, %cst_180 [1] : vector<16x32xf32> to vector<16xf32>
    %314 = vector.shape_cast %313 : vector<16xf32> to vector<16x1xf32>
    %cst_181 = arith.constant 3.200000e+01 : f32
    %315 = vector.broadcast %cst_181 : f32 to vector<16x1xf32>
    %316 = arith.divf %314, %315 : vector<16x1xf32>
    %317 = vector.broadcast %316 : vector<16x1xf32> to vector<16x32xf32>
    %318 = arith.subf %308, %317 : vector<16x32xf32>
    %319 = arith.mulf %318, %318 : vector<16x32xf32>
    %cst_182 = arith.constant dense<0.000000e+00> : vector<16xf32>
    %320 = vector.multi_reduction <add>, %319, %cst_182 [1] : vector<16x32xf32> to vector<16xf32>
    %321 = vector.shape_cast %320 : vector<16xf32> to vector<16x1xf32>
    %cst_183 = arith.constant 3.200000e+01 : f32
    %322 = vector.broadcast %cst_183 : f32 to vector<16x1xf32>
    %323 = arith.divf %321, %322 : vector<16x1xf32>
    %324 = vector.broadcast %316 : vector<16x1xf32> to vector<16x32xf32>
    %325 = arith.subf %308, %324 : vector<16x32xf32>
    %cst_184 = arith.constant 9.99999996E-13 : f32
    %326 = vector.broadcast %cst_184 : f32 to vector<16x1xf32>
    %327 = arith.addf %323, %326 : vector<16x1xf32>
    %328 = math.rsqrt %327 : vector<16x1xf32>
    %329 = vector.broadcast %328 : vector<16x1xf32> to vector<16x32xf32>
    %330 = arith.mulf %325, %329 : vector<16x32xf32>
    %331 = vector.broadcast %310 : vector<1x32xf32> to vector<16x32xf32>
    %332 = arith.mulf %330, %331 : vector<16x32xf32>
    %333 = vector.broadcast %312 : vector<1x32xf32> to vector<16x32xf32>
    %334 = arith.addf %332, %333 : vector<16x32xf32>
    %335 = arith.truncf %334 : vector<16x32xf32> to vector<16x32xbf16>
    %c0_185 = arith.constant 0 : index
    %c0_186 = arith.constant 0 : index
    %c0_187 = arith.constant 0 : index
    %336 = vector.load %arg14[%c0_185, %c0_186, %c0_187] : memref<2x32x64xbf16, #tpu.memory_space<vmem>>, vector<1x32x64xbf16>
    %337 = vector.shape_cast %336 : vector<1x32x64xbf16> to vector<32x64xbf16>
    %cst_188 = arith.constant dense<0.000000e+00> : vector<16x64xf32>
    %338 = tpu.matmul %335, %337, %cst_188 {dimension_numbers = #tpu.dot_dimension_numbers<[1], [0], [0], [1], [0, 0, 1, 1], [], []>} : vector<16x32xbf16>, vector<32x64xbf16>, vector<16x64xf32> -> vector<16x64xf32>
    %c0_189 = arith.constant 0 : index
    %c0_190 = arith.constant 0 : index
    %c0_191 = arith.constant 0 : index
    %339 = vector.load %arg15[%c0_189, %c0_190, %c0_191] : memref<2x1x64xf32, #tpu.memory_space<vmem>>, vector<1x1x64xf32>
    %340 = vector.shape_cast %339 : vector<1x1x64xf32> to vector<1x64xf32>
    %341 = vector.broadcast %340 : vector<1x64xf32> to vector<16x64xf32>
    %342 = arith.addf %338, %341 : vector<16x64xf32>
    %cst_192 = arith.constant 5.000000e-01 : f32
    %343 = vector.broadcast %cst_192 : f32 to vector<16x64xf32>
    %344 = arith.mulf %343, %342 : vector<16x64xf32>
    %cst_193 = arith.constant 4.471500e-02 : f32
    %345 = vector.broadcast %cst_193 : f32 to vector<16x64xf32>
    %346 = arith.mulf %345, %342 : vector<16x64xf32>
    %347 = arith.mulf %346, %342 : vector<16x64xf32>
    %348 = arith.mulf %347, %342 : vector<16x64xf32>
    %349 = arith.addf %342, %348 : vector<16x64xf32>
    %cst_194 = arith.constant 0.797884583 : f32
    %350 = vector.broadcast %cst_194 : f32 to vector<16x64xf32>
    %351 = arith.mulf %350, %349 : vector<16x64xf32>
    %352 = math.tanh %351 : vector<16x64xf32>
    %cst_195 = arith.constant 1.000000e+00 : f32
    %353 = vector.broadcast %cst_195 : f32 to vector<16x64xf32>
    %354 = arith.addf %353, %352 : vector<16x64xf32>
    %355 = arith.mulf %344, %354 : vector<16x64xf32>
    %356 = arith.truncf %355 : vector<16x64xf32> to vector<16x64xbf16>
    %c0_196 = arith.constant 0 : index
    %c0_197 = arith.constant 0 : index
    %c0_198 = arith.constant 0 : index
    %357 = vector.load %arg16[%c0_196, %c0_197, %c0_198] : memref<2x64x32xbf16, #tpu.memory_space<vmem>>, vector<1x64x32xbf16>
    %358 = vector.shape_cast %357 : vector<1x64x32xbf16> to vector<64x32xbf16>
    %cst_199 = arith.constant dense<0.000000e+00> : vector<16x32xf32>
    %359 = tpu.matmul %356, %358, %cst_199 {dimension_numbers = #tpu.dot_dimension_numbers<[1], [0], [0], [1], [0, 0, 1, 1], [], []>} : vector<16x64xbf16>, vector<64x32xbf16>, vector<16x32xf32> -> vector<16x32xf32>
    %c0_200 = arith.constant 0 : index
    %c0_201 = arith.constant 0 : index
    %c0_202 = arith.constant 0 : index
    %360 = vector.load %arg17[%c0_200, %c0_201, %c0_202] : memref<2x1x32xf32, #tpu.memory_space<vmem>>, vector<1x1x32xf32>
    %361 = vector.shape_cast %360 : vector<1x1x32xf32> to vector<1x32xf32>
    %362 = vector.broadcast %361 : vector<1x32xf32> to vector<16x32xf32>
    %363 = arith.addf %359, %362 : vector<16x32xf32>
    %364 = arith.addf %334, %363 : vector<16x32xf32>
    %c0_203 = arith.constant 0 : index
    %c0_204 = arith.constant 0 : index
    %c0_205 = arith.constant 0 : index
    %365 = vector.load %arg18[%c0_203, %c0_204, %c0_205] : memref<2x1x32xf32, #tpu.memory_space<vmem>>, vector<1x1x32xf32>
    %366 = vector.shape_cast %365 : vector<1x1x32xf32> to vector<1x32xf32>
    %c0_206 = arith.constant 0 : index
    %c0_207 = arith.constant 0 : index
    %c0_208 = arith.constant 0 : index
    %367 = vector.load %arg19[%c0_206, %c0_207, %c0_208] : memref<2x1x32xf32, #tpu.memory_space<vmem>>, vector<1x1x32xf32>
    %368 = vector.shape_cast %367 : vector<1x1x32xf32> to vector<1x32xf32>
    %cst_209 = arith.constant dense<0.000000e+00> : vector<16xf32>
    %369 = vector.multi_reduction <add>, %364, %cst_209 [1] : vector<16x32xf32> to vector<16xf32>
    %370 = vector.shape_cast %369 : vector<16xf32> to vector<16x1xf32>
    %cst_210 = arith.constant 3.200000e+01 : f32
    %371 = vector.broadcast %cst_210 : f32 to vector<16x1xf32>
    %372 = arith.divf %370, %371 : vector<16x1xf32>
    %373 = vector.broadcast %372 : vector<16x1xf32> to vector<16x32xf32>
    %374 = arith.subf %364, %373 : vector<16x32xf32>
    %375 = arith.mulf %374, %374 : vector<16x32xf32>
    %cst_211 = arith.constant dense<0.000000e+00> : vector<16xf32>
    %376 = vector.multi_reduction <add>, %375, %cst_211 [1] : vector<16x32xf32> to vector<16xf32>
    %377 = vector.shape_cast %376 : vector<16xf32> to vector<16x1xf32>
    %cst_212 = arith.constant 3.200000e+01 : f32
    %378 = vector.broadcast %cst_212 : f32 to vector<16x1xf32>
    %379 = arith.divf %377, %378 : vector<16x1xf32>
    %380 = vector.broadcast %372 : vector<16x1xf32> to vector<16x32xf32>
    %381 = arith.subf %364, %380 : vector<16x32xf32>
    %cst_213 = arith.constant 9.99999996E-13 : f32
    %382 = vector.broadcast %cst_213 : f32 to vector<16x1xf32>
    %383 = arith.addf %379, %382 : vector<16x1xf32>
    %384 = math.rsqrt %383 : vector<16x1xf32>
    %385 = vector.broadcast %384 : vector<16x1xf32> to vector<16x32xf32>
    %386 = arith.mulf %381, %385 : vector<16x32xf32>
    %387 = vector.broadcast %366 : vector<1x32xf32> to vector<16x32xf32>
    %388 = arith.mulf %386, %387 : vector<16x32xf32>
    %389 = vector.broadcast %368 : vector<1x32xf32> to vector<16x32xf32>
    %390 = arith.addf %388, %389 : vector<16x32xf32>
    %391 = arith.truncf %390 : vector<16x32xf32> to vector<16x32xbf16>
    %c1_214 = arith.constant 1 : index
    %c0_215 = arith.constant 0 : index
    %c0_216 = arith.constant 0 : index
    %392 = vector.load %arg8[%c1_214, %c0_215, %c0_216] : memref<2x32x96xbf16, #tpu.memory_space<vmem>>, vector<1x32x96xbf16>
    %393 = vector.shape_cast %392 : vector<1x32x96xbf16> to vector<32x96xbf16>
    %cst_217 = arith.constant dense<0.000000e+00> : vector<16x96xf32>
    %394 = tpu.matmul %391, %393, %cst_217 {dimension_numbers = #tpu.dot_dimension_numbers<[1], [0], [0], [1], [0, 0, 1, 1], [], []>} : vector<16x32xbf16>, vector<32x96xbf16>, vector<16x96xf32> -> vector<16x96xf32>
    %c1_218 = arith.constant 1 : index
    %c0_219 = arith.constant 0 : index
    %c0_220 = arith.constant 0 : index
    %395 = vector.load %arg9[%c1_218, %c0_219, %c0_220] : memref<2x1x96xf32, #tpu.memory_space<vmem>>, vector<1x1x96xf32>
    %396 = vector.shape_cast %395 : vector<1x1x96xf32> to vector<1x96xf32>
    %397 = vector.broadcast %396 : vector<1x96xf32> to vector<16x96xf32>
    %398 = arith.addf %394, %397 : vector<16x96xf32>
    %399 = vector.extract_strided_slice %398 {offsets = [0, 0], sizes = [16, 32], strides = [1, 1]} : vector<16x96xf32> to vector<16x32xf32>
    %400 = vector.extract_strided_slice %398 {offsets = [0, 32], sizes = [16, 32], strides = [1, 1]} : vector<16x96xf32> to vector<16x32xf32>
    %401 = vector.extract_strided_slice %398 {offsets = [0, 64], sizes = [16, 32], strides = [1, 1]} : vector<16x96xf32> to vector<16x32xf32>
    %c0_221 = arith.constant 0 : index
    %c0_222 = arith.constant 0 : index
    %402 = vector.load %arg2[%c0_221, %c0_222] : memref<2x8xf32, #tpu.memory_space<vmem>>, vector<1x8xf32>
    %403 = vector.extract_strided_slice %399 {offsets = [0, 0], sizes = [8, 32], strides = [1, 1]} : vector<16x32xf32> to vector<8x32xf32>
    %404 = vector.extract_strided_slice %400 {offsets = [0, 0], sizes = [8, 32], strides = [1, 1]} : vector<16x32xf32> to vector<8x32xf32>
    %405 = vector.extract_strided_slice %401 {offsets = [0, 0], sizes = [8, 32], strides = [1, 1]} : vector<16x32xf32> to vector<8x32xf32>
    %406 = vector.extract_strided_slice %403 {offsets = [0, 0], sizes = [8, 8], strides = [1, 1]} : vector<8x32xf32> to vector<8x8xf32>
    %407 = vector.extract_strided_slice %404 {offsets = [0, 0], sizes = [8, 8], strides = [1, 1]} : vector<8x32xf32> to vector<8x8xf32>
    %408 = vector.extract_strided_slice %405 {offsets = [0, 0], sizes = [8, 8], strides = [1, 1]} : vector<8x32xf32> to vector<8x8xf32>
    %cst_223 = arith.constant dense<0.000000e+00> : vector<8x8xf32>
    %409 = tpu.matmul %406, %407, %cst_223 {dimension_numbers = #tpu.dot_dimension_numbers<[1], [1], [0], [0], [0, 0, 1, 0], [], []>} : vector<8x8xf32>, vector<8x8xf32>, vector<8x8xf32> -> vector<8x8xf32>
    %cst_224 = arith.constant 0.353553385 : f32
    %410 = vector.broadcast %cst_224 : f32 to vector<8x8xf32>
    %411 = arith.mulf %409, %410 : vector<8x8xf32>
    %412 = vector.broadcast %402 : vector<1x8xf32> to vector<8x8xf32>
    %413 = arith.addf %411, %412 : vector<8x8xf32>
    %cst_225 = arith.constant dense<0xFF800000> : vector<8xf32>
    %414 = vector.multi_reduction <maximumf>, %413, %cst_225 [1] : vector<8x8xf32> to vector<8xf32>
    %415 = vector.shape_cast %414 : vector<8xf32> to vector<8x1xf32>
    %416 = vector.broadcast %415 : vector<8x1xf32> to vector<8x8xf32>
    %417 = arith.subf %413, %416 : vector<8x8xf32>
    %418 = math.exp %417 : vector<8x8xf32>
    %cst_226 = arith.constant dense<0.000000e+00> : vector<8xf32>
    %419 = vector.multi_reduction <add>, %418, %cst_226 [1] : vector<8x8xf32> to vector<8xf32>
    %420 = vector.shape_cast %419 : vector<8xf32> to vector<8x1xf32>
    %421 = tpu.reciprocal %420 {approx = true} : vector<8x1xf32> -> vector<8x1xf32>
    %422 = vector.broadcast %421 : vector<8x1xf32> to vector<8x8xf32>
    %423 = arith.mulf %418, %422 : vector<8x8xf32>
    %cst_227 = arith.constant dense<0.000000e+00> : vector<8x8xf32>
    %424 = tpu.matmul %423, %408, %cst_227 {dimension_numbers = #tpu.dot_dimension_numbers<[1], [0], [0], [1], [0, 0, 1, 1], [], []>} : vector<8x8xf32>, vector<8x8xf32>, vector<8x8xf32> -> vector<8x8xf32>
    %c0_228 = arith.constant 0 : index
    %c0_229 = arith.constant 0 : index
    %425 = vector.load %arg26[%c0_228, %c0_229] : memref<16x32xf32, #tpu.memory_space<vmem>>, vector<8x8xf32>
    tpu.vector_store %arg26[%c0_228, %c0_229], %424 {strides = array<i32>} : memref<16x32xf32, #tpu.memory_space<vmem>>, vector<8x8xf32>,
    %426 = vector.extract_strided_slice %403 {offsets = [0, 8], sizes = [8, 8], strides = [1, 1]} : vector<8x32xf32> to vector<8x8xf32>
    %427 = vector.extract_strided_slice %404 {offsets = [0, 8], sizes = [8, 8], strides = [1, 1]} : vector<8x32xf32> to vector<8x8xf32>
    %428 = vector.extract_strided_slice %405 {offsets = [0, 8], sizes = [8, 8], strides = [1, 1]} : vector<8x32xf32> to vector<8x8xf32>
    %cst_230 = arith.constant dense<0.000000e+00> : vector<8x8xf32>
    %429 = tpu.matmul %426, %427, %cst_230 {dimension_numbers = #tpu.dot_dimension_numbers<[1], [1], [0], [0], [0, 0, 1, 0], [], []>} : vector<8x8xf32>, vector<8x8xf32>, vector<8x8xf32> -> vector<8x8xf32>
    %cst_231 = arith.constant 0.353553385 : f32
    %430 = vector.broadcast %cst_231 : f32 to vector<8x8xf32>
    %431 = arith.mulf %429, %430 : vector<8x8xf32>
    %432 = vector.broadcast %402 : vector<1x8xf32> to vector<8x8xf32>
    %433 = arith.addf %431, %432 : vector<8x8xf32>
    %cst_232 = arith.constant dense<0xFF800000> : vector<8xf32>
    %434 = vector.multi_reduction <maximumf>, %433, %cst_232 [1] : vector<8x8xf32> to vector<8xf32>
    %435 = vector.shape_cast %434 : vector<8xf32> to vector<8x1xf32>
    %436 = vector.broadcast %435 : vector<8x1xf32> to vector<8x8xf32>
    %437 = arith.subf %433, %436 : vector<8x8xf32>
    %438 = math.exp %437 : vector<8x8xf32>
    %cst_233 = arith.constant dense<0.000000e+00> : vector<8xf32>
    %439 = vector.multi_reduction <add>, %438, %cst_233 [1] : vector<8x8xf32> to vector<8xf32>
    %440 = vector.shape_cast %439 : vector<8xf32> to vector<8x1xf32>
    %441 = tpu.reciprocal %440 {approx = true} : vector<8x1xf32> -> vector<8x1xf32>
    %442 = vector.broadcast %441 : vector<8x1xf32> to vector<8x8xf32>
    %443 = arith.mulf %438, %442 : vector<8x8xf32>
    %cst_234 = arith.constant dense<0.000000e+00> : vector<8x8xf32>
    %444 = tpu.matmul %443, %428, %cst_234 {dimension_numbers = #tpu.dot_dimension_numbers<[1], [0], [0], [1], [0, 0, 1, 1], [], []>} : vector<8x8xf32>, vector<8x8xf32>, vector<8x8xf32> -> vector<8x8xf32>
    %c0_235 = arith.constant 0 : index
    %c8_236 = arith.constant 8 : index
    %445 = vector.load %arg26[%c0_235, %c8_236] : memref<16x32xf32, #tpu.memory_space<vmem>>, vector<8x8xf32>
    tpu.vector_store %arg26[%c0_235, %c8_236], %444 {strides = array<i32>} : memref<16x32xf32, #tpu.memory_space<vmem>>, vector<8x8xf32>,
    %446 = vector.extract_strided_slice %403 {offsets = [0, 16], sizes = [8, 8], strides = [1, 1]} : vector<8x32xf32> to vector<8x8xf32>
    %447 = vector.extract_strided_slice %404 {offsets = [0, 16], sizes = [8, 8], strides = [1, 1]} : vector<8x32xf32> to vector<8x8xf32>
    %448 = vector.extract_strided_slice %405 {offsets = [0, 16], sizes = [8, 8], strides = [1, 1]} : vector<8x32xf32> to vector<8x8xf32>
    %cst_237 = arith.constant dense<0.000000e+00> : vector<8x8xf32>
    %449 = tpu.matmul %446, %447, %cst_237 {dimension_numbers = #tpu.dot_dimension_numbers<[1], [1], [0], [0], [0, 0, 1, 0], [], []>} : vector<8x8xf32>, vector<8x8xf32>, vector<8x8xf32> -> vector<8x8xf32>
    %cst_238 = arith.constant 0.353553385 : f32
    %450 = vector.broadcast %cst_238 : f32 to vector<8x8xf32>
    %451 = arith.mulf %449, %450 : vector<8x8xf32>
    %452 = vector.broadcast %402 : vector<1x8xf32> to vector<8x8xf32>
    %453 = arith.addf %451, %452 : vector<8x8xf32>
    %cst_239 = arith.constant dense<0xFF800000> : vector<8xf32>
    %454 = vector.multi_reduction <maximumf>, %453, %cst_239 [1] : vector<8x8xf32> to vector<8xf32>
    %455 = vector.shape_cast %454 : vector<8xf32> to vector<8x1xf32>
    %456 = vector.broadcast %455 : vector<8x1xf32> to vector<8x8xf32>
    %457 = arith.subf %453, %456 : vector<8x8xf32>
    %458 = math.exp %457 : vector<8x8xf32>
    %cst_240 = arith.constant dense<0.000000e+00> : vector<8xf32>
    %459 = vector.multi_reduction <add>, %458, %cst_240 [1] : vector<8x8xf32> to vector<8xf32>
    %460 = vector.shape_cast %459 : vector<8xf32> to vector<8x1xf32>
    %461 = tpu.reciprocal %460 {approx = true} : vector<8x1xf32> -> vector<8x1xf32>
    %462 = vector.broadcast %461 : vector<8x1xf32> to vector<8x8xf32>
    %463 = arith.mulf %458, %462 : vector<8x8xf32>
    %cst_241 = arith.constant dense<0.000000e+00> : vector<8x8xf32>
    %464 = tpu.matmul %463, %448, %cst_241 {dimension_numbers = #tpu.dot_dimension_numbers<[1], [0], [0], [1], [0, 0, 1, 1], [], []>} : vector<8x8xf32>, vector<8x8xf32>, vector<8x8xf32> -> vector<8x8xf32>
    %c0_242 = arith.constant 0 : index
    %c16_243 = arith.constant 16 : index
    %465 = vector.load %arg26[%c0_242, %c16_243] : memref<16x32xf32, #tpu.memory_space<vmem>>, vector<8x8xf32>
    tpu.vector_store %arg26[%c0_242, %c16_243], %464 {strides = array<i32>} : memref<16x32xf32, #tpu.memory_space<vmem>>, vector<8x8xf32>,
    %466 = vector.extract_strided_slice %403 {offsets = [0, 24], sizes = [8, 8], strides = [1, 1]} : vector<8x32xf32> to vector<8x8xf32>
    %467 = vector.extract_strided_slice %404 {offsets = [0, 24], sizes = [8, 8], strides = [1, 1]} : vector<8x32xf32> to vector<8x8xf32>
    %468 = vector.extract_strided_slice %405 {offsets = [0, 24], sizes = [8, 8], strides = [1, 1]} : vector<8x32xf32> to vector<8x8xf32>
    %cst_244 = arith.constant dense<0.000000e+00> : vector<8x8xf32>
    %469 = tpu.matmul %466, %467, %cst_244 {dimension_numbers = #tpu.dot_dimension_numbers<[1], [1], [0], [0], [0, 0, 1, 0], [], []>} : vector<8x8xf32>, vector<8x8xf32>, vector<8x8xf32> -> vector<8x8xf32>
    %cst_245 = arith.constant 0.353553385 : f32
    %470 = vector.broadcast %cst_245 : f32 to vector<8x8xf32>
    %471 = arith.mulf %469, %470 : vector<8x8xf32>
    %472 = vector.broadcast %402 : vector<1x8xf32> to vector<8x8xf32>
    %473 = arith.addf %471, %472 : vector<8x8xf32>
    %cst_246 = arith.constant dense<0xFF800000> : vector<8xf32>
    %474 = vector.multi_reduction <maximumf>, %473, %cst_246 [1] : vector<8x8xf32> to vector<8xf32>
    %475 = vector.shape_cast %474 : vector<8xf32> to vector<8x1xf32>
    %476 = vector.broadcast %475 : vector<8x1xf32> to vector<8x8xf32>
    %477 = arith.subf %473, %476 : vector<8x8xf32>
    %478 = math.exp %477 : vector<8x8xf32>
    %cst_247 = arith.constant dense<0.000000e+00> : vector<8xf32>
    %479 = vector.multi_reduction <add>, %478, %cst_247 [1] : vector<8x8xf32> to vector<8xf32>
    %480 = vector.shape_cast %479 : vector<8xf32> to vector<8x1xf32>
    %481 = tpu.reciprocal %480 {approx = true} : vector<8x1xf32> -> vector<8x1xf32>
    %482 = vector.broadcast %481 : vector<8x1xf32> to vector<8x8xf32>
    %483 = arith.mulf %478, %482 : vector<8x8xf32>
    %cst_248 = arith.constant dense<0.000000e+00> : vector<8x8xf32>
    %484 = tpu.matmul %483, %468, %cst_248 {dimension_numbers = #tpu.dot_dimension_numbers<[1], [0], [0], [1], [0, 0, 1, 1], [], []>} : vector<8x8xf32>, vector<8x8xf32>, vector<8x8xf32> -> vector<8x8xf32>
    %c0_249 = arith.constant 0 : index
    %c24_250 = arith.constant 24 : index
    %485 = vector.load %arg26[%c0_249, %c24_250] : memref<16x32xf32, #tpu.memory_space<vmem>>, vector<8x8xf32>
    tpu.vector_store %arg26[%c0_249, %c24_250], %484 {strides = array<i32>} : memref<16x32xf32, #tpu.memory_space<vmem>>, vector<8x8xf32>,
    %c1_251 = arith.constant 1 : index
    %c0_252 = arith.constant 0 : index
    %486 = vector.load %arg2[%c1_251, %c0_252] : memref<2x8xf32, #tpu.memory_space<vmem>>, vector<1x8xf32>
    %487 = vector.extract_strided_slice %399 {offsets = [8, 0], sizes = [8, 32], strides = [1, 1]} : vector<16x32xf32> to vector<8x32xf32>
    %488 = vector.extract_strided_slice %400 {offsets = [8, 0], sizes = [8, 32], strides = [1, 1]} : vector<16x32xf32> to vector<8x32xf32>
    %489 = vector.extract_strided_slice %401 {offsets = [8, 0], sizes = [8, 32], strides = [1, 1]} : vector<16x32xf32> to vector<8x32xf32>
    %490 = vector.extract_strided_slice %487 {offsets = [0, 0], sizes = [8, 8], strides = [1, 1]} : vector<8x32xf32> to vector<8x8xf32>
    %491 = vector.extract_strided_slice %488 {offsets = [0, 0], sizes = [8, 8], strides = [1, 1]} : vector<8x32xf32> to vector<8x8xf32>
    %492 = vector.extract_strided_slice %489 {offsets = [0, 0], sizes = [8, 8], strides = [1, 1]} : vector<8x32xf32> to vector<8x8xf32>
    %cst_253 = arith.constant dense<0.000000e+00> : vector<8x8xf32>
    %493 = tpu.matmul %490, %491, %cst_253 {dimension_numbers = #tpu.dot_dimension_numbers<[1], [1], [0], [0], [0, 0, 1, 0], [], []>} : vector<8x8xf32>, vector<8x8xf32>, vector<8x8xf32> -> vector<8x8xf32>
    %cst_254 = arith.constant 0.353553385 : f32
    %494 = vector.broadcast %cst_254 : f32 to vector<8x8xf32>
    %495 = arith.mulf %493, %494 : vector<8x8xf32>
    %496 = vector.broadcast %486 : vector<1x8xf32> to vector<8x8xf32>
    %497 = arith.addf %495, %496 : vector<8x8xf32>
    %cst_255 = arith.constant dense<0xFF800000> : vector<8xf32>
    %498 = vector.multi_reduction <maximumf>, %497, %cst_255 [1] : vector<8x8xf32> to vector<8xf32>
    %499 = vector.shape_cast %498 : vector<8xf32> to vector<8x1xf32>
    %500 = vector.broadcast %499 : vector<8x1xf32> to vector<8x8xf32>
    %501 = arith.subf %497, %500 : vector<8x8xf32>
    %502 = math.exp %501 : vector<8x8xf32>
    %cst_256 = arith.constant dense<0.000000e+00> : vector<8xf32>
    %503 = vector.multi_reduction <add>, %502, %cst_256 [1] : vector<8x8xf32> to vector<8xf32>
    %504 = vector.shape_cast %503 : vector<8xf32> to vector<8x1xf32>
    %505 = tpu.reciprocal %504 {approx = true} : vector<8x1xf32> -> vector<8x1xf32>
    %506 = vector.broadcast %505 : vector<8x1xf32> to vector<8x8xf32>
    %507 = arith.mulf %502, %506 : vector<8x8xf32>
    %cst_257 = arith.constant dense<0.000000e+00> : vector<8x8xf32>
    %508 = tpu.matmul %507, %492, %cst_257 {dimension_numbers = #tpu.dot_dimension_numbers<[1], [0], [0], [1], [0, 0, 1, 1], [], []>} : vector<8x8xf32>, vector<8x8xf32>, vector<8x8xf32> -> vector<8x8xf32>
    %c8_258 = arith.constant 8 : index
    %c0_259 = arith.constant 0 : index
    %509 = vector.load %arg26[%c8_258, %c0_259] : memref<16x32xf32, #tpu.memory_space<vmem>>, vector<8x8xf32>
    tpu.vector_store %arg26[%c8_258, %c0_259], %508 {strides = array<i32>} : memref<16x32xf32, #tpu.memory_space<vmem>>, vector<8x8xf32>,
    %510 = vector.extract_strided_slice %487 {offsets = [0, 8], sizes = [8, 8], strides = [1, 1]} : vector<8x32xf32> to vector<8x8xf32>
    %511 = vector.extract_strided_slice %488 {offsets = [0, 8], sizes = [8, 8], strides = [1, 1]} : vector<8x32xf32> to vector<8x8xf32>
    %512 = vector.extract_strided_slice %489 {offsets = [0, 8], sizes = [8, 8], strides = [1, 1]} : vector<8x32xf32> to vector<8x8xf32>
    %cst_260 = arith.constant dense<0.000000e+00> : vector<8x8xf32>
    %513 = tpu.matmul %510, %511, %cst_260 {dimension_numbers = #tpu.dot_dimension_numbers<[1], [1], [0], [0], [0, 0, 1, 0], [], []>} : vector<8x8xf32>, vector<8x8xf32>, vector<8x8xf32> -> vector<8x8xf32>
    %cst_261 = arith.constant 0.353553385 : f32
    %514 = vector.broadcast %cst_261 : f32 to vector<8x8xf32>
    %515 = arith.mulf %513, %514 : vector<8x8xf32>
    %516 = vector.broadcast %486 : vector<1x8xf32> to vector<8x8xf32>
    %517 = arith.addf %515, %516 : vector<8x8xf32>
    %cst_262 = arith.constant dense<0xFF800000> : vector<8xf32>
    %518 = vector.multi_reduction <maximumf>, %517, %cst_262 [1] : vector<8x8xf32> to vector<8xf32>
    %519 = vector.shape_cast %518 : vector<8xf32> to vector<8x1xf32>
    %520 = vector.broadcast %519 : vector<8x1xf32> to vector<8x8xf32>
    %521 = arith.subf %517, %520 : vector<8x8xf32>
    %522 = math.exp %521 : vector<8x8xf32>
    %cst_263 = arith.constant dense<0.000000e+00> : vector<8xf32>
    %523 = vector.multi_reduction <add>, %522, %cst_263 [1] : vector<8x8xf32> to vector<8xf32>
    %524 = vector.shape_cast %523 : vector<8xf32> to vector<8x1xf32>
    %525 = tpu.reciprocal %524 {approx = true} : vector<8x1xf32> -> vector<8x1xf32>
    %526 = vector.broadcast %525 : vector<8x1xf32> to vector<8x8xf32>
    %527 = arith.mulf %522, %526 : vector<8x8xf32>
    %cst_264 = arith.constant dense<0.000000e+00> : vector<8x8xf32>
    %528 = tpu.matmul %527, %512, %cst_264 {dimension_numbers = #tpu.dot_dimension_numbers<[1], [0], [0], [1], [0, 0, 1, 1], [], []>} : vector<8x8xf32>, vector<8x8xf32>, vector<8x8xf32> -> vector<8x8xf32>
    %c8_265 = arith.constant 8 : index
    %c8_266 = arith.constant 8 : index
    %529 = vector.load %arg26[%c8_265, %c8_266] : memref<16x32xf32, #tpu.memory_space<vmem>>, vector<8x8xf32>
    tpu.vector_store %arg26[%c8_265, %c8_266], %528 {strides = array<i32>} : memref<16x32xf32, #tpu.memory_space<vmem>>, vector<8x8xf32>,
    %530 = vector.extract_strided_slice %487 {offsets = [0, 16], sizes = [8, 8], strides = [1, 1]} : vector<8x32xf32> to vector<8x8xf32>
    %531 = vector.extract_strided_slice %488 {offsets = [0, 16], sizes = [8, 8], strides = [1, 1]} : vector<8x32xf32> to vector<8x8xf32>
    %532 = vector.extract_strided_slice %489 {offsets = [0, 16], sizes = [8, 8], strides = [1, 1]} : vector<8x32xf32> to vector<8x8xf32>
    %cst_267 = arith.constant dense<0.000000e+00> : vector<8x8xf32>
    %533 = tpu.matmul %530, %531, %cst_267 {dimension_numbers = #tpu.dot_dimension_numbers<[1], [1], [0], [0], [0, 0, 1, 0], [], []>} : vector<8x8xf32>, vector<8x8xf32>, vector<8x8xf32> -> vector<8x8xf32>
    %cst_268 = arith.constant 0.353553385 : f32
    %534 = vector.broadcast %cst_268 : f32 to vector<8x8xf32>
    %535 = arith.mulf %533, %534 : vector<8x8xf32>
    %536 = vector.broadcast %486 : vector<1x8xf32> to vector<8x8xf32>
    %537 = arith.addf %535, %536 : vector<8x8xf32>
    %cst_269 = arith.constant dense<0xFF800000> : vector<8xf32>
    %538 = vector.multi_reduction <maximumf>, %537, %cst_269 [1] : vector<8x8xf32> to vector<8xf32>
    %539 = vector.shape_cast %538 : vector<8xf32> to vector<8x1xf32>
    %540 = vector.broadcast %539 : vector<8x1xf32> to vector<8x8xf32>
    %541 = arith.subf %537, %540 : vector<8x8xf32>
    %542 = math.exp %541 : vector<8x8xf32>
    %cst_270 = arith.constant dense<0.000000e+00> : vector<8xf32>
    %543 = vector.multi_reduction <add>, %542, %cst_270 [1] : vector<8x8xf32> to vector<8xf32>
    %544 = vector.shape_cast %543 : vector<8xf32> to vector<8x1xf32>
    %545 = tpu.reciprocal %544 {approx = true} : vector<8x1xf32> -> vector<8x1xf32>
    %546 = vector.broadcast %545 : vector<8x1xf32> to vector<8x8xf32>
    %547 = arith.mulf %542, %546 : vector<8x8xf32>
    %cst_271 = arith.constant dense<0.000000e+00> : vector<8x8xf32>
    %548 = tpu.matmul %547, %532, %cst_271 {dimension_numbers = #tpu.dot_dimension_numbers<[1], [0], [0], [1], [0, 0, 1, 1], [], []>} : vector<8x8xf32>, vector<8x8xf32>, vector<8x8xf32> -> vector<8x8xf32>
    %c8_272 = arith.constant 8 : index
    %c16_273 = arith.constant 16 : index
    %549 = vector.load %arg26[%c8_272, %c16_273] : memref<16x32xf32, #tpu.memory_space<vmem>>, vector<8x8xf32>
    tpu.vector_store %arg26[%c8_272, %c16_273], %548 {strides = array<i32>} : memref<16x32xf32, #tpu.memory_space<vmem>>, vector<8x8xf32>,
    %550 = vector.extract_strided_slice %487 {offsets = [0, 24], sizes = [8, 8], strides = [1, 1]} : vector<8x32xf32> to vector<8x8xf32>
    %551 = vector.extract_strided_slice %488 {offsets = [0, 24], sizes = [8, 8], strides = [1, 1]} : vector<8x32xf32> to vector<8x8xf32>
    %552 = vector.extract_strided_slice %489 {offsets = [0, 24], sizes = [8, 8], strides = [1, 1]} : vector<8x32xf32> to vector<8x8xf32>
    %cst_274 = arith.constant dense<0.000000e+00> : vector<8x8xf32>
    %553 = tpu.matmul %550, %551, %cst_274 {dimension_numbers = #tpu.dot_dimension_numbers<[1], [1], [0], [0], [0, 0, 1, 0], [], []>} : vector<8x8xf32>, vector<8x8xf32>, vector<8x8xf32> -> vector<8x8xf32>
    %cst_275 = arith.constant 0.353553385 : f32
    %554 = vector.broadcast %cst_275 : f32 to vector<8x8xf32>
    %555 = arith.mulf %553, %554 : vector<8x8xf32>
    %556 = vector.broadcast %486 : vector<1x8xf32> to vector<8x8xf32>
    %557 = arith.addf %555, %556 : vector<8x8xf32>
    %cst_276 = arith.constant dense<0xFF800000> : vector<8xf32>
    %558 = vector.multi_reduction <maximumf>, %557, %cst_276 [1] : vector<8x8xf32> to vector<8xf32>
    %559 = vector.shape_cast %558 : vector<8xf32> to vector<8x1xf32>
    %560 = vector.broadcast %559 : vector<8x1xf32> to vector<8x8xf32>
    %561 = arith.subf %557, %560 : vector<8x8xf32>
    %562 = math.exp %561 : vector<8x8xf32>
    %cst_277 = arith.constant dense<0.000000e+00> : vector<8xf32>
    %563 = vector.multi_reduction <add>, %562, %cst_277 [1] : vector<8x8xf32> to vector<8xf32>
    %564 = vector.shape_cast %563 : vector<8xf32> to vector<8x1xf32>
    %565 = tpu.reciprocal %564 {approx = true} : vector<8x1xf32> -> vector<8x1xf32>
    %566 = vector.broadcast %565 : vector<8x1xf32> to vector<8x8xf32>
    %567 = arith.mulf %562, %566 : vector<8x8xf32>
    %cst_278 = arith.constant dense<0.000000e+00> : vector<8x8xf32>
    %568 = tpu.matmul %567, %552, %cst_278 {dimension_numbers = #tpu.dot_dimension_numbers<[1], [0], [0], [1], [0, 0, 1, 1], [], []>} : vector<8x8xf32>, vector<8x8xf32>, vector<8x8xf32> -> vector<8x8xf32>
    %c8_279 = arith.constant 8 : index
    %c24_280 = arith.constant 24 : index
    %569 = vector.load %arg26[%c8_279, %c24_280] : memref<16x32xf32, #tpu.memory_space<vmem>>, vector<8x8xf32>
    tpu.vector_store %arg26[%c8_279, %c24_280], %568 {strides = array<i32>} : memref<16x32xf32, #tpu.memory_space<vmem>>, vector<8x8xf32>,
    %c0_281 = arith.constant 0 : index
    %c0_282 = arith.constant 0 : index
    %570 = vector.load %arg26[%c0_281, %c0_282] : memref<16x32xf32, #tpu.memory_space<vmem>>, vector<16x32xf32>
    %571 = arith.truncf %570 : vector<16x32xf32> to vector<16x32xbf16>
    %c1_283 = arith.constant 1 : index
    %c0_284 = arith.constant 0 : index
    %c0_285 = arith.constant 0 : index
    %572 = vector.load %arg10[%c1_283, %c0_284, %c0_285] : memref<2x32x32xbf16, #tpu.memory_space<vmem>>, vector<1x32x32xbf16>
    %573 = vector.shape_cast %572 : vector<1x32x32xbf16> to vector<32x32xbf16>
    %cst_286 = arith.constant dense<0.000000e+00> : vector<16x32xf32>
    %574 = tpu.matmul %571, %573, %cst_286 {dimension_numbers = #tpu.dot_dimension_numbers<[1], [0], [0], [1], [0, 0, 1, 1], [], []>} : vector<16x32xbf16>, vector<32x32xbf16>, vector<16x32xf32> -> vector<16x32xf32>
    %c1_287 = arith.constant 1 : index
    %c0_288 = arith.constant 0 : index
    %c0_289 = arith.constant 0 : index
    %575 = vector.load %arg11[%c1_287, %c0_288, %c0_289] : memref<2x1x32xf32, #tpu.memory_space<vmem>>, vector<1x1x32xf32>
    %576 = vector.shape_cast %575 : vector<1x1x32xf32> to vector<1x32xf32>
    %577 = vector.broadcast %576 : vector<1x32xf32> to vector<16x32xf32>
    %578 = arith.addf %574, %577 : vector<16x32xf32>
    %579 = arith.addf %390, %578 : vector<16x32xf32>
    %c1_290 = arith.constant 1 : index
    %c0_291 = arith.constant 0 : index
    %c0_292 = arith.constant 0 : index
    %580 = vector.load %arg12[%c1_290, %c0_291, %c0_292] : memref<2x1x32xf32, #tpu.memory_space<vmem>>, vector<1x1x32xf32>
    %581 = vector.shape_cast %580 : vector<1x1x32xf32> to vector<1x32xf32>
    %c1_293 = arith.constant 1 : index
    %c0_294 = arith.constant 0 : index
    %c0_295 = arith.constant 0 : index
    %582 = vector.load %arg13[%c1_293, %c0_294, %c0_295] : memref<2x1x32xf32, #tpu.memory_space<vmem>>, vector<1x1x32xf32>
    %583 = vector.shape_cast %582 : vector<1x1x32xf32> to vector<1x32xf32>
    %cst_296 = arith.constant dense<0.000000e+00> : vector<16xf32>
    %584 = vector.multi_reduction <add>, %579, %cst_296 [1] : vector<16x32xf32> to vector<16xf32>
    %585 = vector.shape_cast %584 : vector<16xf32> to vector<16x1xf32>
    %cst_297 = arith.constant 3.200000e+01 : f32
    %586 = vector.broadcast %cst_297 : f32 to vector<16x1xf32>
    %587 = arith.divf %585, %586 : vector<16x1xf32>
    %588 = vector.broadcast %587 : vector<16x1xf32> to vector<16x32xf32>
    %589 = arith.subf %579, %588 : vector<16x32xf32>
    %590 = arith.mulf %589, %589 : vector<16x32xf32>
    %cst_298 = arith.constant dense<0.000000e+00> : vector<16xf32>
    %591 = vector.multi_reduction <add>, %590, %cst_298 [1] : vector<16x32xf32> to vector<16xf32>
    %592 = vector.shape_cast %591 : vector<16xf32> to vector<16x1xf32>
    %cst_299 = arith.constant 3.200000e+01 : f32
    %593 = vector.broadcast %cst_299 : f32 to vector<16x1xf32>
    %594 = arith.divf %592, %593 : vector<16x1xf32>
    %595 = vector.broadcast %587 : vector<16x1xf32> to vector<16x32xf32>
    %596 = arith.subf %579, %595 : vector<16x32xf32>
    %cst_300 = arith.constant 9.99999996E-13 : f32
    %597 = vector.broadcast %cst_300 : f32 to vector<16x1xf32>
    %598 = arith.addf %594, %597 : vector<16x1xf32>
    %599 = math.rsqrt %598 : vector<16x1xf32>
    %600 = vector.broadcast %599 : vector<16x1xf32> to vector<16x32xf32>
    %601 = arith.mulf %596, %600 : vector<16x32xf32>
    %602 = vector.broadcast %581 : vector<1x32xf32> to vector<16x32xf32>
    %603 = arith.mulf %601, %602 : vector<16x32xf32>
    %604 = vector.broadcast %583 : vector<1x32xf32> to vector<16x32xf32>
    %605 = arith.addf %603, %604 : vector<16x32xf32>
    %606 = arith.truncf %605 : vector<16x32xf32> to vector<16x32xbf16>
    %c1_301 = arith.constant 1 : index
    %c0_302 = arith.constant 0 : index
    %c0_303 = arith.constant 0 : index
    %607 = vector.load %arg14[%c1_301, %c0_302, %c0_303] : memref<2x32x64xbf16, #tpu.memory_space<vmem>>, vector<1x32x64xbf16>
    %608 = vector.shape_cast %607 : vector<1x32x64xbf16> to vector<32x64xbf16>
    %cst_304 = arith.constant dense<0.000000e+00> : vector<16x64xf32>
    %609 = tpu.matmul %606, %608, %cst_304 {dimension_numbers = #tpu.dot_dimension_numbers<[1], [0], [0], [1], [0, 0, 1, 1], [], []>} : vector<16x32xbf16>, vector<32x64xbf16>, vector<16x64xf32> -> vector<16x64xf32>
    %c1_305 = arith.constant 1 : index
    %c0_306 = arith.constant 0 : index
    %c0_307 = arith.constant 0 : index
    %610 = vector.load %arg15[%c1_305, %c0_306, %c0_307] : memref<2x1x64xf32, #tpu.memory_space<vmem>>, vector<1x1x64xf32>
    %611 = vector.shape_cast %610 : vector<1x1x64xf32> to vector<1x64xf32>
    %612 = vector.broadcast %611 : vector<1x64xf32> to vector<16x64xf32>
    %613 = arith.addf %609, %612 : vector<16x64xf32>
    %cst_308 = arith.constant 5.000000e-01 : f32
    %614 = vector.broadcast %cst_308 : f32 to vector<16x64xf32>
    %615 = arith.mulf %614, %613 : vector<16x64xf32>
    %cst_309 = arith.constant 4.471500e-02 : f32
    %616 = vector.broadcast %cst_309 : f32 to vector<16x64xf32>
    %617 = arith.mulf %616, %613 : vector<16x64xf32>
    %618 = arith.mulf %617, %613 : vector<16x64xf32>
    %619 = arith.mulf %618, %613 : vector<16x64xf32>
    %620 = arith.addf %613, %619 : vector<16x64xf32>
    %cst_310 = arith.constant 0.797884583 : f32
    %621 = vector.broadcast %cst_310 : f32 to vector<16x64xf32>
    %622 = arith.mulf %621, %620 : vector<16x64xf32>
    %623 = math.tanh %622 : vector<16x64xf32>
    %cst_311 = arith.constant 1.000000e+00 : f32
    %624 = vector.broadcast %cst_311 : f32 to vector<16x64xf32>
    %625 = arith.addf %624, %623 : vector<16x64xf32>
    %626 = arith.mulf %615, %625 : vector<16x64xf32>
    %627 = arith.truncf %626 : vector<16x64xf32> to vector<16x64xbf16>
    %c1_312 = arith.constant 1 : index
    %c0_313 = arith.constant 0 : index
    %c0_314 = arith.constant 0 : index
    %628 = vector.load %arg16[%c1_312, %c0_313, %c0_314] : memref<2x64x32xbf16, #tpu.memory_space<vmem>>, vector<1x64x32xbf16>
    %629 = vector.shape_cast %628 : vector<1x64x32xbf16> to vector<64x32xbf16>
    %cst_315 = arith.constant dense<0.000000e+00> : vector<16x32xf32>
    %630 = tpu.matmul %627, %629, %cst_315 {dimension_numbers = #tpu.dot_dimension_numbers<[1], [0], [0], [1], [0, 0, 1, 1], [], []>} : vector<16x64xbf16>, vector<64x32xbf16>, vector<16x32xf32> -> vector<16x32xf32>
    %c1_316 = arith.constant 1 : index
    %c0_317 = arith.constant 0 : index
    %c0_318 = arith.constant 0 : index
    %631 = vector.load %arg17[%c1_316, %c0_317, %c0_318] : memref<2x1x32xf32, #tpu.memory_space<vmem>>, vector<1x1x32xf32>
    %632 = vector.shape_cast %631 : vector<1x1x32xf32> to vector<1x32xf32>
    %633 = vector.broadcast %632 : vector<1x32xf32> to vector<16x32xf32>
    %634 = arith.addf %630, %633 : vector<16x32xf32>
    %635 = arith.addf %605, %634 : vector<16x32xf32>
    %c1_319 = arith.constant 1 : index
    %c0_320 = arith.constant 0 : index
    %c0_321 = arith.constant 0 : index
    %636 = vector.load %arg18[%c1_319, %c0_320, %c0_321] : memref<2x1x32xf32, #tpu.memory_space<vmem>>, vector<1x1x32xf32>
    %637 = vector.shape_cast %636 : vector<1x1x32xf32> to vector<1x32xf32>
    %c1_322 = arith.constant 1 : index
    %c0_323 = arith.constant 0 : index
    %c0_324 = arith.constant 0 : index
    %638 = vector.load %arg19[%c1_322, %c0_323, %c0_324] : memref<2x1x32xf32, #tpu.memory_space<vmem>>, vector<1x1x32xf32>
    %639 = vector.shape_cast %638 : vector<1x1x32xf32> to vector<1x32xf32>
    %cst_325 = arith.constant dense<0.000000e+00> : vector<16xf32>
    %640 = vector.multi_reduction <add>, %635, %cst_325 [1] : vector<16x32xf32> to vector<16xf32>
    %641 = vector.shape_cast %640 : vector<16xf32> to vector<16x1xf32>
    %cst_326 = arith.constant 3.200000e+01 : f32
    %642 = vector.broadcast %cst_326 : f32 to vector<16x1xf32>
    %643 = arith.divf %641, %642 : vector<16x1xf32>
    %644 = vector.broadcast %643 : vector<16x1xf32> to vector<16x32xf32>
    %645 = arith.subf %635, %644 : vector<16x32xf32>
    %646 = arith.mulf %645, %645 : vector<16x32xf32>
    %cst_327 = arith.constant dense<0.000000e+00> : vector<16xf32>
    %647 = vector.multi_reduction <add>, %646, %cst_327 [1] : vector<16x32xf32> to vector<16xf32>
    %648 = vector.shape_cast %647 : vector<16xf32> to vector<16x1xf32>
    %cst_328 = arith.constant 3.200000e+01 : f32
    %649 = vector.broadcast %cst_328 : f32 to vector<16x1xf32>
    %650 = arith.divf %648, %649 : vector<16x1xf32>
    %651 = vector.broadcast %643 : vector<16x1xf32> to vector<16x32xf32>
    %652 = arith.subf %635, %651 : vector<16x32xf32>
    %cst_329 = arith.constant 9.99999996E-13 : f32
    %653 = vector.broadcast %cst_329 : f32 to vector<16x1xf32>
    %654 = arith.addf %650, %653 : vector<16x1xf32>
    %655 = math.rsqrt %654 : vector<16x1xf32>
    %656 = vector.broadcast %655 : vector<16x1xf32> to vector<16x32xf32>
    %657 = arith.mulf %652, %656 : vector<16x32xf32>
    %658 = vector.broadcast %637 : vector<1x32xf32> to vector<16x32xf32>
    %659 = arith.mulf %657, %658 : vector<16x32xf32>
    %660 = vector.broadcast %639 : vector<1x32xf32> to vector<16x32xf32>
    %661 = arith.addf %659, %660 : vector<16x32xf32>
    %662 = vector.extract_strided_slice %661 {offsets = [0, 0], sizes = [1, 32], strides = [1, 1]} : vector<16x32xf32> to vector<1x32xf32>
    %663 = vector.extract_strided_slice %661 {offsets = [8, 0], sizes = [1, 32], strides = [1, 1]} : vector<16x32xf32> to vector<1x32xf32>
    %664 = tpu.concatenate %662, %663 in 0 : vector<1x32xf32>, vector<1x32xf32> -> vector<2x32xf32>
    %665 = arith.truncf %664 : vector<2x32xf32> to vector<2x32xbf16>
    %c0_330 = arith.constant 0 : index
    %c0_331 = arith.constant 0 : index
    %666 = vector.load %arg20[%c0_330, %c0_331] : memref<32x32xbf16, #tpu.memory_space<vmem>>, vector<32x32xbf16>
    %cst_332 = arith.constant dense<0.000000e+00> : vector<2x32xf32>
    %667 = tpu.matmul %665, %666, %cst_332 {dimension_numbers = #tpu.dot_dimension_numbers<[1], [0], [0], [1], [0, 0, 1, 1], [], []>} : vector<2x32xbf16>, vector<32x32xbf16>, vector<2x32xf32> -> vector<2x32xf32>
    %c0_333 = arith.constant 0 : index
    %c0_334 = arith.constant 0 : index
    %668 = vector.load %arg21[%c0_333, %c0_334] : memref<1x32xf32, #tpu.memory_space<vmem>>, vector<1x32xf32>
    %669 = vector.broadcast %668 : vector<1x32xf32> to vector<2x32xf32>
    %670 = arith.addf %667, %669 : vector<2x32xf32>
    %671 = math.tanh %670 : vector<2x32xf32>
    %672 = arith.truncf %671 : vector<2x32xf32> to vector<2x32xbf16>
    %c0_335 = arith.constant 0 : index
    %c0_336 = arith.constant 0 : index
    %673 = vector.load %arg22[%c0_335, %c0_336] : memref<32x16xbf16, #tpu.memory_space<vmem>>, vector<32x16xbf16>
    %cst_337 = arith.constant dense<0.000000e+00> : vector<2x16xf32>
    %674 = tpu.matmul %672, %673, %cst_337 {dimension_numbers = #tpu.dot_dimension_numbers<[1], [0], [0], [1], [0, 0, 1, 1], [], []>} : vector<2x32xbf16>, vector<32x16xbf16>, vector<2x16xf32> -> vector<2x16xf32>
    %c0_338 = arith.constant 0 : index
    %c0_339 = arith.constant 0 : index
    %675 = vector.load %arg23[%c0_338, %c0_339] : memref<1x16xf32, #tpu.memory_space<vmem>>, vector<1x16xf32>
    %676 = vector.broadcast %675 : vector<1x16xf32> to vector<2x16xf32>
    %677 = arith.addf %674, %676 : vector<2x16xf32>
    %c0_340 = arith.constant 0 : index
    %c0_341 = arith.constant 0 : index
    %678 = vector.load %arg24[%c0_340, %c0_341] : memref<2x16xf32, #tpu.memory_space<vmem>>, vector<2x16xf32>
    tpu.vector_store %arg24[%c0_340, %c0_341], %677 {strides = array<i32>} : memref<2x16xf32, #tpu.memory_space<vmem>>, vector<2x16xf32>,
    return
  }
}

</mosaic_0001>

<bundles_post_ra>
// kernel: tpu_custom_call.1
= control target key start
LH: loop header
LB: loop body
LE: loop exit
PB: predicated region body
PF: predicated region fallthrough
CT: control target
= control target key end

     0   :  { %s5481_s0 = inlined_call_operand.vmem [shape: s32[2,8], index: 0, kind: input, shape index: {}]   ;;  %s5482_s1 = inlined_call_operand.vmem [shape: f32[16,1], index: 1, kind: input, shape index: {}]   ;;  %s5483_s2 = inlined_call_operand.vmem [shape: f32[2,8], index: 2, kind: input, shape index: {}]   ;;  %s5484_s3 = inlined_call_operand.vmem [shape: f32[100,1,32], index: 3, kind: input, shape index: {}]   ;;  %s5485_s4 = inlined_call_operand.vmem [shape: f32[16,32], index: 4, kind: input, shape index: {}]   ;;  %s5486_s5 = inlined_call_operand.vmem [shape: f32[2,1,32], index: 5, kind: input, shape index: {}]   ;;  %s5487_s6 = inlined_call_operand.vmem [shape: f32[1,32], index: 6, kind: input, shape index: {}]   ;;  %s5488_s7 = inlined_call_operand.vmem [shape: f32[1,32], index: 7, kind: input, shape index: {}]   ;;  %s5489_s8 = inlined_call_operand.vmem [shape: bf16[2,32,96], index: 8, kind: input, shape index: {}]   ;;  %s5490_s9 = inlined_call_operand.vmem [shape: f32[2,1,96], index: 9, kind: input, shape index: {}]   ;;  %s5491_s10 = inlined_call_operand.vmem [shape: bf16[2,32,32], index: 10, kind: input, shape index: {}]   ;;  %s5492_s11 = inlined_call_operand.vmem [shape: f32[2,1,32], index: 11, kind: input, shape index: {}]   ;;  %s5493_s12 = inlined_call_operand.vmem [shape: f32[2,1,32], index: 12, kind: input, shape index: {}]   ;;  %s5494_s13 = inlined_call_operand.vmem [shape: f32[2,1,32], index: 13, kind: input, shape index: {}]   ;;  %s5495_s14 = inlined_call_operand.vmem [shape: bf16[2,32,64], index: 14, kind: input, shape index: {}]   ;;  %s5496_s15 = inlined_call_operand.vmem [shape: f32[2,1,64], index: 15, kind: input, shape index: {}]   ;;  %s5497_s16 = inlined_call_operand.vmem [shape: bf16[2,64,32], index: 16, kind: input, shape index: {}]   ;;  %s5498_s17 = inlined_call_operand.vmem [shape: f32[2,1,32], index: 17, kind: input, shape index: {}]   ;;  %s5499_s18 = inlined_call_operand.vmem [shape: f32[2,1,32], index: 18, kind: input, shape index: {}]   ;;  %s5500_s19 = inlined_call_operand.vmem [shape: f32[2,1,32], index: 19, kind: input, shape index: {}]   ;;  %s5501_s20 = inlined_call_operand.vmem [shape: bf16[32,32], index: 20, kind: input, shape index: {}]   ;;  %s5502_s21 = inlined_call_operand.vmem [shape: f32[1,32], index: 21, kind: input, shape index: {}]   ;;  %s5503_s22 = inlined_call_operand.vmem [shape: bf16[32,16], index: 22, kind: input, shape index: {}]   ;;  %s5504_s23 = inlined_call_operand.vmem [shape: f32[1,16], index: 23, kind: input, shape index: {}]   ;;  %s5505_s24 = inlined_call_operand.hbm [shape: f32[2,16], index: 24, kind: output, shape index: {}]  }
   0x1   :  { %5519 = sst [smem:[#allocation10_spill]] %s5481_s0 }
   0x2   :  { %5520 = sst [smem:[#allocation11_spill]] %s5482_s1 }
   0x3   :  { %5521 = sst [smem:[#allocation12_spill]] %s5483_s2 }
   0x4   :  { %5522 = sst [smem:[#allocation13_spill]] %s5484_s3 }
   0x5   :  { %5523 = sst [smem:[#allocation14_spill]] %s5485_s4 }
   0x6   :  { %5524 = sst [smem:[#allocation15_spill]] %s5486_s5 }
   0x7   :  { %5525 = sst [smem:[#allocation16_spill]] %s5487_s6 }
   0x8   :  { %5526 = sst [smem:[#allocation17_spill]] %s5488_s7 }
   0x9   :  { %5527 = sst [smem:[#allocation18_spill]] %s5489_s8 }
   0xa   :  { %5528 = sst [smem:[#allocation19_spill]] %s5496_s15 }
   0xb   :  { %5529 = sst [smem:[#allocation20_spill]] %s5497_s16 }
   0xc   :  { %5530 = sst [smem:[#allocation21_spill]] %s5498_s17 }
   0xd   :  { %5531 = sst [smem:[#allocation22_spill]] %s5499_s18 }
   0xe   :  { %5532 = sst [smem:[#allocation23_spill]] %s5500_s19 }
   0xf   :  { %5533 = sst [smem:[#allocation24_spill]] %s5501_s20 }
  0x10   :  { %5534 = sst [smem:[#allocation25_spill]] %s5502_s21 }
  0x11   :  { %5535 = sst [smem:[#allocation26_spill]] %s5503_s22 }
  0x12   :  { %5536 = sst [smem:[#allocation27_spill]] %s5504_s23 }
  0x13   :  { %5537 = sst [smem:[#allocation28_spill]] %s5505_s24 }
  0x14   :  { %29 = vsyncpa [#allocation6], 0 }
  0x15   :  { %30 = vsyncpa [#allocation5], 0  ;;  %s5538_s27 = sld [smem:[#allocation10_spill]] }
  0x1b   :  { %s37_s28 = sshll.u32 %s5538_s27, 4  ;;  %s38_s28 = int_to_ptr.vmem [resolvable:$true] %s37_s28 }
  0x1c   :  { %s4618_s6 = scalar_lea.vmem %s38_s28, 32  ;;  %p4623_p1 = scmp.lt.s32.totalorder %s38_s28, %s38_s28 }
  0x1d   :  { %p4619_p0 = scmp.ne.s32.totalorder %s38_s28, %s4618_s6  ;;  %p4624_p2 = scmp.lt.s32.totalorder %s4618_s6, %s4618_s6 }
  0x1f   :  { %p4625_p3 = por %p4624_p2, %p4623_p1 }
  0x21   :  { %p4626_p4 = pnand %p4625_p3, %p4619_p0 }
  0x23   :  { %4629 = shalt.err (!%p4626_p4)
}
  0x24   :  { %s4656_s2 = smov [#allocation4]  }
  0x25   :  { %40 = dma.vmem_to_smem %s38_s28, 32, %s4656_s2, [#allocation6]  }
  0x26   :  { %4652 = dma.done.wait [#allocation6], 32  }
  0x27   :  { %4653 = vsyncadd [#allocation6], 4294967264 }
  0x28   :  { %90 = sfence }
  0x29   :  { %s5539_s7 = sld [smem:[#allocation11_spill]]  ;;  %v4657_v1 = vmov 0   ;;  %s92_s30 = sld [smem:[#allocation4]]  ;;  %vm95_vm0 = vcmask 253952   ;;  %v175_v19 = vlaneseq  ;;  %vm198_vm1 = vcmask 261120  }
  0x2a   :  { %4499 = vset.pattern.permute.xlu0 %v4657_v1  ;;  %s3984_s3 = sld [smem:[#allocation4 + $0x1]]  ;;  %s3985_s25 = sld [smem:[#allocation4 + $0x2]]  ;;  %v4658_v53 = vmov 0.0   ;;  %vm4659_vm2 = vmmov 0   ;;  %vm314_vm3 = vcmask 64512   ;;  %vm654_vm4 = vcmask 130112  }
  0x2b   :  { %s3986_s8 = sld [smem:[#allocation4 + $0x3]]  ;;  %s3987_s5 = sld [smem:[#allocation4 + $0x4]]  ;;  %v176_v20 = vshrl.u32 %v175_v19, 7  ;;  %4232 = vmatprep.subr.bf16.mxu0 %v4658_v53  ;;  %4236 = vmatprep.mubr.msk.bf16.mxu0 %vm4659_vm2, %v4658_v53  ;;  %vm827_vm5 = vcmask 195712   ;;  %vm1000_vm6 = vcmask 261312   ;;  %vm1932_vm7 = vcmask 523264  }
  0x2c   :  { %s3988_s26 = sld [smem:[#allocation4 + $0x5]]  ;;  %s3989_s27 = sld [smem:[#allocation4 + $0x6]]  ;;  %4240 = vmatprep.subr.mxu1 %v4658_v53  ;;  %4242 = vmatprep.mubr.msk.f32.mxu1 %vm4659_vm2, %v4658_v53  ;;  %vm3814_vm8 = vcmask 1040384   ;;  %vm3951_vm9 = vcmask 123904  }
  0x2d   :  { %s3990_s28 = sld [smem:[#allocation4 + $0x7]]  ;;  %s4809_s6 = sld [smem:[#allocation4 + $0x80]]  ;;  %v177_v24 = vsub.s32 0, %v176_v20 }
  0x2e   :  { %s4811_s2 = sld [smem:[#allocation4 + $0x81]]  ;;  %s4813_s29 = sld [smem:[#allocation4 + $0x82]] }
  0x2f   :  { %v158_v0 = vld [vmem:[%s5539_s7] sm:$0xff]  ;;  %v159_v2 = vld [vmem:[%s5539_s7 + $0x8] sm:$0xff]  ;;  %s4815_s0 = sld [smem:[#allocation4 + $0x83]]  ;;  %s5540_s21 = sld [smem:[#allocation13_spill]] }
  0x30   :  { %166 = vperm.xlu0 %4499, %v158_v0   ;;  %s4667_s24 = smov 72   ;;  %s4671_s15 = smov 8  }
  0x31   :  { %s5550_s20 = sld [smem:[#allocation22_spill]]  ;;  %s5551_s7 = sld [smem:[#allocation23_spill]] }
  0x34   :  { %171 = vperm.xlu0 %4499, %v159_v2  }
  0x35   :  { %s93_s22 = scalar_lea.vmem %s5540_s21, %s92_s30  ;;  %s98_s1 = scalar_lea.vmem %s5540_s21, %s3984_s3 }
  0x36   :  { %v94_v3 = vld [vmem:[%s93_s22] sm:$0x1]  ;;  %s102_s18 = scalar_lea.vmem %s5540_s21, %s3985_s25  ;;  %s106_s16 = scalar_lea.vmem %s5540_s21, %s3986_s8 }
  0x37   :  { %v99_v4 = vld [vmem:[%s98_s1] sm:$0x1]  ;;  %96 = vst.msk [vmem:[#allocation2] sm:$0x1] %vm95_vm0, %v94_v3  ;;  %s110_s22 = scalar_lea.vmem %s5540_s21, %s3987_s5  ;;  %s114_s19 = scalar_lea.vmem %s5540_s21, %s3988_s26 }
  0x38   :  { %100 = vst.msk [vmem:[#allocation2 + $0x1] sm:$0x1] %vm95_vm0, %v99_v4  ;;  %v103_v5 = vld [vmem:[%s102_s18] sm:$0x1]  ;;  %s122_s25 = scalar_lea.vmem %s5540_s21, %s3990_s28  ;;  %s126_s26 = scalar_lea.vmem %s5540_s21, %s4809_s6 }
  0x39   :  { %v107_v6 = vld [vmem:[%s106_s16] sm:$0x1]  ;;  %104 = vst.msk [vmem:[#allocation2 + $0x2] sm:$0x1] %vm95_vm0, %v103_v5  ;;  %s118_s16 = scalar_lea.vmem %s5540_s21, %s3989_s27  ;;  %s130_s1 = scalar_lea.vmem %s5540_s21, %s4811_s2 }
  0x3a   :  { %108 = vst.msk [vmem:[#allocation2 + $0x3] sm:$0x1] %vm95_vm0, %v107_v6  ;;  %v111_v7 = vld [vmem:[%s110_s22] sm:$0x1]  ;;  %s134_s23 = scalar_lea.vmem %s5540_s21, %s4813_s29  ;;  %s138_s30 = scalar_lea.vmem %s5540_s21, %s4815_s0 }
  0x3b   :  { %v115_v8 = vld [vmem:[%s114_s19] sm:$0x1]  ;;  %112 = vst.msk [vmem:[#allocation2 + $0x4] sm:$0x1] %vm95_vm0, %v111_v7  ;;  %s3995_s6 = sld [smem:[#allocation4 + $0x84]]  ;;  %s3996_s2 = sld [smem:[#allocation4 + $0x85]] }
  0x3c   :  { %116 = vst.msk [vmem:[#allocation2 + $0x5] sm:$0x1] %vm95_vm0, %v115_v8  ;;  %v119_v9 = vld [vmem:[%s118_s16] sm:$0x1]  ;;  %s3997_s3 = sld [smem:[#allocation4 + $0x86]]  ;;  %s3998_s19 = sld [smem:[#allocation4 + $0x87]] }
  0x3d   :  { %v123_v10 = vld [vmem:[%s122_s25] sm:$0x1]  ;;  %120 = vst.msk [vmem:[#allocation2 + $0x6] sm:$0x1] %vm95_vm0, %v119_v9  ;;  %s5541_s27 = sld [smem:[#allocation15_spill]]  ;;  %s5542_s22 = sld [smem:[#allocation14_spill]] }
  0x3e   :  { %124 = vst.msk [vmem:[#allocation2 + $0x7] sm:$0x1] %vm95_vm0, %v123_v10  ;;  %v127_v11 = vld [vmem:[%s126_s26] sm:$0x1]  ;;  %s4661_s5 = smov 96   ;;  %s4662_s26 = smov 88  }
  0x3f   :  { %v131_v12 = vld [vmem:[%s130_s1] sm:$0x1]  ;;  %128 = vst.msk [vmem:[#allocation2 + $0x8] sm:$0x1] %vm95_vm0, %v127_v11  ;;  %s4664_s28 = smov 120   ;;  %s4672_s29 = smov 16  }
  0x40   :  { %132 = vst.msk [vmem:[#allocation2 + $0x9] sm:$0x1] %vm95_vm0, %v131_v12  ;;  %v135_v13 = vld [vmem:[%s134_s23] sm:$0x1]  ;;  %s4665_s23 = smov 112  }
  0x41   :  { %v139_v14 = vld [vmem:[%s138_s30] sm:$0x1]  ;;  %136 = vst.msk [vmem:[#allocation2 + $0xa] sm:$0x1] %vm95_vm0, %v135_v13  ;;  %s142_s17 = scalar_lea.vmem %s5540_s21, %s3995_s6  ;;  %s146_s18 = scalar_lea.vmem %s5540_s21, %s3996_s2 }
  0x42   :  { %140 = vst.msk [vmem:[#allocation2 + $0xb] sm:$0x1] %vm95_vm0, %v139_v14  ;;  %v143_v15 = vld [vmem:[%s142_s17] sm:$0x1]  ;;  %s150_s8 = scalar_lea.vmem %s5540_s21, %s3997_s3  ;;  %s154_s4 = scalar_lea.vmem %s5540_s21, %s3998_s19 }
  0x43   :  { %144 = vst.msk [vmem:[#allocation2 + $0xc] sm:$0x1] %vm95_vm0, %v143_v15  ;;  %v147_v16 = vld [vmem:[%s146_s18] sm:$0x1]  ;;  %v3999_v22 = vld [vmem:[%s5541_s27 + $0x1] sm:$0x1] }
  0x44   :  { %v151_v17 = vld [vmem:[%s150_s8] sm:$0x1]  ;;  %148 = vst.msk [vmem:[#allocation2 + $0xd] sm:$0x1] %vm95_vm0, %v147_v16  ;;  %s5543_s2 = sld [smem:[#allocation18_spill]]  ;;  %s5544_s17 = sld [smem:[#allocation16_spill]] }
  0x45   :  { %152 = vst.msk [vmem:[#allocation2 + $0xe] sm:$0x1] %vm95_vm0, %v151_v17  ;;  %v155_v18 = vld [vmem:[%s154_s4] sm:$0x1]  ;;  %s5545_s18 = sld [smem:[#allocation17_spill]]  ;;  %s4660_s8 = smov 64  }
  0x46   :  { %156 = vst.msk [vmem:[#allocation2 + $0xf] sm:$0x1] %vm95_vm0, %v155_v18  ;;  %v160_v21 = vld [vmem:[%s5541_s27] sm:$0x1]  ;;  %s4663_s4 = smov 80   ;;  %s5546_s27 = sld [smem:[#allocation12_spill]] }
  0x47   :  { %v163_v23 = vsub.f32 %v3999_v22, %v160_v21  ;;  %v157_v26 = vld [vmem:[%s5542_s22] sm:$0xff]  ;;  %v186_v28 = vrot.slane %v160_v21, %v177_v24  ;;  %s4666_s21 = smov 104   ;;  %s4668_s6 = smov 56  }
  0x48   :  { %v190_v27 = vld [vmem:[#allocation2] sm:$0xff]  ;;  %s4669_s3 = smov 48   ;;  %s4670_s19 = smov 40  }
  0x49   :  { %v178_v25 = vrot.slane %v163_v23, %v177_v24  ;;  %v192_v31 = vadd.f32 %v190_v27, %v157_v26  ;;  %v4002_v8 = vld [vmem:[%s5490_s9] ss:$0 sm:$0xff]  ;;  %s5547_s22 = sld [smem:[#allocation20_spill]]  ;;  %s5548_s30 = sld [smem:[#allocation19_spill]] }
  0x4a   :  { %v4500_v52 = vld [vmem:[%s5543_s2] sm:$0xff]   ;;  %v4501_v54 = vld [vmem:[%s5543_s2 + $0x8] sm:$0xff]  }
  0x4b   :  { %4233 = vmatpush3.bf16.msra.mxu0 %v4500_v52  ;;  %v4000_v63 = vld [vmem:[%s5544_s17] ss:$0 sm:$0xff]  ;;  %s4673_s17 = smov 24  }
  0x4c   :  { %4234 = vmatprep.subr.bf16.mxu0 %v4658_v53  ;;  %v4001_v3 = vld [vmem:[%s5545_s18] ss:$0 sm:$0xff]  ;;  %s5549_s18 = sld [smem:[#allocation21_spill]] }
  0x4d   :  { %v191_v32 = vld [vmem:[#allocation2 + $0x8] sm:$0xff]  ;;  %v4952_v18 = vld [vmem:[%s5546_s27] ss:$0 sm:$0xff] }
  0x4e   :  { %v193_v37 = vadd.f32 %v191_v32, %v157_v26 }
  0x4f   :  { %4235 = vmatpush3.bf16.msra.mxu0 %v4501_v54 }
  0x50   :  { %4255 = vmatprep.subr.mxu0 %v4658_v53 }
  0xaf   :  { %v167_v29 = vpop.permute.xlu0 %166 }
  0xb0   :  { %v180_v30 = vmul.f32 %v178_v25, %v167_v29 }
  0xb2   :  { %v188_v33 = vadd.f32 %v186_v28, %v180_v30 }
  0xb3   :  { %v172_v34 = vpop.permute.xlu0 %171 }
  0xb4   :  { %v181_v35 = vmul.f32 %v178_v25, %v172_v34  ;;  %v194_v36 = vadd.f32 %v192_v31, %v188_v33 }
  0xb6   :  { %v189_v38 = vadd.f32 %v186_v28, %v181_v35  ;;  %v199_v39 = vsel %vm198_vm1, %v194_v36, 0.0 }
  0xb7   :  { %200 = vadd.xlane.f32.xlu1 %v199_v39 }
  0xb8   :  { %v195_v40 = vadd.f32 %v193_v37, %v189_v38 }
  0xba   :  { %v202_v41 = vsel %vm198_vm1, %v195_v40, 0.0 }
  0xbb   :  { %203 = vadd.xlane.f32.xlu1 %v202_v41 }
 0x144   :  { %v201_v42 = vpop.xlane.xlu1 %200 }
 0x145   :  { %v206_v43 = vmul.f32 0.03125, %v201_v42 }
 0x147   :  { %v208_v44 = vsub.f32 %v194_v36, %v206_v43 }
 0x148   :  { %v204_v45 = vpop.xlane.xlu1 %203 }
 0x149   :  { %v207_v46 = vmul.f32 0.03125, %v204_v45  ;;  %v210_v47 = vmul.f32 %v208_v44, %v208_v44 }
 0x14b   :  { %v209_v48 = vsub.f32 %v195_v40, %v207_v46  ;;  %v212_v49 = vsel %vm198_vm1, %v210_v47, 0.0 }
 0x14c   :  { %213 = vadd.xlane.f32.xlu0 %v212_v49 }
 0x14d   :  { %v211_v50 = vmul.f32 %v209_v48, %v209_v48 }
 0x14f   :  { %v215_v51 = vsel %vm198_vm1, %v211_v50, 0.0 }
 0x150   :  { %216 = vadd.xlane.f32.xlu1 %v215_v51 }
 0x1d9   :  { %v214_v55 = vpop.xlane.xlu0 %213 }
 0x1da   :  { %v218_v56 = vmul.f32 0.03125, %v214_v55 }
 0x1dc   :  { %v220_v57 = vadd.f32 1e-12, %v218_v56 }
 0x1dd   :  { %v217_v58 = vpop.xlane.xlu1 %216 }
 0x1de   :  { %4524 = vrsqrt.f32 %v220_v57  ;;  %v219_v59 = vmul.f32 0.03125, %v217_v58 }
 0x1e0   :  { %v221_v60 = vadd.f32 1e-12, %v219_v59 }
 0x1e2   :  { %4526 = vrsqrt.f32 %v221_v60 }
 0x1e8   :  { %v4525_v61 = vpop.eup %4524 }
 0x1e9   :  { %v224_v62 = vmul.f32 %v4525_v61, %v208_v44 }
 0x1eb   :  { %v232_v2 = vmul.f32 %v4000_v63, %v224_v62  ;;  %v5027_v62 = vld [vmem:[%s5546_s27 + $0x1] ss:$0 sm:$0xff] }
 0x1ec   :  { %v4527_v0 = vpop.eup %4526 }
 0x1ed   :  { %v225_v1 = vmul.f32 %v4527_v0, %v209_v48  ;;  %v4918_v5 = vadd.f32 %v4001_v3, %v232_v2 }
 0x1ef   :  { %v233_v4 = vmul.f32 %v4000_v63, %v225_v1 }
 0x1f1   :  { %v4920_v6 = vadd.f32 %v4001_v3, %v233_v4 }
 0x1f3   :  { %v242_v7 = vpack.c.bf16 %v4920_v6, %v4918_v5 }
 0x1f5   :  { %4237 = vmatmul.mubr.msk.bf16.vlgmr.msra.gmra.mrb[0].mxu0 %vm198_vm1, %v242_v7 }
 0x1f6   :  { %4257 = vmatprep.mubr.msk.f32.mxu0 %vm4659_vm2, %v4658_v53 }
 0x2c8   :  { %v303_v9 = vpop.f32.mrb[0].mxu0 }
 0x2c9   :  { %v4930_v10 = vadd.f32 %v4002_v8, %v303_v9  ;;  %v4238_v11 = vpop.f32.mrb[1].mxu0 }
 0x2ca   :  { %v306_v12 = vpop.f32.mrb[2].mxu0 }
 0x2cb   :  { %v4932_v13 = vadd.f32 %v4002_v8, %v306_v12  ;;  %406 = vrot.lane.b32.xlu0 %v4930_v10, %s4660_s8  ;;  %312 = vrot.lane.b32.xlu1 %v4930_v10, %s4661_s5  ;;  %v4239_v14 = vpop.f32.mrb[3].mxu0 }
 0x2cf   :  { %485 = vrot.lane.b32.xlu0 %v4930_v10, %s4662_s26 }
 0x2d3   :  { %658 = vrot.lane.b32.xlu0 %v4930_v10, %s4663_s4 }
 0x33d   :  { %v313_v15 = vpop.permute.xlu1 %312  ;;  %v407_v16 = vpop.permute.xlu0 %406 }
 0x33e   :  { %4241 = vmatpush3.xpose.msk.msra.mxu1 %vm314_vm3, %v313_v15 }
 0x33f   :  { %4245 = vmatprep.subr.mxu1 %v4658_v53 }
 0x341   :  { %4243 = vmatmul.mubr.msk.f32.vlgmr.msra.gmra.mrb[0].mxu1 %vm314_vm3, %v4930_v10  ;;  %v486_v28 = vpop.permute.xlu0 %485 }
 0x342   :  { %4246 = vmatpush3.msra.mxu1 %v407_v16  ;;  %4247 = vmatprep.mubr.msk.f32.mxu1 %vm4659_vm2, %v4658_v53 }
 0x343   :  { %4250 = vmatprep.subr.mxu1 %v4658_v53 }
 0x345   :  { %v659_v29 = vpop.permute.xlu0 %658 }
 0x414   :  { %v385_v17 = vpop.f32.mrb[0].mxu1 }
 0x415   :  { %v389_v19 = vmul.f32 0.35355338, %v385_v17  ;;  %v4244_v20 = vpop.f32.mrb[1].mxu1 }
 0x417   :  { %v394_v21 = vadd.f32 %v4952_v18, %v389_v19 }
 0x419   :  { %v395_v22 = vsel %vm314_vm3, %v394_v21, -inf }
 0x41a   :  { %396 = vmax.xlane.f32.xlu1 %v395_v22 }
 0x42b   :  { %483 = vrot.lane.b32.xlu1 %v4930_v10, %s4664_s28 }
 0x42f   :  { %1004 = vrot.lane.b32.xlu1 %v4932_v13, %s4661_s5 }
 0x433   :  { %1174 = vrot.lane.b32.xlu1 %v4932_v13, %s4664_s28 }
 0x437   :  { %1346 = vrot.lane.b32.xlu1 %v4932_v13, %s4665_s23 }
 0x43b   :  { %1518 = vrot.lane.b32.xlu1 %v4932_v13, %s4666_s21 }
 0x4a7   :  { %v397_v23 = vpop.xlane.xlu1 %396 }
 0x4a8   :  { %v398_v24 = vsub.f32 %v394_v21, %v397_v23 }
 0x4aa   :  { %v399_v25 = vmul.f32 1.442695, %v398_v24 }
 0x4ab   :  { %v484_v35 = vpop.permute.xlu1 %483 }
 0x4ac   :  { %4528 = vpow2.f32 %v399_v25 }
 0x4af   :  { %v1005_v37 = vpop.permute.xlu1 %1004 }
 0x4b3   :  { %v1175_v39 = vpop.permute.xlu1 %1174 }
 0x4b6   :  { %v4529_v26 = vpop.eup %4528 }
 0x4b7   :  { %v401_v27 = vsel %vm314_vm3, %v4529_v26, 0.0  ;;  %v1347_v41 = vpop.permute.xlu1 %1346 }
 0x4b8   :  { %402 = vadd.xlane.f32.xlu0 %v401_v27 }
 0x4bb   :  { %v1519_v43 = vpop.permute.xlu1 %1518 }
 0x4ce   :  { %656 = vrot.lane.b32.xlu0 %v4930_v10, %s4665_s23 }
 0x4d2   :  { %831 = vrot.lane.b32.xlu0 %v4930_v10, %s4667_s24 }
 0x4d6   :  { %829 = vrot.lane.b32.xlu0 %v4930_v10, %s4666_s21 }
 0x4da   :  { %1176 = vrot.lane.b32.xlu0 %v4932_v13, %s4662_s26 }
 0x4de   :  { %1348 = vrot.lane.b32.xlu0 %v4932_v13, %s4663_s4 }
 0x4e2   :  { %1520 = vrot.lane.b32.xlu0 %v4932_v13, %s4667_s24 }
 0x545   :  { %v403_v30 = vpop.xlane.xlu0 %402 }
 0x546   :  { %4530 = vrcp.f32 %v403_v30 }
 0x549   :  { %v657_v31 = vpop.permute.xlu0 %656 }
 0x54d   :  { %v832_v34 = vpop.permute.xlu0 %831 }
 0x550   :  { %v4531_v32 = vpop.eup %4530 }
 0x551   :  { %v405_v33 = vmul.f32 %v4531_v32, %v4529_v26  ;;  %v830_v36 = vpop.permute.xlu0 %829 }
 0x553   :  { %4248 = vmatmul.mubr.msk.f32.vlgmr.msra.gmra.mrb[2].mxu1 %vm314_vm3, %v405_v33 }
 0x554   :  { %4251 = vmatpush3.xpose.msk.msra.mxu1 %vm314_vm3, %v486_v28  ;;  %4252 = vmatprep.mubr.msk.f32.mxu1 %vm4659_vm2, %v4658_v53 }
 0x555   :  { %4260 = vmatprep.subr.mxu1 %v4658_v53  ;;  %v1177_v38 = vpop.permute.xlu0 %1176 }
 0x557   :  { %4253 = vmatmul.mubr.msk.f32.vlgmr.msra.gmra.mrb[4].mxu1 %vm314_vm3, %v484_v35 }
 0x558   :  { %4261 = vmatpush3.xpose.msk.msra.mxu1 %vm314_vm3, %v659_v29  ;;  %4262 = vmatprep.mubr.msk.f32.mxu1 %vm4659_vm2, %v4658_v53 }
 0x559   :  { %4270 = vmatprep.subr.mxu1 %v4658_v53  ;;  %v1349_v40 = vpop.permute.xlu0 %1348 }
 0x55b   :  { %4263 = vmatmul.mubr.msk.f32.vlgmr.msra.gmra.mrb[6].mxu1 %vm314_vm3, %v657_v31 }
 0x55c   :  { %4271 = vmatpush3.xpose.msk.msra.mxu1 %vm314_vm3, %v832_v34  ;;  %4272 = vmatprep.mubr.msk.f32.mxu1 %vm4659_vm2, %v4658_v53 }
 0x55d   :  { %4280 = vmatprep.subr.mxu1 %v4658_v53  ;;  %v1521_v42 = vpop.permute.xlu0 %1520 }
 0x55f   :  { %4273 = vmatmul.mubr.msk.f32.vlgmr.msra.gmra.mrb[8].mxu1 %vm314_vm3, %v830_v36 }
 0x560   :  { %4281 = vmatpush3.xpose.msk.msra.mxu1 %vm314_vm3, %v1005_v37  ;;  %4282 = vmatprep.mubr.msk.f32.mxu1 %vm4659_vm2, %v4658_v53 }
 0x561   :  { %4290 = vmatprep.subr.mxu1 %v4658_v53 }
 0x563   :  { %4283 = vmatmul.mubr.msk.f32.vlgmr.msra.gmra.mrb[10].mxu1 %vm314_vm3, %v4932_v13 }
 0x564   :  { %4291 = vmatpush3.xpose.msk.msra.mxu1 %vm314_vm3, %v1177_v38  ;;  %4292 = vmatprep.mubr.msk.f32.mxu1 %vm4659_vm2, %v4658_v53 }
 0x565   :  { %4300 = vmatprep.subr.mxu1 %v4658_v53 }
 0x567   :  { %4293 = vmatmul.mubr.msk.f32.vlgmr.msra.gmra.mrb[12].mxu1 %vm314_vm3, %v1175_v39 }
 0x568   :  { %4301 = vmatpush3.xpose.msk.msra.mxu1 %vm314_vm3, %v1349_v40  ;;  %4302 = vmatprep.mubr.msk.f32.mxu1 %vm4659_vm2, %v4658_v53 }
 0x569   :  { %4310 = vmatprep.subr.mxu1 %v4658_v53 }
 0x56b   :  { %4303 = vmatmul.mubr.msk.f32.vlgmr.msra.gmra.mrb[14].mxu1 %vm314_vm3, %v1347_v41 }
 0x56c   :  { %4311 = vmatpush3.xpose.msk.msra.mxu1 %vm314_vm3, %v1521_v42  ;;  %4312 = vmatprep.mubr.msk.f32.mxu1 %vm4659_vm2, %v4658_v53 }
 0x56d   :  { %4320 = vmatprep.subr.bf16.mxu1 %v4658_v53 }
 0x56f   :  { %4313 = vmatmul.mubr.msk.f32.vlgmr.msra.gmra.mrb[16].mxu1 %vm314_vm3, %v1519_v43 }
 0x570   :  { %4324 = vmatprep.mubr.msk.bf16.mxu1 %vm4659_vm2, %v4658_v53 }
 0x626   :  { %v478_v44 = vpop.f32.mrb[2].mxu1 }
 0x627   :  { %482 = vst.msk [vmem:[#allocation3] sm:$0xff] %vm314_vm3, %v478_v44  ;;  %v4249_v45 = vpop.f32.mrb[3].mxu1 }
 0x62a   :  { %v557_v46 = vpop.f32.mrb[4].mxu1 }
 0x62b   :  { %v561_v47 = vmul.f32 0.35355338, %v557_v46  ;;  %v4254_v48 = vpop.f32.mrb[5].mxu1 }
 0x62d   :  { %v562_v49 = vadd.f32 %v4952_v18, %v561_v47 }
 0x62e   :  { %v730_v50 = vpop.f32.mrb[6].mxu1 }
 0x62f   :  { %v734_v51 = vmul.f32 0.35355338, %v730_v50  ;;  %v4264_v52 = vpop.f32.mrb[7].mxu1  ;;  %v563_v54 = vsel %vm314_vm3, %v562_v49, -inf }
 0x630   :  { %564 = vmax.xlane.f32.xlu0 %v563_v54 }
 0x631   :  { %v735_v55 = vadd.f32 %v4952_v18, %v734_v51 }
 0x632   :  { %v903_v56 = vpop.f32.mrb[8].mxu1 }
 0x633   :  { %v907_v57 = vmul.f32 0.35355338, %v903_v56  ;;  %v4274_v58 = vpop.f32.mrb[9].mxu1  ;;  %v736_v59 = vsel %vm314_vm3, %v735_v55, -inf }
 0x634   :  { %737 = vmax.xlane.f32.xlu1 %v736_v59 }
 0x635   :  { %v908_v60 = vadd.f32 %v4952_v18, %v907_v57 }
 0x636   :  { %v1076_v61 = vpop.f32.mrb[10].mxu1 }
 0x637   :  { %v1080_v63 = vmul.f32 0.35355338, %v1076_v61  ;;  %v4284_v0 = vpop.f32.mrb[11].mxu1  ;;  %v909_v1 = vsel %vm314_vm3, %v908_v60, -inf }
 0x638   :  { %910 = vmax.xlane.f32.xlu0 %v909_v1 }
 0x639   :  { %v1085_v2 = vadd.f32 %v5027_v62, %v1080_v63 }
 0x63a   :  { %v1248_v3 = vpop.f32.mrb[12].mxu1 }
 0x63b   :  { %v1252_v4 = vmul.f32 0.35355338, %v1248_v3  ;;  %v4294_v7 = vpop.f32.mrb[13].mxu1  ;;  %v1086_v8 = vsel %vm314_vm3, %v1085_v2, -inf }
 0x63c   :  { %1087 = vmax.xlane.f32.xlu0 %v1086_v8 }
 0x63d   :  { %v5033_v9 = vadd.f32 %v5027_v62, %v1252_v4 }
 0x63e   :  { %v1420_v11 = vpop.f32.mrb[14].mxu1 }
 0x63f   :  { %v1424_v12 = vmul.f32 0.35355338, %v1420_v11  ;;  %v4304_v14 = vpop.f32.mrb[15].mxu1  ;;  %v1254_v15 = vsel %vm314_vm3, %v5033_v9, -inf }
 0x640   :  { %1255 = vmax.xlane.f32.xlu1 %v1254_v15 }
 0x641   :  { %v1425_v16 = vadd.f32 %v5027_v62, %v1424_v12 }
 0x642   :  { %v1592_v17 = vpop.f32.mrb[16].mxu1 }
 0x643   :  { %v1596_v18 = vmul.f32 0.35355338, %v1592_v17  ;;  %v4314_v19 = vpop.f32.mrb[17].mxu1  ;;  %v1426_v20 = vsel %vm314_vm3, %v1425_v16, -inf }
 0x644   :  { %1427 = vmax.xlane.f32.xlu0 %v1426_v20 }
 0x645   :  { %v1597_v21 = vadd.f32 %v5027_v62, %v1596_v18 }
 0x647   :  { %v1598_v22 = vsel %vm314_vm3, %v1597_v21, -inf }
 0x648   :  { %1599 = vmax.xlane.f32.xlu1 %v1598_v22 }
 0x659   :  { %574 = vrot.lane.b32.xlu1 %v4930_v10, %s4668_s6 }
 0x65a   :  { %747 = vrot.lane.b32.xlu0 %v4930_v10, %s4669_s3 }
 0x65d   :  { %920 = vrot.lane.b32.xlu1 %v4930_v10, %s4670_s19 }
 0x661   :  { %1097 = vrot.lane.b32.xlu1 %v4932_v13, %s4660_s8 }
 0x6bd   :  { %v565_v23 = vpop.xlane.xlu0 %564 }
 0x6be   :  { %v566_v24 = vsub.f32 %v562_v49, %v565_v23 }
 0x6c0   :  { %v567_v25 = vmul.f32 1.442695, %v566_v24 }
 0x6c1   :  { %v738_v26 = vpop.xlane.xlu1 %737 }
 0x6c2   :  { %4532 = vpow2.f32 %v567_v25  ;;  %v739_v27 = vsub.f32 %v735_v55, %v738_v26 }
 0x6c4   :  { %v740_v28 = vmul.f32 1.442695, %v739_v27 }
 0x6c5   :  { %v911_v29 = vpop.xlane.xlu0 %910 }
 0x6c6   :  { %4534 = vpow2.f32 %v740_v28  ;;  %v912_v30 = vsub.f32 %v908_v60, %v911_v29 }
 0x6c8   :  { %v913_v31 = vmul.f32 1.442695, %v912_v30 }
 0x6c9   :  { %v1088_v32 = vpop.xlane.xlu0 %1087 }
 0x6ca   :  { %4536 = vpow2.f32 %v913_v31  ;;  %v1089_v33 = vsub.f32 %v1085_v2, %v1088_v32 }
 0x6cc   :  { %v4533_v34 = vpop.eup %4532  ;;  %v1090_v35 = vmul.f32 1.442695, %v1089_v33 }
 0x6cd   :  { %v569_v10 = vsel %vm314_vm3, %v4533_v34, 0.0  ;;  %v1256_v37 = vpop.xlane.xlu1 %1255 }
 0x6ce   :  { %4538 = vpow2.f32 %v1090_v35  ;;  %570 = vadd.xlane.f32.xlu0 %v569_v10  ;;  %v1257_v50 = vsub.f32 %v5033_v9, %v1256_v37  ;;  %v4503_v35 = vld [vmem:[%s5491_s10 + $0x8] sm:$0xff]  }
 0x6d0   :  { %v4535_v36 = vpop.eup %4534  ;;  %v1258_v51 = vmul.f32 1.442695, %v1257_v50  ;;  %v4032_v50 = vld [vmem:[%s5492_s11] ss:$0 sm:$0xff] }
 0x6d1   :  { %v1428_v38 = vpop.xlane.xlu0 %1427  ;;  %v742_v39 = vsel %vm314_vm3, %v4535_v36, 0.0 }
 0x6d2   :  { %v1429_v40 = vsub.f32 %v1425_v16, %v1428_v38  ;;  %743 = vadd.xlane.f32.xlu1 %v742_v39 }
 0x6d4   :  { %v4537_v41 = vpop.eup %4536  ;;  %v1430_v42 = vmul.f32 1.442695, %v1429_v40 }
 0x6d5   :  { %v1600_v43 = vpop.xlane.xlu1 %1599  ;;  %v915_v44 = vsel %vm314_vm3, %v4537_v41, 0.0  ;;  %v748_v60 = vpop.permute.xlu0 %747 }
 0x6d6   :  { %4540 = vpow2.f32 %v1430_v42  ;;  %916 = vadd.xlane.f32.xlu0 %v915_v44  ;;  %v1601_v52 = vsub.f32 %v1597_v21, %v1600_v43 }
 0x6d7   :  { %4542 = vpow2.f32 %v1258_v51 }
 0x6d8   :  { %v4539_v45 = vpop.eup %4538  ;;  %v1602_v54 = vmul.f32 1.442695, %v1601_v52 }
 0x6d9   :  { %v575_v46 = vpop.permute.xlu1 %574  ;;  %v1092_v47 = vsel %vm314_vm3, %v4539_v45, 0.0 }
 0x6da   :  { %1093 = vadd.xlane.f32.xlu1 %v1092_v47  ;;  %4256 = vmatpush3.msra.mxu0 %v575_v46  ;;  %4544 = vpow2.f32 %v1602_v54 }
 0x6db   :  { %4265 = vmatprep.subr.mxu0 %v4658_v53 }
 0x6dd   :  { %v921_v59 = vpop.permute.xlu1 %920 }
 0x6e0   :  { %v5054_v48 = vpop.eup %4540 }
 0x6e1   :  { %v1432_v49 = vsel %vm314_vm3, %v5054_v48, 0.0  ;;  %v4543_v55 = vpop.eup %4542  ;;  %v1098_v61 = vpop.permute.xlu1 %1097 }
 0x6e2   :  { %1433 = vadd.xlane.f32.xlu1 %v1432_v49  ;;  %v1260_v56 = vsel %vm314_vm3, %v4543_v55, 0.0 }
 0x6e4   :  { %v4545_v57 = vpop.eup %4544 }
 0x6e5   :  { %v1604_v58 = vsel %vm314_vm3, %v4545_v57, 0.0 }
 0x6ec   :  { %1265 = vrot.lane.b32.xlu0 %v4932_v13, %s4668_s6 }
 0x6f3   :  { %1437 = vrot.lane.b32.xlu1 %v4932_v13, %s4669_s3 }
 0x70b   :  { %1261 = vadd.xlane.f32.xlu0 %v1260_v56 }
 0x70f   :  { %1605 = vadd.xlane.f32.xlu0 %v1604_v58 }
 0x725   :  { %1609 = vrot.lane.b32.xlu0 %v4932_v13, %s4670_s19 }
 0x75b   :  { %v571_v63 = vpop.xlane.xlu0 %570 }
 0x75c   :  { %4546 = vrcp.f32 %v571_v63 }
 0x75f   :  { %v744_v0 = vpop.xlane.xlu1 %743 }
 0x760   :  { %4548 = vrcp.f32 %v744_v0 }
 0x763   :  { %v917_v1 = vpop.xlane.xlu0 %916 }
 0x764   :  { %4550 = vrcp.f32 %v917_v1 }
 0x766   :  { %v4547_v2 = vpop.eup %4546 }
 0x767   :  { %v573_v3 = vmul.f32 %v4547_v2, %v4533_v34  ;;  %v1094_v4 = vpop.xlane.xlu1 %1093  ;;  %v1266_v14 = vpop.permute.xlu0 %1265  ;;  %v4502_v34 = vld [vmem:[%s5491_s10] sm:$0xff]  }
 0x768   :  { %4552 = vrcp.f32 %v1094_v4  ;;  %4321 = vmatpush3.bf16.msra.mxu1 %v4502_v34 }
 0x769   :  { %4258 = vmatmul.mubr.msk.f32.vlgmr.msra.gmra.mrb[4].mxu0 %vm314_vm3, %v573_v3  ;;  %4322 = vmatprep.subr.bf16.mxu1 %v4658_v53 }
 0x76a   :  { %v4549_v7 = vpop.eup %4548  ;;  %4266 = vmatpush3.msra.mxu0 %v748_v60  ;;  %4267 = vmatprep.mubr.msk.f32.mxu0 %vm4659_vm2, %v4658_v53 }
 0x76b   :  { %v746_v13 = vmul.f32 %v4549_v7, %v4535_v36  ;;  %4275 = vmatprep.subr.mxu0 %v4658_v53 }
 0x76c   :  { %4323 = vmatpush3.bf16.msra.mxu1 %v4503_v35 }
 0x76d   :  { %4268 = vmatmul.mubr.msk.f32.vlgmr.msra.gmra.mrb[6].mxu0 %vm314_vm3, %v746_v13  ;;  %4336 = vmatprep.subr.bf16.mxu1 %v4658_v53 }
 0x76e   :  { %v4551_v8 = vpop.eup %4550  ;;  %4276 = vmatpush3.msra.mxu0 %v921_v59  ;;  %4277 = vmatprep.mubr.msk.f32.mxu0 %vm4659_vm2, %v4658_v53 }
 0x76f   :  { %v919_v9 = vmul.f32 %v4551_v8, %v4537_v41  ;;  %4285 = vmatprep.subr.mxu0 %v4658_v53  ;;  %v1434_v15 = vpop.xlane.xlu1 %1433 }
 0x771   :  { %4278 = vmatmul.mubr.msk.f32.vlgmr.msra.gmra.mrb[8].mxu0 %vm314_vm3, %v919_v9  ;;  %v4505_v9 = vld [vmem:[%s5495_s14 + $0x8] sm:$0xff]  }
 0x772   :  { %v4553_v11 = vpop.eup %4552  ;;  %4286 = vmatpush3.msra.mxu0 %v1098_v61  ;;  %4287 = vmatprep.mubr.msk.f32.mxu0 %vm4659_vm2, %v4658_v53 }
 0x773   :  { %v1096_v12 = vmul.f32 %v4553_v11, %v4539_v45  ;;  %4295 = vmatprep.subr.mxu0 %v4658_v53  ;;  %v1438_v21 = vpop.permute.xlu1 %1437 }
 0x775   :  { %4288 = vmatmul.mubr.msk.f32.vlgmr.msra.gmra.mrb[10].mxu0 %vm314_vm3, %v1096_v12 }
 0x776   :  { %4296 = vmatpush3.msra.mxu0 %v1266_v14  ;;  %4297 = vmatprep.mubr.msk.f32.mxu0 %vm4659_vm2, %v4658_v53 }
 0x777   :  { %4305 = vmatprep.subr.mxu0 %v4658_v53 }
 0x798   :  { %v1262_v16 = vpop.xlane.xlu0 %1261 }
 0x799   :  { %4554 = vrcp.f32 %v1262_v16 }
 0x79a   :  { %4556 = vrcp.f32 %v1434_v15 }
 0x79c   :  { %v1606_v17 = vpop.xlane.xlu0 %1605 }
 0x79d   :  { %4558 = vrcp.f32 %v1606_v17 }
 0x7a0   :  { %v1610_v24 = vpop.permute.xlu0 %1609 }
 0x7a3   :  { %v4555_v18 = vpop.eup %4554 }
 0x7a4   :  { %v1264_v19 = vmul.f32 %v4555_v18, %v4543_v55  ;;  %v4557_v20 = vpop.eup %4556 }
 0x7a5   :  { %v1436_v22 = vmul.f32 %v4557_v20, %v5054_v48 }
 0x7a6   :  { %4298 = vmatmul.mubr.msk.f32.vlgmr.msra.gmra.mrb[12].mxu0 %vm314_vm3, %v1264_v19  ;;  %v4036_v19 = vld [vmem:[%s5493_s12] ss:$0 sm:$0xff] }
 0x7a7   :  { %4306 = vmatpush3.msra.mxu0 %v1438_v21  ;;  %4307 = vmatprep.mubr.msk.f32.mxu0 %vm4659_vm2, %v4658_v53  ;;  %v4559_v23 = vpop.eup %4558 }
 0x7a8   :  { %4315 = vmatprep.subr.mxu0 %v4658_v53  ;;  %v1608_v25 = vmul.f32 %v4559_v23, %v4545_v57 }
 0x7aa   :  { %4308 = vmatmul.mubr.msk.f32.vlgmr.msra.gmra.mrb[14].mxu0 %vm314_vm3, %v1436_v22 }
 0x7ab   :  { %4316 = vmatpush3.msra.mxu0 %v1610_v24  ;;  %4317 = vmatprep.mubr.msk.f32.mxu0 %vm4659_vm2, %v4658_v53  ;;  %v4037_v24 = vld [vmem:[%s5494_s13] ss:$0 sm:$0xff] }
 0x7ac   :  { %4328 = vmatprep.subr.bf16.mxu0 %v4658_v53 }
 0x7ae   :  { %4318 = vmatmul.mubr.msk.f32.vlgmr.msra.gmra.mrb[16].mxu0 %vm314_vm3, %v1608_v25 }
 0x7af   :  { %4332 = vmatprep.mubr.msk.bf16.mxu0 %vm4659_vm2, %v4658_v53 }
 0x83c   :  { %v646_v26 = vpop.f32.mrb[4].mxu0 }
 0x83d   :  { %651 = vrot.lane.b32.xlu1 %v646_v26, %s4671_s15  ;;  %v4259_v27 = vpop.f32.mrb[5].mxu0 }
 0x840   :  { %v819_v28 = vpop.f32.mrb[6].mxu0 }
 0x841   :  { %824 = vrot.lane.b32.xlu1 %v819_v28, %s4672_s29  ;;  %v4269_v29 = vpop.f32.mrb[7].mxu0 }
 0x842   :  { %v4506_v29 = vld [vmem:[%s5547_s22] sm:$0xff]  }
 0x844   :  { %v992_v30 = vpop.f32.mrb[8].mxu0 }
 0x845   :  { %997 = vrot.lane.b32.xlu1 %v992_v30, %s4673_s17  ;;  %v4279_v31 = vpop.f32.mrb[9].mxu0  ;;  %v4507_v30 = vld [vmem:[%s5547_s22 + $0x8] sm:$0xff]  }
 0x846   :  { %v4508_v31 = vld [vmem:[%s5547_s22 + $0x10] sm:$0xff]  }
 0x848   :  { %v1169_v32 = vpop.f32.mrb[10].mxu0 }
 0x849   :  { %1173 = vst.msk [vmem:[#allocation3 + $0x8] sm:$0xff] %vm314_vm3, %v1169_v32  ;;  %v4289_v33 = vpop.f32.mrb[11].mxu0  ;;  %v4509_v32 = vld [vmem:[%s5547_s22 + $0x18] sm:$0xff]  }
 0x84a   :  { %v4038_v33 = vld [vmem:[%s5548_s30] ss:$0 sm:$0xff] }
 0x879   :  { %v1337_v10 = vpop.f32.mrb[12].mxu0 }
 0x87a   :  { %1342 = vrot.lane.b32.xlu0 %v1337_v10, %s4671_s15  ;;  %v4299_v36 = vpop.f32.mrb[13].mxu0 }
 0x87d   :  { %v1509_v37 = vpop.f32.mrb[14].mxu0 }
 0x87e   :  { %1514 = vrot.lane.b32.xlu0 %v1509_v37, %s4672_s29  ;;  %v4309_v38 = vpop.f32.mrb[15].mxu0 }
 0x881   :  { %v1681_v39 = vpop.f32.mrb[16].mxu0 }
 0x882   :  { %1686 = vrot.lane.b32.xlu0 %v1681_v39, %s4673_s17  ;;  %v4319_v40 = vpop.f32.mrb[17].mxu0 }
 0x8af   :  { %v652_v41 = vpop.permute.xlu1 %651 }
 0x8b0   :  { %655 = vst.msk [vmem:[#allocation3] sm:$0xff] %vm654_vm4, %v652_v41 }
 0x8b3   :  { %v825_v42 = vpop.permute.xlu1 %824 }
 0x8b4   :  { %828 = vst.msk [vmem:[#allocation3] sm:$0xff] %vm827_vm5, %v825_v42 }
 0x8b7   :  { %v998_v43 = vpop.permute.xlu1 %997 }
 0x8b8   :  { %1001 = vst.msk [vmem:[#allocation3] sm:$0xff] %vm1000_vm6, %v998_v43 }
 0x8bf   :  { %v1690_v47 = vld [vmem:[#allocation3] sm:$0xff] }
 0x8ec   :  { %v1343_v44 = vpop.permute.xlu0 %1342 }
 0x8ed   :  { %1345 = vst.msk [vmem:[#allocation3 + $0x8] sm:$0xff] %vm654_vm4, %v1343_v44 }
 0x8f0   :  { %v1515_v45 = vpop.permute.xlu0 %1514 }
 0x8f1   :  { %1517 = vst.msk [vmem:[#allocation3 + $0x8] sm:$0xff] %vm827_vm5, %v1515_v45 }
 0x8f4   :  { %v1687_v46 = vpop.permute.xlu0 %1686 }
 0x8f5   :  { %1689 = vst.msk [vmem:[#allocation3 + $0x8] sm:$0xff] %vm1000_vm6, %v1687_v46 }
 0x8fc   :  { %v1691_v48 = vld [vmem:[#allocation3 + $0x8] sm:$0xff] }
 0x8fd   :  { %v1692_v49 = vpack.c.bf16 %v1691_v48, %v1690_v47 }
 0x8ff   :  { %4325 = vmatmul.mubr.msk.bf16.vlgmr.msra.gmra.mrb[20].mxu1 %vm198_vm1, %v1692_v49 }
 0x900   :  { %4344 = vmatprep.mubr.msk.bf16.mxu1 %vm4659_vm2, %v4658_v53  ;;  %4337 = vmatpush3.bf16.msra.mxu1 %v4506_v29 }
 0x901   :  { %4338 = vmatprep.subr.bf16.mxu1 %v4658_v53 }
 0x904   :  { %4339 = vmatpush3.bf16.msra.mxu1 %v4507_v30 }
 0x905   :  { %4340 = vmatprep.subr.bf16.mxu1 %v4658_v53 }
 0x908   :  { %4341 = vmatpush3.bf16.msra.mxu1 %v4508_v31 }
 0x909   :  { %4342 = vmatprep.subr.bf16.mxu1 %v4658_v53 }
 0x90c   :  { %4343 = vmatpush3.bf16.msra.mxu1 %v4509_v32  ;;  %v4049_v32 = vld [vmem:[%s5551_s7] ss:$0 sm:$0xff] }
 0x90d   :  { %4366 = vmatprep.subr.mxu1 %v4658_v53 }
 0x9d2   :  { %v1753_v51 = vpop.f32.mrb[20].mxu1 }
 0x9d3   :  { %v1754_v52 = vadd.f32 %v4032_v50, %v1753_v51  ;;  %v4326_v54 = vpop.f32.mrb[21].mxu1 }
 0x9d4   :  { %v1756_v55 = vpop.f32.mrb[22].mxu1 }
 0x9d5   :  { %v1757_v56 = vadd.f32 %v4032_v50, %v1756_v55  ;;  %v4327_v57 = vpop.f32.mrb[23].mxu1  ;;  %v1760_v58 = vadd.f32 %v1754_v52, %v4918_v5 }
 0x9d7   :  { %v1764_v59 = vsel %vm198_vm1, %v1760_v58, 0.0  ;;  %v1761_v60 = vadd.f32 %v1757_v56, %v4920_v6  ;;  %v4504_v6 = vld [vmem:[%s5495_s14] sm:$0xff]  }
 0x9d8   :  { %1765 = vadd.xlane.f32.xlu1 %v1764_v59  ;;  %4329 = vmatpush3.bf16.msra.mxu0 %v4504_v6  ;;  %v4042_v59 = vld [vmem:[%s5549_s18] ss:$0 sm:$0xff] }
 0x9d9   :  { %v1767_v61 = vsel %vm198_vm1, %v1761_v60, 0.0  ;;  %4330 = vmatprep.subr.bf16.mxu0 %v4658_v53 }
 0x9da   :  { %1768 = vadd.xlane.f32.xlu0 %v1767_v61 }
 0x9dc   :  { %4331 = vmatpush3.bf16.msra.mxu0 %v4505_v9 }
 0x9dd   :  { %4348 = vmatprep.subr.bf16.mxu0 %v4658_v53 }
 0xa65   :  { %v1766_v63 = vpop.xlane.xlu1 %1765 }
 0xa66   :  { %v1770_v0 = vmul.f32 0.03125, %v1766_v63 }
 0xa67   :  { %v1769_v1 = vpop.xlane.xlu0 %1768 }
 0xa68   :  { %v1772_v2 = vsub.f32 %v1760_v58, %v1770_v0  ;;  %v1771_v3 = vmul.f32 0.03125, %v1769_v1 }
 0xa6a   :  { %v1773_v4 = vsub.f32 %v1761_v60, %v1771_v3  ;;  %v1774_v7 = vmul.f32 %v1772_v2, %v1772_v2 }
 0xa6c   :  { %v1776_v13 = vsel %vm198_vm1, %v1774_v7, 0.0  ;;  %v1775_v8 = vmul.f32 %v1773_v4, %v1773_v4 }
 0xa6d   :  { %1777 = vadd.xlane.f32.xlu0 %v1776_v13 }
 0xa6e   :  { %v1779_v5 = vsel %vm198_vm1, %v1775_v8, 0.0 }
 0xa6f   :  { %1780 = vadd.xlane.f32.xlu1 %v1779_v5 }
 0xafa   :  { %v1778_v11 = vpop.xlane.xlu0 %1777 }
 0xafb   :  { %v1782_v12 = vmul.f32 0.03125, %v1778_v11 }
 0xafc   :  { %v1781_v14 = vpop.xlane.xlu1 %1780 }
 0xafd   :  { %v1784_v15 = vadd.f32 1e-12, %v1782_v12  ;;  %v1783_v16 = vmul.f32 0.03125, %v1781_v14 }
 0xaff   :  { %4560 = vrsqrt.f32 %v1784_v15  ;;  %v1785_v17 = vadd.f32 1e-12, %v1783_v16 }
 0xb01   :  { %4562 = vrsqrt.f32 %v1785_v17 }
 0xb09   :  { %v4561_v18 = vpop.eup %4560 }
 0xb0a   :  { %v1788_v20 = vmul.f32 %v4561_v18, %v1772_v2  ;;  %v4510_v18 = vld [vmem:[%s5543_s2 + $0x10] sm:$0xff]  }
 0xb0b   :  { %v4563_v21 = vpop.eup %4562 }
 0xb0c   :  { %v1796_v22 = vmul.f32 %v4036_v19, %v1788_v20  ;;  %v1789_v23 = vmul.f32 %v4563_v21, %v1773_v4 }
 0xb0e   :  { %v1797_v25 = vmul.f32 %v4036_v19, %v1789_v23  ;;  %v1804_v26 = vadd.f32 %v4037_v24, %v1796_v22  ;;  %v4511_v19 = vld [vmem:[%s5543_s2 + $0x18] sm:$0xff]  }
 0xb10   :  { %v1805_v27 = vadd.f32 %v4037_v24, %v1797_v25 }
 0xb12   :  { %v1806_v28 = vpack.c.bf16 %v1805_v27, %v1804_v26 }
 0xb14   :  { %4333 = vmatmul.mubr.msk.bf16.vlgmr.msra.gmra.mrb[20].mxu0 %vm198_vm1, %v1806_v28 }
 0xb15   :  { %4352 = vmatprep.mubr.msk.bf16.mxu0 %vm4659_vm2, %v4658_v53  ;;  %4349 = vmatpush3.bf16.msra.mxu0 %v4510_v18 }
 0xb16   :  { %4350 = vmatprep.subr.bf16.mxu0 %v4658_v53 }
 0xb19   :  { %4351 = vmatpush3.bf16.msra.mxu0 %v4511_v19 }
 0xb1a   :  { %4356 = vmatprep.subr.mxu0 %v4658_v53 }
 0xbe7   :  { %v1867_v34 = vpop.f32.mrb[20].mxu0 }
 0xbe8   :  { %v1868_v35 = vadd.f32 %v4038_v33, %v1867_v34  ;;  %v4334_v10 = vpop.f32.mrb[21].mxu0 }
 0xbe9   :  { %v1870_v36 = vpop.f32.mrb[22].mxu0 }
 0xbea   :  { %v1876_v37 = vmul.f32 0.044715, %v1868_v35  ;;  %v1871_v38 = vadd.f32 %v4038_v33, %v1870_v36  ;;  %v4335_v39 = vpop.f32.mrb[23].mxu0  ;;  %v1874_v52 = vmul.f32 0.5, %v1868_v35  ;;  %v4055_v36 = vld [vmem:[%s5490_s9 + $0x1] ss:$0 sm:$0xff] }
 0xbec   :  { %v1878_v40 = vmul.f32 %v1876_v37, %v1868_v35  ;;  %v1877_v41 = vmul.f32 0.044715, %v1871_v38  ;;  %v1875_v54 = vmul.f32 0.5, %v1871_v38 }
 0xbee   :  { %v1880_v42 = vmul.f32 %v1878_v40, %v1868_v35  ;;  %v1879_v43 = vmul.f32 %v1877_v41, %v1871_v38 }
 0xbf0   :  { %v1882_v44 = vadd.f32 %v1880_v42, %v1868_v35  ;;  %v1881_v45 = vmul.f32 %v1879_v43, %v1871_v38 }
 0xbf2   :  { %v1884_v46 = vmul.f32 0.7978846, %v1882_v44  ;;  %v1883_v47 = vadd.f32 %v1881_v45, %v1871_v38 }
 0xbf4   :  { %4564 = vtanh.f32 %v1884_v46  ;;  %v1885_v48 = vmul.f32 0.7978846, %v1883_v47 }
 0xbf6   :  { %4566 = vtanh.f32 %v1885_v48 }
 0xbfe   :  { %v4565_v49 = vpop.eup %4564 }
 0xbff   :  { %v1888_v50 = vadd.f32 1.0, %v4565_v49 }
 0xc00   :  { %v4567_v51 = vpop.eup %4566 }
 0xc01   :  { %v1889_v55 = vadd.f32 1.0, %v4567_v51  ;;  %v1890_v56 = vmul.f32 %v1888_v50, %v1874_v52 }
 0xc03   :  { %v1891_v57 = vmul.f32 %v1889_v55, %v1875_v54 }
 0xc05   :  { %v1892_v58 = vpack.c.bf16 %v1891_v57, %v1890_v56 }
 0xc07   :  { %4345 = vmatmul.mubr.msk.bf16.vlgmr.msra.gmra.mrb[24].mxu1 %vm1932_vm7, %v1892_v58 }
 0xc08   :  { %4368 = vmatprep.mubr.msk.f32.mxu1 %vm4659_vm2, %v4658_v53 }
 0xcda   :  { %v1970_v60 = vpop.f32.mrb[24].mxu1 }
 0xcdb   :  { %v1971_v61 = vadd.f32 %v4042_v59, %v1970_v60  ;;  %v4346_v63 = vpop.f32.mrb[25].mxu1  ;;  %v4061_v60 = vld [vmem:[%s5546_s27] ss:$0 sm:$0xff] }
 0xcdc   :  { %v1973_v0 = vpop.f32.mrb[26].mxu1 }
 0xcdd   :  { %v1974_v1 = vadd.f32 %v4042_v59, %v1973_v0  ;;  %v4347_v2 = vpop.f32.mrb[27].mxu1  ;;  %v1977_v3 = vadd.f32 %v1971_v61, %v1804_v26 }
 0xcdf   :  { %v1981_v4 = vsel %vm198_vm1, %v1977_v3, 0.0  ;;  %v1978_v7 = vadd.f32 %v1974_v1, %v1805_v27  ;;  %v4048_v27 = vld [vmem:[%s5550_s20] ss:$0 sm:$0xff] }
 0xce0   :  { %1982 = vadd.xlane.f32.xlu0 %v1981_v4 }
 0xce1   :  { %v1984_v13 = vsel %vm198_vm1, %v1978_v7, 0.0 }
 0xce2   :  { %1985 = vadd.xlane.f32.xlu1 %v1984_v13 }
 0xd6d   :  { %v1983_v8 = vpop.xlane.xlu0 %1982 }
 0xd6e   :  { %v1987_v5 = vmul.f32 0.03125, %v1983_v8 }
 0xd6f   :  { %v1986_v6 = vpop.xlane.xlu1 %1985 }
 0xd70   :  { %v1989_v9 = vsub.f32 %v1977_v3, %v1987_v5  ;;  %v1988_v11 = vmul.f32 0.03125, %v1986_v6 }
 0xd72   :  { %v1990_v12 = vsub.f32 %v1978_v7, %v1988_v11  ;;  %v1991_v14 = vmul.f32 %v1989_v9, %v1989_v9 }
 0xd74   :  { %v1993_v15 = vsel %vm198_vm1, %v1991_v14, 0.0  ;;  %v1992_v16 = vmul.f32 %v1990_v12, %v1990_v12 }
 0xd75   :  { %1994 = vadd.xlane.f32.xlu0 %v1993_v15 }
 0xd76   :  { %v1996_v17 = vsel %vm198_vm1, %v1992_v16, 0.0 }
 0xd77   :  { %1997 = vadd.xlane.f32.xlu1 %v1996_v17 }
 0xe02   :  { %v1995_v20 = vpop.xlane.xlu0 %1994 }
 0xe03   :  { %v1999_v21 = vmul.f32 0.03125, %v1995_v20 }
 0xe04   :  { %v1998_v22 = vpop.xlane.xlu1 %1997 }
 0xe05   :  { %v2001_v23 = vadd.f32 1e-12, %v1999_v21  ;;  %v2000_v24 = vmul.f32 0.03125, %v1998_v22 }
 0xe07   :  { %4568 = vrsqrt.f32 %v2001_v23  ;;  %v2002_v25 = vadd.f32 1e-12, %v2000_v24 }
 0xe09   :  { %4570 = vrsqrt.f32 %v2002_v25 }
 0xe11   :  { %v4569_v26 = vpop.eup %4568 }
 0xe12   :  { %v2005_v28 = vmul.f32 %v4569_v26, %v1989_v9 }
 0xe13   :  { %v4571_v29 = vpop.eup %4570 }
 0xe14   :  { %v2013_v30 = vmul.f32 %v4048_v27, %v2005_v28  ;;  %v2006_v31 = vmul.f32 %v4571_v29, %v1990_v12 }
 0xe16   :  { %v2014_v33 = vmul.f32 %v4048_v27, %v2006_v31  ;;  %v5188_v34 = vadd.f32 %v4049_v32, %v2013_v30 }
 0xe18   :  { %v5190_v35 = vadd.f32 %v4049_v32, %v2014_v33 }
 0xe1a   :  { %v2023_v10 = vpack.c.bf16 %v5190_v35, %v5188_v34 }
 0xe1c   :  { %4353 = vmatmul.mubr.msk.bf16.vlgmr.msra.gmra.mrb[24].mxu0 %vm198_vm1, %v2023_v10 }
 0xe1d   :  { %4358 = vmatprep.mubr.msk.f32.mxu0 %vm4659_vm2, %v4658_v53 }
 0xeef   :  { %v2086_v37 = vpop.f32.mrb[24].mxu0 }
 0xef0   :  { %v5200_v38 = vadd.f32 %v4055_v36, %v2086_v37  ;;  %v4354_v39 = vpop.f32.mrb[25].mxu0 }
 0xef1   :  { %v2089_v40 = vpop.f32.mrb[26].mxu0 }
 0xef2   :  { %2267 = vrot.lane.b32.xlu1 %v5200_v38, %s4662_s26  ;;  %2095 = vrot.lane.b32.xlu0 %v5200_v38, %s4661_s5  ;;  %v4355_v41 = vpop.f32.mrb[27].mxu0  ;;  %v5214_v42 = vadd.f32 %v4055_v36, %v2089_v40 }
 0xef6   :  { %2265 = vrot.lane.b32.xlu1 %v5200_v38, %s4664_s28  ;;  %2439 = vrot.lane.b32.xlu0 %v5200_v38, %s4663_s4 }
 0xefa   :  { %2437 = vrot.lane.b32.xlu1 %v5200_v38, %s4665_s23  ;;  %2611 = vrot.lane.b32.xlu0 %v5200_v38, %s4667_s24 }
 0xefe   :  { %2609 = vrot.lane.b32.xlu1 %v5200_v38, %s4666_s21  ;;  %2783 = vrot.lane.b32.xlu0 %v5214_v42, %s4661_s5  ;;  %s5552_s5 = sld [smem:[#allocation24_spill]] }
 0xf02   :  { %2955 = vrot.lane.b32.xlu1 %v5214_v42, %s4662_s26  ;;  %2953 = vrot.lane.b32.xlu0 %v5214_v42, %s4664_s28 }
 0xf06   :  { %3127 = vrot.lane.b32.xlu1 %v5214_v42, %s4663_s4  ;;  %3125 = vrot.lane.b32.xlu0 %v5214_v42, %s4665_s23  ;;  %s5553_s23 = sld [smem:[#allocation26_spill]] }
 0xf0a   :  { %3299 = vrot.lane.b32.xlu1 %v5214_v42, %s4667_s24  ;;  %3297 = vrot.lane.b32.xlu0 %v5214_v42, %s4666_s21 }
 0xf0e   :  { %2188 = vrot.lane.b32.xlu1 %v5200_v38, %s4660_s8 }
 0xf64   :  { %v2268_v43 = vpop.permute.xlu1 %2267  ;;  %v2096_v44 = vpop.permute.xlu0 %2095 }
 0xf65   :  { %4357 = vmatpush3.xpose.msk.msra.mxu0 %vm314_vm3, %v2096_v44  ;;  %4367 = vmatpush3.xpose.msk.msra.mxu1 %vm314_vm3, %v2268_v43 }
 0xf66   :  { %4376 = vmatprep.subr.mxu1 %v4658_v53  ;;  %4361 = vmatprep.subr.mxu0 %v4658_v53 }
 0xf68   :  { %v2266_v45 = vpop.permute.xlu1 %2265  ;;  %4359 = vmatmul.mubr.msk.f32.vlgmr.msra.gmra.mrb[18].mxu0 %vm314_vm3, %v5200_v38  ;;  %v2440_v46 = vpop.permute.xlu0 %2439 }
 0xf69   :  { %4369 = vmatmul.mubr.msk.f32.vlgmr.msra.gmra.mrb[18].mxu1 %vm314_vm3, %v2266_v45  ;;  %4363 = vmatprep.mubr.msk.f32.mxu0 %vm4659_vm2, %v4658_v53 }
 0xf6a   :  { %4377 = vmatpush3.xpose.msk.msra.mxu1 %vm314_vm3, %v2440_v46  ;;  %4378 = vmatprep.mubr.msk.f32.mxu1 %vm4659_vm2, %v4658_v53 }
 0xf6b   :  { %4386 = vmatprep.subr.mxu1 %v4658_v53 }
 0xf6c   :  { %v2438_v47 = vpop.permute.xlu1 %2437  ;;  %v2612_v48 = vpop.permute.xlu0 %2611 }
 0xf6d   :  { %4379 = vmatmul.mubr.msk.f32.vlgmr.msra.gmra.mrb[28].mxu1 %vm314_vm3, %v2438_v47 }
 0xf6e   :  { %4387 = vmatpush3.xpose.msk.msra.mxu1 %vm314_vm3, %v2612_v48  ;;  %4388 = vmatprep.mubr.msk.f32.mxu1 %vm4659_vm2, %v4658_v53 }
 0xf6f   :  { %4396 = vmatprep.subr.mxu1 %v4658_v53 }
 0xf70   :  { %v2610_v49 = vpop.permute.xlu1 %2609  ;;  %v2784_v50 = vpop.permute.xlu0 %2783 }
 0xf71   :  { %4389 = vmatmul.mubr.msk.f32.vlgmr.msra.gmra.mrb[30].mxu1 %vm314_vm3, %v2610_v49 }
 0xf72   :  { %4397 = vmatpush3.xpose.msk.msra.mxu1 %vm314_vm3, %v2784_v50  ;;  %4398 = vmatprep.mubr.msk.f32.mxu1 %vm4659_vm2, %v4658_v53 }
 0xf73   :  { %4406 = vmatprep.subr.mxu1 %v4658_v53 }
 0xf74   :  { %v2956_v51 = vpop.permute.xlu1 %2955  ;;  %v2954_v52 = vpop.permute.xlu0 %2953 }
 0xf75   :  { %4399 = vmatmul.mubr.msk.f32.vlgmr.msra.gmra.mrb[32].mxu1 %vm314_vm3, %v5214_v42 }
 0xf76   :  { %4407 = vmatpush3.xpose.msk.msra.mxu1 %vm314_vm3, %v2956_v51  ;;  %4408 = vmatprep.mubr.msk.f32.mxu1 %vm4659_vm2, %v4658_v53 }
 0xf77   :  { %4416 = vmatprep.subr.mxu1 %v4658_v53 }
 0xf78   :  { %v3128_v54 = vpop.permute.xlu1 %3127  ;;  %v3126_v55 = vpop.permute.xlu0 %3125 }
 0xf79   :  { %4409 = vmatmul.mubr.msk.f32.vlgmr.msra.gmra.mrb[34].mxu1 %vm314_vm3, %v2954_v52 }
 0xf7a   :  { %4417 = vmatpush3.xpose.msk.msra.mxu1 %vm314_vm3, %v3128_v54  ;;  %4418 = vmatprep.mubr.msk.f32.mxu1 %vm4659_vm2, %v4658_v53 }
 0xf7b   :  { %4426 = vmatprep.subr.mxu1 %v4658_v53 }
 0xf7c   :  { %v3300_v56 = vpop.permute.xlu1 %3299  ;;  %v3298_v57 = vpop.permute.xlu0 %3297 }
 0xf7d   :  { %4419 = vmatmul.mubr.msk.f32.vlgmr.msra.gmra.mrb[36].mxu1 %vm314_vm3, %v3126_v55 }
 0xf7e   :  { %4427 = vmatpush3.xpose.msk.msra.mxu1 %vm314_vm3, %v3300_v56  ;;  %4428 = vmatprep.mubr.msk.f32.mxu1 %vm4659_vm2, %v4658_v53 }
 0xf7f   :  { %4436 = vmatprep.subr.bf16.mxu1 %v4658_v53 }
 0xf80   :  { %v2189_v58 = vpop.permute.xlu1 %2188 }
 0xf81   :  { %4362 = vmatpush3.msra.mxu0 %v2189_v58  ;;  %4429 = vmatmul.mubr.msk.f32.vlgmr.msra.gmra.mrb[38].mxu1 %vm314_vm3, %v3298_v57 }
 0xf82   :  { %4371 = vmatprep.subr.mxu0 %v4658_v53  ;;  %4440 = vmatprep.mubr.msk.bf16.mxu1 %vm4659_vm2, %v4658_v53 }
0x103b   :  { %v2167_v59 = vpop.f32.mrb[18].mxu0 }
0x103c   :  { %v2171_v61 = vmul.f32 0.35355338, %v2167_v59  ;;  %v4360_v63 = vpop.f32.mrb[19].mxu0  ;;  %v2339_v0 = vpop.f32.mrb[18].mxu1 }
0x103d   :  { %v2343_v1 = vmul.f32 0.35355338, %v2339_v0  ;;  %v4370_v2 = vpop.f32.mrb[19].mxu1 }
0x103e   :  { %v2176_v3 = vadd.f32 %v4061_v60, %v2171_v61 }
0x103f   :  { %v2344_v4 = vadd.f32 %v4061_v60, %v2343_v1 }
0x1040   :  { %v2511_v7 = vpop.f32.mrb[28].mxu1  ;;  %v2177_v13 = vsel %vm314_vm3, %v2176_v3, -inf }
0x1041   :  { %v2515_v8 = vmul.f32 0.35355338, %v2511_v7  ;;  %v4380_v5 = vpop.f32.mrb[29].mxu1  ;;  %2178 = vmax.xlane.f32.xlu1 %v2177_v13  ;;  %v2345_v6 = vsel %vm314_vm3, %v2344_v4, -inf }
0x1042   :  { %2346 = vmax.xlane.f32.xlu0 %v2345_v6 }
0x1043   :  { %v2516_v9 = vadd.f32 %v4061_v60, %v2515_v8 }
0x1044   :  { %v2683_v11 = vpop.f32.mrb[30].mxu1 }
0x1045   :  { %v2687_v12 = vmul.f32 0.35355338, %v2683_v11  ;;  %v4390_v14 = vpop.f32.mrb[31].mxu1  ;;  %v2517_v15 = vsel %vm314_vm3, %v2516_v9, -inf }
0x1046   :  { %2518 = vmax.xlane.f32.xlu0 %v2517_v15 }
0x1047   :  { %v2688_v16 = vadd.f32 %v4061_v60, %v2687_v12 }
0x1048   :  { %v2855_v17 = vpop.f32.mrb[32].mxu1 }
0x1049   :  { %v2859_v18 = vmul.f32 0.35355338, %v2855_v17  ;;  %v4400_v19 = vpop.f32.mrb[33].mxu1  ;;  %v2689_v20 = vsel %vm314_vm3, %v2688_v16, -inf }
0x104a   :  { %2690 = vmax.xlane.f32.xlu1 %v2689_v20 }
0x104b   :  { %v2864_v21 = vadd.f32 %v5027_v62, %v2859_v18 }
0x104c   :  { %v3027_v22 = vpop.f32.mrb[34].mxu1 }
0x104d   :  { %v3031_v23 = vmul.f32 0.35355338, %v3027_v22  ;;  %v4410_v24 = vpop.f32.mrb[35].mxu1  ;;  %v2865_v25 = vsel %vm314_vm3, %v2864_v21, -inf }
0x104e   :  { %2866 = vmax.xlane.f32.xlu0 %v2865_v25 }
0x104f   :  { %v3032_v26 = vadd.f32 %v5027_v62, %v3031_v23 }
0x1050   :  { %v3199_v27 = vpop.f32.mrb[36].mxu1 }
0x1051   :  { %v3203_v28 = vmul.f32 0.35355338, %v3199_v27  ;;  %v4420_v29 = vpop.f32.mrb[37].mxu1  ;;  %v3033_v30 = vsel %vm314_vm3, %v3032_v26, -inf }
0x1052   :  { %3034 = vmax.xlane.f32.xlu1 %v3033_v30 }
0x1053   :  { %v3204_v31 = vadd.f32 %v5027_v62, %v3203_v28 }
0x1054   :  { %v3371_v32 = vpop.f32.mrb[38].mxu1 }
0x1055   :  { %v4430_v33 = vpop.f32.mrb[39].mxu1  ;;  %v3205_v10 = vsel %vm314_vm3, %v3204_v31, -inf  ;;  %v3375_v36 = vmul.f32 0.35355338, %v3371_v32 }
0x1056   :  { %3206 = vmax.xlane.f32.xlu0 %v3205_v10 }
0x1057   :  { %v3376_v37 = vadd.f32 %v5027_v62, %v3375_v36 }
0x1059   :  { %v3377_v39 = vsel %vm314_vm3, %v3376_v37, -inf }
0x1063   :  { %2528 = vrot.lane.b32.xlu1 %v5200_v38, %s4669_s3 }
0x106c   :  { %2356 = vrot.lane.b32.xlu0 %v5200_v38, %s4668_s6 }
0x1087   :  { %3378 = vmax.xlane.f32.xlu1 %v3377_v39 }
0x1098   :  { %2700 = vrot.lane.b32.xlu1 %v5200_v38, %s4670_s19 }
0x10ce   :  { %v2179_v40 = vpop.xlane.xlu1 %2178 }
0x10cf   :  { %v2180_v41 = vsub.f32 %v2176_v3, %v2179_v40  ;;  %v2347_v43 = vpop.xlane.xlu0 %2346 }
0x10d0   :  { %v2348_v44 = vsub.f32 %v2344_v4, %v2347_v43 }
0x10d1   :  { %v2181_v45 = vmul.f32 1.442695, %v2180_v41 }
0x10d2   :  { %v2349_v46 = vmul.f32 1.442695, %v2348_v44 }
0x10d3   :  { %4572 = vpow2.f32 %v2181_v45  ;;  %v2519_v47 = vpop.xlane.xlu0 %2518 }
0x10d4   :  { %4574 = vpow2.f32 %v2349_v46  ;;  %v2520_v48 = vsub.f32 %v2516_v9, %v2519_v47 }
0x10d6   :  { %v2521_v49 = vmul.f32 1.442695, %v2520_v48 }
0x10d7   :  { %v2691_v55 = vpop.xlane.xlu1 %2690 }
0x10d8   :  { %4576 = vpow2.f32 %v2521_v49  ;;  %v2692_v56 = vsub.f32 %v2688_v16, %v2691_v55 }
0x10da   :  { %v2693_v60 = vmul.f32 1.442695, %v2692_v56 }
0x10db   :  { %v2867_v57 = vpop.xlane.xlu0 %2866 }
0x10dc   :  { %v2868_v59 = vsub.f32 %v2864_v21, %v2867_v57  ;;  %4578 = vpow2.f32 %v2693_v60 }
0x10dd   :  { %v4573_v50 = vpop.eup %4572 }
0x10de   :  { %v4575_v62 = vpop.eup %4574  ;;  %v2183_v51 = vsel %vm314_vm3, %v4573_v50, 0.0  ;;  %v2869_v0 = vmul.f32 1.442695, %v2868_v59  ;;  %v4512_v59 = vld [vmem:[%s5491_s10 + $0x10] sm:$0xff]  }
0x10df   :  { %2184 = vadd.xlane.f32.xlu0 %v2183_v51  ;;  %v2351_v52 = vsel %vm314_vm3, %v4575_v62, 0.0  ;;  %v3035_v58 = vpop.xlane.xlu1 %3034  ;;  %4437 = vmatpush3.bf16.msra.mxu1 %v4512_v59 }
0x10e0   :  { %2352 = vadd.xlane.f32.xlu1 %v2351_v52  ;;  %v3036_v61 = vsub.f32 %v3032_v26, %v3035_v58  ;;  %4580 = vpow2.f32 %v2869_v0  ;;  %4438 = vmatprep.subr.bf16.mxu1 %v4658_v53 }
0x10e2   :  { %v5300_v38 = vpop.eup %4576  ;;  %v3037_v1 = vmul.f32 1.442695, %v3036_v61  ;;  %v4513_v61 = vld [vmem:[%s5491_s10 + $0x18] sm:$0xff]  }
0x10e3   :  { %v2523_v54 = vsel %vm314_vm3, %v5300_v38, 0.0  ;;  %v3207_v63 = vpop.xlane.xlu0 %3206  ;;  %v2529_v4 = vpop.permute.xlu1 %2528  ;;  %4439 = vmatpush3.bf16.msra.mxu1 %v4513_v61 }
0x10e4   :  { %2524 = vadd.xlane.f32.xlu0 %v2523_v54  ;;  %v3208_v2 = vsub.f32 %v3204_v31, %v3207_v63  ;;  %4582 = vpow2.f32 %v3037_v1  ;;  %4452 = vmatprep.subr.bf16.mxu1 %v4658_v53 }
0x10e6   :  { %v3209_v3 = vmul.f32 1.442695, %v3208_v2  ;;  %v4579_v7 = vpop.eup %4578 }
0x10e7   :  { %v2695_v5 = vsel %vm314_vm3, %v4579_v7, 0.0  ;;  %v2357_v19 = vpop.permute.xlu0 %2356 }
0x10e8   :  { %4584 = vpow2.f32 %v3209_v3 }
0x10ea   :  { %v4581_v13 = vpop.eup %4580 }
0x10eb   :  { %v2871_v12 = vsel %vm314_vm3, %v4581_v13, 0.0 }
0x10ee   :  { %v5309_v6 = vpop.eup %4582 }
0x10ef   :  { %v3039_v14 = vsel %vm314_vm3, %v5309_v6, 0.0 }
0x10f1   :  { %2876 = vrot.lane.b32.xlu1 %v5214_v42, %s4660_s8 }
0x10f2   :  { %v5314_v15 = vpop.eup %4584 }
0x10f3   :  { %v3211_v16 = vsel %vm314_vm3, %v5314_v15, 0.0 }
0x10fa   :  { %3044 = vrot.lane.b32.xlu0 %v5214_v42, %s4668_s6 }
0x1114   :  { %v3379_v8 = vpop.xlane.xlu1 %3378 }
0x1115   :  { %v3380_v9 = vsub.f32 %v3376_v37, %v3379_v8  ;;  %2696 = vadd.xlane.f32.xlu1 %v2695_v5 }
0x1117   :  { %v3381_v11 = vmul.f32 1.442695, %v3380_v9 }
0x1118   :  { %v2701_v20 = vpop.permute.xlu1 %2700 }
0x1119   :  { %4586 = vpow2.f32 %v3381_v11  ;;  %2872 = vadd.xlane.f32.xlu0 %v2871_v12  ;;  %3040 = vadd.xlane.f32.xlu1 %v3039_v14 }
0x111d   :  { %3212 = vadd.xlane.f32.xlu0 %v3211_v16 }
0x1123   :  { %v5318_v17 = vpop.eup %4586 }
0x1124   :  { %v3383_v18 = vsel %vm314_vm3, %v5318_v17, 0.0 }
0x1125   :  { %3384 = vadd.xlane.f32.xlu0 %v3383_v18 }
0x112a   :  { %3216 = vrot.lane.b32.xlu1 %v5214_v42, %s4669_s3  ;;  %s5554_s3 = sld [smem:[#allocation25_spill]] }
0x113b   :  { %3388 = vrot.lane.b32.xlu0 %v5214_v42, %s4670_s19 }
0x116c   :  { %v2185_v21 = vpop.xlane.xlu0 %2184 }
0x116d   :  { %4588 = vrcp.f32 %v2185_v21  ;;  %v2353_v22 = vpop.xlane.xlu1 %2352 }
0x116e   :  { %4590 = vrcp.f32 %v2353_v22 }
0x1171   :  { %v2525_v23 = vpop.xlane.xlu0 %2524  ;;  %v2877_v29 = vpop.permute.xlu1 %2876 }
0x1172   :  { %4592 = vrcp.f32 %v2525_v23 }
0x1175   :  { %v3045_v30 = vpop.permute.xlu0 %3044 }
0x1177   :  { %v4589_v24 = vpop.eup %4588 }
0x1178   :  { %v2187_v25 = vmul.f32 %v4589_v24, %v4573_v50  ;;  %v4591_v26 = vpop.eup %4590 }
0x1179   :  { %v2355_v27 = vmul.f32 %v4591_v26, %v4575_v62 }
0x117a   :  { %4364 = vmatmul.mubr.msk.f32.vlgmr.msra.gmra.mrb[28].mxu0 %vm314_vm3, %v2187_v25 }
0x117b   :  { %4372 = vmatpush3.msra.mxu0 %v2357_v19  ;;  %4373 = vmatprep.mubr.msk.f32.mxu0 %vm4659_vm2, %v4658_v53 }
0x117c   :  { %4381 = vmatprep.subr.mxu0 %v4658_v53  ;;  %v4593_v42 = vpop.eup %4592 }
0x117d   :  { %v2527_v28 = vmul.f32 %v4593_v42, %v5300_v38 }
0x117e   :  { %4374 = vmatmul.mubr.msk.f32.vlgmr.msra.gmra.mrb[30].mxu0 %vm314_vm3, %v2355_v27 }
0x117f   :  { %4382 = vmatpush3.msra.mxu0 %v2529_v4  ;;  %4383 = vmatprep.mubr.msk.f32.mxu0 %vm4659_vm2, %v4658_v53 }
0x1180   :  { %4391 = vmatprep.subr.mxu0 %v4658_v53 }
0x1182   :  { %4384 = vmatmul.mubr.msk.f32.vlgmr.msra.gmra.mrb[32].mxu0 %vm314_vm3, %v2527_v28 }
0x1183   :  { %4392 = vmatpush3.msra.mxu0 %v2701_v20  ;;  %4393 = vmatprep.mubr.msk.f32.mxu0 %vm4659_vm2, %v4658_v53 }
0x1184   :  { %4401 = vmatprep.subr.mxu0 %v4658_v53 }
0x11a2   :  { %v2697_v31 = vpop.xlane.xlu1 %2696 }
0x11a3   :  { %4594 = vrcp.f32 %v2697_v31 }
0x11a6   :  { %v2873_v32 = vpop.xlane.xlu0 %2872  ;;  %v3041_v33 = vpop.xlane.xlu1 %3040 }
0x11a7   :  { %4596 = vrcp.f32 %v2873_v32 }
0x11a8   :  { %4598 = vrcp.f32 %v3041_v33 }
0x11aa   :  { %v3213_v10 = vpop.xlane.xlu0 %3212  ;;  %v3217_v46 = vpop.permute.xlu1 %3216 }
0x11ab   :  { %4600 = vrcp.f32 %v3213_v10  ;;  %v4515_v10 = vld [vmem:[%s5495_s14 + $0x18] sm:$0xff]  }
0x11ad   :  { %v4595_v36 = vpop.eup %4594 }
0x11ae   :  { %v2699_v37 = vmul.f32 %v4595_v36, %v4579_v7 }
0x11b0   :  { %4394 = vmatmul.mubr.msk.f32.vlgmr.msra.gmra.mrb[34].mxu0 %vm314_vm3, %v2699_v37 }
0x11b1   :  { %v4597_v39 = vpop.eup %4596  ;;  %4402 = vmatpush3.msra.mxu0 %v2877_v29  ;;  %4403 = vmatprep.mubr.msk.f32.mxu0 %vm4659_vm2, %v4658_v53 }
0x11b2   :  { %v2875_v40 = vmul.f32 %v4597_v39, %v4581_v13  ;;  %v3385_v41 = vpop.xlane.xlu0 %3384  ;;  %4411 = vmatprep.subr.mxu0 %v4658_v53  ;;  %v4599_v43 = vpop.eup %4598 }
0x11b3   :  { %4602 = vrcp.f32 %v3385_v41  ;;  %v3043_v44 = vmul.f32 %v4599_v43, %v5309_v6 }
0x11b4   :  { %4404 = vmatmul.mubr.msk.f32.vlgmr.msra.gmra.mrb[36].mxu0 %vm314_vm3, %v2875_v40 }
0x11b5   :  { %4412 = vmatpush3.msra.mxu0 %v3045_v30  ;;  %4413 = vmatprep.mubr.msk.f32.mxu0 %vm4659_vm2, %v4658_v53  ;;  %v4601_v45 = vpop.eup %4600 }
0x11b6   :  { %4421 = vmatprep.subr.mxu0 %v4658_v53  ;;  %v3215_v47 = vmul.f32 %v4601_v45, %v5314_v15  ;;  %v3389_v48 = vpop.permute.xlu0 %3388  ;;  %v4090_v15 = vld [vmem:[%s5492_s11 + $0x1] ss:$0 sm:$0xff] }
0x11b7   :  { %v4096_v45 = vld [vmem:[%s5493_s12 + $0x1] ss:$0 sm:$0xff] }
0x11b8   :  { %4414 = vmatmul.mubr.msk.f32.vlgmr.msra.gmra.mrb[38].mxu0 %vm314_vm3, %v3043_v44 }
0x11b9   :  { %4422 = vmatpush3.msra.mxu0 %v3217_v46  ;;  %4423 = vmatprep.mubr.msk.f32.mxu0 %vm4659_vm2, %v4658_v53 }
0x11ba   :  { %4431 = vmatprep.subr.mxu0 %v4658_v53 }
0x11bc   :  { %4424 = vmatmul.mubr.msk.f32.vlgmr.msra.gmra.mrb[40].mxu0 %vm314_vm3, %v3215_v47 }
0x11bd   :  { %v4603_v49 = vpop.eup %4602  ;;  %4432 = vmatpush3.msra.mxu0 %v3389_v48  ;;  %4433 = vmatprep.mubr.msk.f32.mxu0 %vm4659_vm2, %v4658_v53 }
0x11be   :  { %v3387_v50 = vmul.f32 %v4603_v49, %v5318_v17  ;;  %4444 = vmatprep.subr.bf16.mxu0 %v4658_v53 }
0x11c0   :  { %4434 = vmatmul.mubr.msk.f32.vlgmr.msra.gmra.mrb[42].mxu0 %vm314_vm3, %v3387_v50  ;;  %v4097_v50 = vld [vmem:[%s5494_s13 + $0x1] ss:$0 sm:$0xff] }
0x11c1   :  { %4448 = vmatprep.mubr.msk.bf16.mxu0 %vm4659_vm2, %v4658_v53 }
0x124d   :  { %v2260_v62 = vpop.f32.mrb[28].mxu0 }
0x124e   :  { %2264 = vst.msk [vmem:[#allocation3] sm:$0xff] %vm314_vm3, %v2260_v62  ;;  %v4365_v51 = vpop.f32.mrb[29].mxu0 }
0x1251   :  { %v2428_v52 = vpop.f32.mrb[30].mxu0 }
0x1252   :  { %2433 = vrot.lane.b32.xlu1 %v2428_v52, %s4671_s15  ;;  %v4375_v38 = vpop.f32.mrb[31].mxu0 }
0x1255   :  { %v2600_v54 = vpop.f32.mrb[32].mxu0 }
0x1256   :  { %2605 = vrot.lane.b32.xlu1 %v2600_v54, %s4672_s29  ;;  %v4385_v55 = vpop.f32.mrb[33].mxu0  ;;  %v4516_v54 = vld [vmem:[%s5547_s22 + $0x20] sm:$0xff]  }
0x1257   :  { %v4517_v55 = vld [vmem:[%s5547_s22 + $0x28] sm:$0xff]  }
0x1283   :  { %v2772_v56 = vpop.f32.mrb[34].mxu0 }
0x1284   :  { %2777 = vrot.lane.b32.xlu1 %v2772_v56, %s4673_s17  ;;  %v4395_v57 = vpop.f32.mrb[35].mxu0  ;;  %v4518_v56 = vld [vmem:[%s5547_s22 + $0x30] sm:$0xff]  }
0x1285   :  { %v4519_v57 = vld [vmem:[%s5547_s22 + $0x38] sm:$0xff]  }
0x1287   :  { %v2948_v58 = vpop.f32.mrb[36].mxu0 }
0x1288   :  { %2952 = vst.msk [vmem:[#allocation3 + $0x8] sm:$0xff] %vm314_vm3, %v2948_v58  ;;  %v4405_v60 = vpop.f32.mrb[37].mxu0  ;;  %v4103_v58 = vld [vmem:[%s5548_s30 + $0x1] ss:$0 sm:$0xff] }
0x128b   :  { %v3116_v63 = vpop.f32.mrb[38].mxu0 }
0x128c   :  { %3121 = vrot.lane.b32.xlu0 %v3116_v63, %s4671_s15  ;;  %v4415_v0 = vpop.f32.mrb[39].mxu0  ;;  %s5555_s15 = sld [smem:[#allocation27_spill]] }
0x128f   :  { %v3288_v1 = vpop.f32.mrb[40].mxu0 }
0x1290   :  { %3293 = vrot.lane.b32.xlu0 %v3288_v1, %s4672_s29  ;;  %v4425_v2 = vpop.f32.mrb[41].mxu0  ;;  %s4674_s29 = smov [#allocation7]  }
0x1291   :  { %s3959_s12 = sshll.u32 %s4674_s29, 4  ;;  %s3960_s12 = int_to_ptr.vmem [resolvable:$true] %s3959_s12 }
0x1292   :  { %p4635_p6 = scmp.lt.s32.totalorder %s3960_s12, %s3960_s12 }
0x1293   :  { %v3460_v3 = vpop.f32.mrb[42].mxu0 }
0x1294   :  { %3465 = vrot.lane.b32.xlu0 %v3460_v3, %s4673_s17  ;;  %v4435_v4 = vpop.f32.mrb[43].mxu0  ;;  %s4630_s17 = scalar_lea.vmem %s3960_s12, 32 }
0x1295   :  { %p4631_p5 = scmp.ne.s32.totalorder %s3960_s12, %s4630_s17  ;;  %p4636_p7 = scmp.lt.s32.totalorder %s4630_s17, %s4630_s17 }
0x1297   :  { %p4637_p8 = por %p4636_p7, %p4635_p6 }
0x1299   :  { %p4638_p9 = pnand %p4637_p8, %p4631_p5 }
0x12c4   :  { %v2434_v7 = vpop.permute.xlu1 %2433 }
0x12c5   :  { %2436 = vst.msk [vmem:[#allocation3] sm:$0xff] %vm654_vm4, %v2434_v7 }
0x12c8   :  { %v2606_v13 = vpop.permute.xlu1 %2605 }
0x12c9   :  { %2608 = vst.msk [vmem:[#allocation3] sm:$0xff] %vm827_vm5, %v2606_v13 }
0x12f6   :  { %v2778_v8 = vpop.permute.xlu1 %2777 }
0x12f7   :  { %2780 = vst.msk [vmem:[#allocation3] sm:$0xff] %vm1000_vm6, %v2778_v8 }
0x12fe   :  { %v3122_v5 = vpop.permute.xlu0 %3121  ;;  %v3469_v11 = vld [vmem:[#allocation3] sm:$0xff] }
0x12ff   :  { %3124 = vst.msk [vmem:[#allocation3 + $0x8] sm:$0xff] %vm654_vm4, %v3122_v5 }
0x1302   :  { %v3294_v6 = vpop.permute.xlu0 %3293 }
0x1303   :  { %3296 = vst.msk [vmem:[#allocation3 + $0x8] sm:$0xff] %vm827_vm5, %v3294_v6 }
0x1306   :  { %v3466_v9 = vpop.permute.xlu0 %3465 }
0x1307   :  { %3468 = vst.msk [vmem:[#allocation3 + $0x8] sm:$0xff] %vm1000_vm6, %v3466_v9 }
0x130e   :  { %v3470_v12 = vld [vmem:[#allocation3 + $0x8] sm:$0xff] }
0x130f   :  { %v3471_v14 = vpack.c.bf16 %v3470_v12, %v3469_v11 }
0x1311   :  { %4441 = vmatmul.mubr.msk.bf16.vlgmr.msra.gmra.mrb[40].mxu1 %vm198_vm1, %v3471_v14 }
0x1312   :  { %4460 = vmatprep.mubr.msk.bf16.mxu1 %vm4659_vm2, %v4658_v53  ;;  %4453 = vmatpush3.bf16.msra.mxu1 %v4516_v54 }
0x1313   :  { %4454 = vmatprep.subr.bf16.mxu1 %v4658_v53 }
0x1316   :  { %4455 = vmatpush3.bf16.msra.mxu1 %v4517_v55 }
0x1317   :  { %4456 = vmatprep.subr.bf16.mxu1 %v4658_v53 }
0x131a   :  { %4457 = vmatpush3.bf16.msra.mxu1 %v4518_v56 }
0x131b   :  { %4458 = vmatprep.subr.bf16.mxu1 %v4658_v53 }
0x131e   :  { %4459 = vmatpush3.bf16.msra.mxu1 %v4519_v57  ;;  %v4125_v57 = vld [vmem:[%s5551_s7 + $0x1] ss:$0 sm:$0xff] }
0x13e4   :  { %v3534_v16 = vpop.f32.mrb[40].mxu1 }
0x13e5   :  { %v3535_v17 = vadd.f32 %v4090_v15, %v3534_v16  ;;  %v4442_v18 = vpop.f32.mrb[41].mxu1 }
0x13e6   :  { %v3537_v19 = vpop.f32.mrb[42].mxu1 }
0x13e7   :  { %v3541_v20 = vadd.f32 %v3535_v17, %v5188_v34  ;;  %v3538_v21 = vadd.f32 %v4090_v15, %v3537_v19  ;;  %v4443_v22 = vpop.f32.mrb[43].mxu1 }
0x13e8   :  { %v4116_v22 = vld [vmem:[%s5549_s18 + $0x1] ss:$0 sm:$0xff] }
0x13e9   :  { %v3542_v23 = vadd.f32 %v3538_v21, %v5190_v35  ;;  %v3547_v24 = vsel %vm198_vm1, %v3541_v20, 0.0  ;;  %v4514_v35 = vld [vmem:[%s5495_s14 + $0x10] sm:$0xff]  }
0x13ea   :  { %3548 = vadd.xlane.f32.xlu1 %v3547_v24  ;;  %4445 = vmatpush3.bf16.msra.mxu0 %v4514_v35 }
0x13eb   :  { %v3550_v25 = vsel %vm198_vm1, %v3542_v23, 0.0  ;;  %4446 = vmatprep.subr.bf16.mxu0 %v4658_v53 }
0x13ec   :  { %3551 = vadd.xlane.f32.xlu0 %v3550_v25 }
0x13ee   :  { %4447 = vmatpush3.bf16.msra.mxu0 %v4515_v10 }
0x13ef   :  { %4464 = vmatprep.subr.bf16.mxu0 %v4658_v53 }
0x1477   :  { %v3549_v26 = vpop.xlane.xlu1 %3548 }
0x1478   :  { %v3553_v27 = vmul.f32 0.03125, %v3549_v26 }
0x1479   :  { %v3552_v42 = vpop.xlane.xlu0 %3551 }
0x147a   :  { %v3555_v28 = vsub.f32 %v3541_v20, %v3553_v27  ;;  %v3554_v29 = vmul.f32 0.03125, %v3552_v42 }
0x147c   :  { %v3556_v30 = vsub.f32 %v3542_v23, %v3554_v29  ;;  %v3557_v31 = vmul.f32 %v3555_v28, %v3555_v28 }
0x147e   :  { %v3559_v32 = vsel %vm198_vm1, %v3557_v31, 0.0  ;;  %v3558_v34 = vmul.f32 %v3556_v30, %v3556_v30 }
0x147f   :  { %3560 = vadd.xlane.f32.xlu0 %v3559_v32 }
0x1480   :  { %v3562_v33 = vsel %vm198_vm1, %v3558_v34, 0.0 }
0x1481   :  { %3563 = vadd.xlane.f32.xlu1 %v3562_v33 }
0x150c   :  { %v3561_v36 = vpop.xlane.xlu0 %3560 }
0x150d   :  { %v3565_v37 = vmul.f32 0.03125, %v3561_v36 }
0x150e   :  { %v3564_v39 = vpop.xlane.xlu1 %3563 }
0x150f   :  { %v3567_v40 = vadd.f32 1e-12, %v3565_v37  ;;  %v3566_v41 = vmul.f32 0.03125, %v3564_v39 }
0x1511   :  { %4604 = vrsqrt.f32 %v3567_v40  ;;  %v3568_v43 = vadd.f32 1e-12, %v3566_v41 }
0x1513   :  { %4606 = vrsqrt.f32 %v3568_v43  ;;  %v4520_v43 = vld [vmem:[%s5552_s5] sm:$0xff]  }
0x151b   :  { %v4605_v44 = vpop.eup %4604 }
0x151c   :  { %v3571_v46 = vmul.f32 %v4605_v44, %v3555_v28  ;;  %v4521_v44 = vld [vmem:[%s5552_s5 + $0x8] sm:$0xff]  }
0x151d   :  { %v4607_v47 = vpop.eup %4606 }
0x151e   :  { %v3579_v48 = vmul.f32 %v4096_v45, %v3571_v46  ;;  %v3572_v49 = vmul.f32 %v4607_v47, %v3556_v30 }
0x1520   :  { %v3580_v62 = vmul.f32 %v4096_v45, %v3572_v49  ;;  %v3587_v51 = vadd.f32 %v4097_v50, %v3579_v48 }
0x1522   :  { %v3588_v52 = vadd.f32 %v4097_v50, %v3580_v62 }
0x1524   :  { %v3589_v38 = vpack.c.bf16 %v3588_v52, %v3587_v51 }
0x1526   :  { %4449 = vmatmul.mubr.msk.bf16.vlgmr.msra.gmra.mrb[44].mxu0 %vm198_vm1, %v3589_v38  ;;  %v4124_v38 = vld [vmem:[%s5550_s20 + $0x1] ss:$0 sm:$0xff] }
0x1527   :  { %4468 = vmatprep.mubr.msk.bf16.mxu0 %vm4659_vm2, %v4658_v53  ;;  %4465 = vmatpush3.bf16.msra.mxu0 %v4520_v43 }
0x1528   :  { %4466 = vmatprep.subr.bf16.mxu0 %v4658_v53 }
0x152b   :  { %4467 = vmatpush3.bf16.msra.mxu0 %v4521_v44 }
0x152c   :  { %4472 = vmatprep.subr.bf16.mxu0 %v4658_v53 }
0x15f9   :  { %v3652_v59 = vpop.f32.mrb[44].mxu0 }
0x15fa   :  { %v3653_v60 = vadd.f32 %v4103_v58, %v3652_v59  ;;  %v4450_v61 = vpop.f32.mrb[45].mxu0 }
0x15fb   :  { %v3655_v63 = vpop.f32.mrb[46].mxu0 }
0x15fc   :  { %v3661_v0 = vmul.f32 0.044715, %v3653_v60  ;;  %v3656_v1 = vadd.f32 %v4103_v58, %v3655_v63  ;;  %v4451_v2 = vpop.f32.mrb[47].mxu0  ;;  %v3659_v16 = vmul.f32 0.5, %v3653_v60 }
0x15fd   :  { %v4126_v2 = vld [vmem:[%s5554_s3] ss:$0 sm:$0xff] }
0x15fe   :  { %v3663_v3 = vmul.f32 %v3661_v0, %v3653_v60  ;;  %v3662_v4 = vmul.f32 0.044715, %v3656_v1  ;;  %v3660_v17 = vmul.f32 0.5, %v3656_v1  ;;  %v4522_v0 = vld [vmem:[%s5553_s23] sm:$0xff]  }
0x1600   :  { %v3665_v7 = vmul.f32 %v3663_v3, %v3653_v60  ;;  %v3664_v13 = vmul.f32 %v3662_v4, %v3656_v1 }
0x1602   :  { %v3667_v8 = vadd.f32 %v3665_v7, %v3653_v60  ;;  %v3666_v5 = vmul.f32 %v3664_v13, %v3656_v1 }
0x1604   :  { %v3669_v6 = vmul.f32 0.7978846, %v3667_v8  ;;  %v3668_v9 = vadd.f32 %v3666_v5, %v3656_v1  ;;  %v4523_v1 = vld [vmem:[%s5553_s23 + $0x8] sm:$0xff]  }
0x1606   :  { %4608 = vtanh.f32 %v3669_v6  ;;  %v3670_v11 = vmul.f32 0.7978846, %v3668_v9 }
0x1608   :  { %4610 = vtanh.f32 %v3670_v11 }
0x1610   :  { %v4609_v12 = vpop.eup %4608 }
0x1611   :  { %v3673_v14 = vadd.f32 1.0, %v4609_v12 }
0x1612   :  { %v4611_v15 = vpop.eup %4610 }
0x1613   :  { %v3674_v18 = vadd.f32 1.0, %v4611_v15  ;;  %v3675_v19 = vmul.f32 %v3673_v14, %v3659_v16 }
0x1615   :  { %v3676_v20 = vmul.f32 %v3674_v18, %v3660_v17 }
0x1617   :  { %v3677_v21 = vpack.c.bf16 %v3676_v20, %v3675_v19 }
0x1619   :  { %4461 = vmatmul.mubr.msk.bf16.vlgmr.msra.gmra.mrb[44].mxu1 %vm1932_vm7, %v3677_v21 }
0x16ec   :  { %v3756_v23 = vpop.f32.mrb[44].mxu1 }
0x16ed   :  { %v3757_v24 = vadd.f32 %v4116_v22, %v3756_v23  ;;  %v4462_v25 = vpop.f32.mrb[45].mxu1 }
0x16ee   :  { %v3759_v26 = vpop.f32.mrb[46].mxu1 }
0x16ef   :  { %v3763_v27 = vadd.f32 %v3757_v24, %v3587_v51  ;;  %v3760_v42 = vadd.f32 %v4116_v22, %v3759_v26  ;;  %v4463_v28 = vpop.f32.mrb[47].mxu1 }
0x16f1   :  { %v3764_v29 = vadd.f32 %v3760_v42, %v3588_v52  ;;  %v3769_v30 = vsel %vm198_vm1, %v3763_v27, 0.0 }
0x16f2   :  { %3770 = vadd.xlane.f32.xlu1 %v3769_v30 }
0x16f3   :  { %v3772_v31 = vsel %vm198_vm1, %v3764_v29, 0.0 }
0x16f4   :  { %3773 = vadd.xlane.f32.xlu0 %v3772_v31 }
0x177f   :  { %v3771_v32 = vpop.xlane.xlu1 %3770 }
0x1780   :  { %v3775_v34 = vmul.f32 0.03125, %v3771_v32 }
0x1781   :  { %v3774_v33 = vpop.xlane.xlu0 %3773 }
0x1782   :  { %v3777_v35 = vsub.f32 %v3763_v27, %v3775_v34  ;;  %v3776_v10 = vmul.f32 0.03125, %v3774_v33 }
0x1784   :  { %v3778_v36 = vsub.f32 %v3764_v29, %v3776_v10  ;;  %v3779_v37 = vmul.f32 %v3777_v35, %v3777_v35 }
0x1786   :  { %v3781_v39 = vsel %vm198_vm1, %v3779_v37, 0.0  ;;  %v3780_v40 = vmul.f32 %v3778_v36, %v3778_v36 }
0x1787   :  { %3782 = vadd.xlane.f32.xlu1 %v3781_v39 }
0x1788   :  { %v3784_v41 = vsel %vm198_vm1, %v3780_v40, 0.0 }
0x1789   :  { %3785 = vadd.xlane.f32.xlu0 %v3784_v41 }
0x1814   :  { %v3783_v45 = vpop.xlane.xlu1 %3782 }
0x1815   :  { %v3787_v46 = vmul.f32 0.03125, %v3783_v45 }
0x1816   :  { %v3786_v47 = vpop.xlane.xlu0 %3785 }
0x1817   :  { %v3789_v48 = vadd.f32 1e-12, %v3787_v46  ;;  %v3788_v49 = vmul.f32 0.03125, %v3786_v47 }
0x1819   :  { %4612 = vrsqrt.f32 %v3789_v48  ;;  %v3790_v50 = vadd.f32 1e-12, %v3788_v49 }
0x181b   :  { %4614 = vrsqrt.f32 %v3790_v50 }
0x1823   :  { %v4613_v62 = vpop.eup %4612 }
0x1824   :  { %v3793_v51 = vmul.f32 %v4613_v62, %v3777_v35 }
0x1825   :  { %v4615_v52 = vpop.eup %4614 }
0x1826   :  { %v3794_v54 = vmul.f32 %v4615_v52, %v3778_v36  ;;  %v3801_v55 = vmul.f32 %v4124_v38, %v3793_v51 }
0x1828   :  { %v3802_v56 = vmul.f32 %v4124_v38, %v3794_v54  ;;  %v3809_v59 = vadd.f32 %v4125_v57, %v3801_v55 }
0x182a   :  { %v3810_v58 = vadd.f32 %v4125_v57, %v3802_v56 }
0x182c   :  { %v3812_v60 = vrot.slane %v3810_v58, 7 }
0x182e   :  { %v3815_v61 = vsel %vm3814_vm8, %v3809_v59, %v3812_v60 }
0x182f   :  { %v3816_v63 = vpack.c.bf16 %v3815_v61, %v3815_v61 }
0x1831   :  { %4469 = vmatmul.mubr.msk.bf16.vlgmr.msra.gmra.mrb[48].mxu0 %vm198_vm1, %v3816_v63 }
0x1832   :  { %4476 = vmatprep.mubr.msk.bf16.mxu0 %vm4659_vm2, %v4658_v53  ;;  %4473 = vmatpush3.bf16.msra.mxu0 %v4522_v0 }
0x1833   :  { %4474 = vmatprep.subr.bf16.mxu0 %v4658_v53  ;;  %v4130_v53 = vld [vmem:[%s5555_s15] ss:$0 sm:$0xff] }
0x1836   :  { %4475 = vmatpush3.bf16.msra.mxu0 %v4523_v1 }
0x1904   :  { %v3877_v3 = vpop.f32.mrb[48].mxu0 }
0x1905   :  { %v3878_v4 = vadd.f32 %v4126_v2, %v3877_v3  ;;  %v4470_v7 = vpop.f32.mrb[49].mxu0 }
0x1906   :  { %v3880_v13 = vpop.f32.mrb[50].mxu0 }
0x1907   :  { %4616 = vtanh.f32 %v3878_v4  ;;  %v4471_v8 = vpop.f32.mrb[51].mxu0 }
0x1911   :  { %v4617_v5 = vpop.eup %4616 }
0x1912   :  { %v3884_v6 = vpack.c.bf16 %v4617_v5, %v4617_v5 }
0x1914   :  { %4477 = vmatmul.mubr.msk.bf16.vlgmr.msra.gmra.mrb[52].mxu0 %vm198_vm1, %v3884_v6 }
0x19e7   :  { %v3945_v9 = vpop.f32.mrb[52].mxu0 }
0x19e8   :  { %v3946_v11 = vadd.f32 %v4130_v53, %v3945_v9  ;;  %v4478_v12 = vpop.f32.mrb[53].mxu0 }
0x19e9   :  { %v3948_v14 = vpop.f32.mrb[54].mxu0 }
0x19ea   :  { %v4479_v15 = vpop.f32.mrb[55].mxu0  ;;  %3952 = vst.msk [vmem:[#allocation7] sm:$0x3] %vm3951_vm9, %v3946_v11 }
0x19eb   :  { %4641 = shalt.err (!%p4638_p9)
}
0x19ec   :  { %s5556_s2 = sld [smem:[#allocation28_spill]] }
0x19f2   :  { %s4642_s25 = scalar_lea.hbm %s5556_s2, 32 }
0x19f3   :  { %p4643_p10 = scmp.ne.s32.totalorder %s5556_s2, %s4642_s25  ;;  %p4646_p11 = scmp.lt.u32.totalorder %s4642_s25, %s5556_s2 }
0x19f5   :  { %p4648_p12 = pnand %p4646_p11, %p4643_p10 }
0x19f7   :  { %4651 = shalt.err (!%p4648_p12)
}
0x19f8   :  { %3962 = dma.vmem_to_hbm [thread:$0]  %s3960_s12, 32, %s5556_s2, [#allocation5]  }
0x19f9   :  { %4654 = dma.done.wait [#allocation5], 32  }
0x19fa   :  { %4655 = vsyncadd [#allocation5], 4294967264 }
0x19fb   :  { %3966 = vsyncpa [#allocation5], 1 }
0x19fc   :  { %3967 = vsyncpa [#allocation6], 1 }

</bundles_post_ra>
